<compile_context>
chip_gen: v7x
topology: tpu7x:2x2x1
jax: 0.10.0
libtpu: 0.0.40
codegen_flags: <defaults>
</compile_context>

<pallas_src>
import math
from math import gcd

import jax
import jax.numpy as jnp
from jax.experimental import pallas as pl
from jax.experimental.pallas import tpu as pltpu

PI = math.pi
HALF_PI = 0.5 * math.pi
TWO_PI = 2.0 * math.pi
INV_TWO_PI = 1.0 / TWO_PI

CTX_IN_PAD = 8          # first-layer contraction dim padded to 8 (clean bf16 MXU shape)
SLAB_ROWS = 8           # [z_even, z_odd, phi0, m1_upd, m2_upd, last_site, 0, 0]
OUT_ROWS = 3            # [phi_even, phi_odd, ldj_per_site]
MAX_TILE_M = 8192       # lanes per grid step (per-tile live VMEM is a few MiB at most)
TARGET_GRID_STEPS = 4   # aim for >=4 steps when the problem is big enough (v7x 2-TC sharding)


def _round_up(x, m):
    return -(-x // m) * m


def _lcm(a, b):
    return a * b // gcd(a, b)


def _choose_tile_m(mh, nh):
    # Tile must be a multiple of 128 (lane tiling) AND of nh, so the in-tile lane
    # rolls that fetch lattice neighbours never cross a tile boundary.
    unit = _lcm(128, nh)
    max_units = max(1, MAX_TILE_M // unit)
    want = -(-mh // TARGET_GRID_STEPS)
    units = min(max(1, -(-want // unit)), max_units)
    return units * unit


def _mod_2pi(t):
    # x mod 2*pi in [0, 2*pi), robust to fp rounding at the boundary.
    r = t - TWO_PI * jnp.floor(t * INV_TWO_PI)
    r = jnp.where(r < 0.0, r + TWO_PI, r)
    return jnp.where(r >= TWO_PI, r - TWO_PI, r)


# ---------------- fused Pallas kernel: all coupling layers in one call ----------------

def make_fused_flow_kernel(n_layers, n_linear, n_mixture, weighted, min_weight, nh):
    """Kernel refs:
        slab (8, TM)  rows: [z_even, z_odd, phi0, m1_upd, m2_upd, last_site, 0, 0]
        then per layer: W1^T(bf16), b1(f32), ..., Wn^T(bf16), bn(f32)   (VMEM resident)
        out (3, TM)   rows: [phi_even, phi_odd, ldj_per_site]
    Lane p = b * nh + j maps to batch b, half-lattice index j (even half: site 2j,
    odd half: site 2j+1)."""
    K = n_mixture
    refs_per_layer = 2 * n_linear

    def kernel(*refs):
        slab_ref = refs[0]
        w_refs = refs[1:1 + n_layers * refs_per_layer]
        out_ref = refs[1 + n_layers * refs_per_layer]
        tm = slab_ref.shape[1]

        slab = slab_ref[...]                              # (8, TM) f32
        phi0 = slab[2:3, :]
        m1_upd = slab[3:4, :] > 0.5                       # even sites, excl. frame site 0 / padding
        m2_upd = slab[4:5, :] > 0.5                       # all odd sites (excl. padding)
        last_site = slab[5:6, :] > 0.5                    # j == nh-1 of each batch row

        # global frame shift: phi = mod_2pi(z - phi0 + pi)
        ev = _mod_2pi(slab[0:1, :] - phi0 + PI)           # even sites  z[2j]
        od = _mod_2pi(slab[1:2, :] - phi0 + PI)           # odd  sites  z[2j+1]
        ldj = jnp.zeros_like(ev)

        for l in range(n_layers):
            lw = w_refs[l * refs_per_layer:(l + 1) * refs_per_layer]
            if l % 2 == 0:
                # mask m1: transform even sites (except site 0); neighbours are odd sites
                sel, upd = ev, m1_upd
                nb_p = od                                  # z[2j+1]
                nb_m = pltpu.roll(od, 1, axis=1)           # z[2j-1] (junk at j=0: masked out)
            else:
                # mask m2: transform all odd sites; neighbours are even sites
                sel, upd = od, m2_upd
                nb_m = ev                                  # z[2j]
                shifted = pltpu.roll(ev, tm - 1, axis=1)   # z[2j+2]  (roll left by one lane)
                wrapped = pltpu.roll(ev, nh - 1, axis=1)   # z[0] of the same batch (lattice wrap)
                nb_p = jnp.where(last_site, wrapped, shifted)

            # ---- context features in-kernel: as_vector([z_{i+1}, z_{i-1}]) ----
            ang = jnp.concatenate([nb_p, nb_m], axis=0)                     # (2, TM)
            feats = jnp.concatenate([jnp.cos(ang), jnp.sin(ang)], axis=0)   # (4, TM)
            h = jnp.concatenate([feats, jnp.zeros_like(feats)], axis=0)     # pad to (8, TM)
            h = h.astype(jnp.bfloat16)

            # ---- context MLP (bf16 MXU, f32 accumulation) ----
            for i in range(n_linear):
                w = lw[2 * i][...]                         # (out, in)  bf16
                b = lw[2 * i + 1][...]                     # (out, 1)   f32
                h = jnp.dot(w, h, preferred_element_type=jnp.float32) + b
                if i < n_linear - 1:
                    h = jnp.tanh(h).astype(jnp.bfloat16)
            params = h                                     # (P, TM) f32

            # ---- mixture-of-sigmoids circular transform (EUP args batched >=8 rows) ----
            x = sel * INV_TWO_PI                           # (1, TM) in [0, 1)
            alog = params[0:K, :]
            llog = params[K:2 * K, :]
            if weighted:
                wlog = params[2 * K:3 * K, :]
                wmax = jnp.max(wlog, axis=0, keepdims=True)            # sublane (XLU) reduce
                eargs = jnp.concatenate([-jnp.abs(alog), -llog, wlog - wmax], axis=0)
            else:
                eargs = jnp.concatenate([-jnp.abs(alog), -llog], axis=0)
            E = jnp.exp(eargs)                                          # one batched EUP exp
            a = jnp.maximum(alog, 0.0) + jnp.log(1.0 + E[0:K, :]) + 1e-2   # softplus + floor
            loc = 1.0 / (1.0 + E[K:2 * K, :])                           # sigmoid(llog)

            sargs = jnp.concatenate([a * (x - loc), -a * loc, a * (1.0 - loc)], axis=0)
            S = 0.5 * (jnp.tanh(0.5 * sargs) + 1.0)                     # one batched EUP tanh
            g, g0, g1 = S[0:K, :], S[K:2 * K, :], S[2 * K:3 * K, :]
            inv_den = 1.0 / jnp.maximum(g1 - g0, 1e-6)                  # clamped denominator
            hc = (g - g0) * inv_den                                     # h(0)=0, h(1)=1
            dh = (a * inv_den) * (g * (1.0 - g))

            if weighted:
                e = E[2 * K:3 * K, :]
                s = jnp.sum(e, axis=0, keepdims=True)                   # sublane (XLU) reduce
                wmix = min_weight + (1.0 - K * min_weight) * e * pl.reciprocal(s, approx=True)
                y = jnp.sum(wmix * hc, axis=0, keepdims=True)
                dy = jnp.sum(wmix * dh, axis=0, keepdims=True)
            else:
                y = jnp.sum(hc, axis=0, keepdims=True) * (1.0 / K)
                dy = jnp.sum(dh, axis=0, keepdims=True) * (1.0 / K)

            phi_new = TWO_PI * y
            ldj_new = jnp.log(jnp.maximum(dy, 1e-30))                   # clamp: avoid -inf

            if l % 2 == 0:
                ev = jnp.where(upd, phi_new, ev)
            else:
                od = jnp.where(upd, phi_new, od)
            ldj = ldj + jnp.where(upd, ldj_new, 0.0)

            # inter-layer frame rotation (applied to every site, as in the reference)
            ev = _mod_2pi(ev + HALF_PI)
            od = _mod_2pi(od + HALF_PI)

        # undo the global frame shift
        ev = _mod_2pi(ev + phi0 - PI)
        od = _mod_2pi(od + phi0 - PI)
        out_ref[...] = jnp.concatenate([ev, od, ldj], axis=0)           # single lane-dense store

    return kernel


def fused_flow_call(slab, weights_flat, n_layers, n_linear, n_mixture, weighted,
                    min_weight, nh, tile_m):
    rows, mh_pad = slab.shape
    kernel = make_fused_flow_kernel(n_layers, n_linear, n_mixture, weighted, min_weight, nh)

    in_specs = [pl.BlockSpec((rows, tile_m), lambda i: (0, i))]
    for w in weights_flat:
        # constant index map -> weights stay VMEM resident across grid steps
        in_specs.append(pl.BlockSpec(w.shape, lambda i: (0, 0)))
    out_specs = pl.BlockSpec((OUT_ROWS, tile_m), lambda i: (0, i))

    # advisory cost estimate (helps XLA schedule the surrounding glue)
    mm_flops = 0
    hidden = 0
    for l in range(n_layers):
        for i in range(n_linear):
            o, k = weights_flat[l * 2 * n_linear + 2 * i].shape
            mm_flops += 2 * mh_pad * o * k
            if i < n_linear - 1:
                hidden += o
    weight_bytes = sum(int(w.size) * w.dtype.itemsize for w in weights_flat)
    K = n_mixture
    cost = pl.CostEstimate(
        flops=int(mm_flops + n_layers * mh_pad * 80 * K),
        transcendentals=int(mh_pad * (hidden + n_layers * (5 + 7 * K))),
        bytes_accessed=int(4 * (rows + OUT_ROWS) * mh_pad + weight_bytes),
    )

    return pl.pallas_call(
        kernel,
        out_shape=jax.ShapeDtypeStruct((OUT_ROWS, mh_pad), jnp.float32),
        grid_spec=pltpu.PrefetchScalarGridSpec(
            num_scalar_prefetch=0,
            grid=(mh_pad // tile_m,),
            in_specs=in_specs,
            out_specs=out_specs,
        ),
        compiler_params=pltpu.CompilerParams(
            dimension_semantics=("parallel",),     # shard lane tiles across TCs on v7x
            vmem_limit_bytes=32 * 1024 * 1024,     # explicit (v5e default is only 16 MiB)
        ),
        cost_estimate=cost,
    )(slab, *weights_flat)


# ---------------- weight preparation (transpose / pad / cast) ----------------

def prep_layer_weights(layer_w):
    """[W1(in,out), b1(1,out), ...] -> [W1^T(out,8) bf16, b1(out,1) f32, ...]."""
    n_linear = len(layer_w) // 2
    out = []
    for i in range(n_linear):
        w = jnp.asarray(layer_w[2 * i], jnp.float32)
        b = jnp.asarray(layer_w[2 * i + 1], jnp.float32)
        wt = w.T                                           # (out, in)
        if i == 0:
            assert wt.shape[1] <= CTX_IN_PAD
            wt = jnp.pad(wt, ((0, 0), (0, CTX_IN_PAD - wt.shape[1])))
        # NOTE: keep the last (hidden -> mixture-params) matrix in f32 instead if the
        # log-det needs tighter than ~1e-2 relative accuracy vs the f32 reference.
        out.append(wt.astype(jnp.bfloat16))
        out.append(b.reshape(-1, 1))
    return out


# ---------------- SpinCouplingFlow forward (one fused kernel + tiny glue) ----------------

def spin_coupling_flow_forward(z, transforms_params, n_mixture, weighted, min_weight):
    """z: (B, N, 1) angles in [0, 2*pi).  Returns (phi (B, N, 1), ldj_total (B,))."""
    B, N, _ = z.shape
    assert N % 2 == 0
    nh = N // 2
    mh = B * nh
    tile_m = _choose_tile_m(mh, nh)
    mh_pad = _round_up(mh, tile_m)

    n_layers = len(transforms_params)
    n_linear = len(transforms_params[0]) // 2
    weights_flat = []
    for lw in transforms_params:
        weights_flat += prep_layer_weights(lw)

    # checkerboard split; batch-major flattening: lane p = b * nh + j
    zr = z[..., 0].astype(jnp.float32).reshape(B, nh, 2)
    z_even = zr[:, :, 0].reshape(-1)                       # sites 0,2,4,...
    z_odd = zr[:, :, 1].reshape(-1)                        # sites 1,3,5,...
    phi0 = jnp.broadcast_to(zr[:, :1, 0], (B, nh)).reshape(-1)

    pos = jnp.arange(mh_pad, dtype=jnp.int32)
    jid = pos % nh
    valid = pos < mh
    m1_upd = (valid & (jid != 0)).astype(jnp.float32)      # even sites minus frame site 0
    m2_upd = valid.astype(jnp.float32)                     # all odd sites
    last = (jid == nh - 1).astype(jnp.float32)             # lattice-wrap fix-up positions

    pad = mh_pad - mh
    slab = jnp.stack([
        jnp.pad(z_even, (0, pad)),
        jnp.pad(z_odd, (0, pad)),
        jnp.pad(phi0, (0, pad)),
        m1_upd, m2_upd, last,
        jnp.zeros((mh_pad,), jnp.float32),
        jnp.zeros((mh_pad,), jnp.float32),
    ], axis=0)                                             # (8, mh_pad)

    out = fused_flow_call(slab, weights_flat, n_layers, n_linear, n_mixture,
                          weighted, min_weight, nh, tile_m)

    ev = out[0, :mh].reshape(B, nh)
    od = out[1, :mh].reshape(B, nh)
    phi = jnp.stack([ev, od], axis=-1).reshape(B, N)       # re-interleave checkerboard
    ldj_total = out[2, :mh].reshape(B, nh).sum(axis=1)     # per-batch log-det-Jacobian
    return phi[..., None], ldj_total


# ---------------- deterministic parameter construction ----------------

def init_transform_params(key, net_shape, in_dim, out_dim):
    sizes = [in_dim] + list(net_shape) + [out_dim]
    params = []
    for i in range(len(sizes) - 1):
        key, k1 = jax.random.split(key)
        w = jax.random.normal(k1, (sizes[i], sizes[i + 1]), jnp.float32)
        w = w * (1.0 / math.sqrt(sizes[i]))
        b = jnp.zeros((1, sizes[i + 1]), jnp.float32)
        params += [w, b]
    return key, params


if __name__ == "__main__":
    # module hyper-parameters (2*n_blocks coupling transforms)
    n_blocks = 2
    n_mixture = 4
    net_shape = [32, 32]
    weighted = True
    min_weight = 0.01
    ramp_pow = 2  # TODO(synk): unused, see note at top of file.

    B, N = 4, 16
    key = jax.random.PRNGKey(0)
    key, kz = jax.random.split(key)
    z = jax.random.uniform(kz, (B, N, 1), jnp.float32, 0.0, TWO_PI)

    n_params_per_site = (3 if weighted else 2) * n_mixture
    transforms_params = []
    for _ in range(2 * n_blocks):
        key, params = init_transform_params(key, net_shape, 4, n_params_per_site)
        transforms_params.append(params)

    fwd = jax.jit(lambda zz: spin_coupling_flow_forward(
        zz, transforms_params, n_mixture, weighted, min_weight))

    phi, ldj = fwd(z)
    phi = jax.block_until_ready(phi)
    ldj = jax.block_until_ready(ldj)

    assert phi.shape == z.shape and phi.dtype == jnp.float32
    assert ldj.shape == (B,)
    assert bool(jnp.all(jnp.isfinite(phi))) and bool(jnp.all(jnp.isfinite(ldj)))
    assert bool(jnp.all((phi >= 0.0) & (phi < TWO_PI + 1e-4)))
    print("KERNEL_OK")
</pallas_src>

<mosaic_0001>
module attributes {stable_mosaic.version = 11 : i64} {
  func.func @kernel(%arg0: i32, %arg1: memref<8x128xf32, #tpu.memory_space<vmem>>, %arg2: memref<32x8xbf16, #tpu.memory_space<vmem>>, %arg3: memref<32x1xf32, #tpu.memory_space<vmem>>, %arg4: memref<32x32xbf16, #tpu.memory_space<vmem>>, %arg5: memref<32x1xf32, #tpu.memory_space<vmem>>, %arg6: memref<12x32xbf16, #tpu.memory_space<vmem>>, %arg7: memref<12x1xf32, #tpu.memory_space<vmem>>, %arg8: memref<32x8xbf16, #tpu.memory_space<vmem>>, %arg9: memref<32x1xf32, #tpu.memory_space<vmem>>, %arg10: memref<32x32xbf16, #tpu.memory_space<vmem>>, %arg11: memref<32x1xf32, #tpu.memory_space<vmem>>, %arg12: memref<12x32xbf16, #tpu.memory_space<vmem>>, %arg13: memref<12x1xf32, #tpu.memory_space<vmem>>, %arg14: memref<32x8xbf16, #tpu.memory_space<vmem>>, %arg15: memref<32x1xf32, #tpu.memory_space<vmem>>, %arg16: memref<32x32xbf16, #tpu.memory_space<vmem>>, %arg17: memref<32x1xf32, #tpu.memory_space<vmem>>, %arg18: memref<12x32xbf16, #tpu.memory_space<vmem>>, %arg19: memref<12x1xf32, #tpu.memory_space<vmem>>, %arg20: memref<32x8xbf16, #tpu.memory_space<vmem>>, %arg21: memref<32x1xf32, #tpu.memory_space<vmem>>, %arg22: memref<32x32xbf16, #tpu.memory_space<vmem>>, %arg23: memref<32x1xf32, #tpu.memory_space<vmem>>, %arg24: memref<12x32xbf16, #tpu.memory_space<vmem>>, %arg25: memref<12x1xf32, #tpu.memory_space<vmem>>, %arg26: memref<3x128xf32, #tpu.memory_space<vmem>>) attributes {dimension_semantics = [#tpu.dimension_semantics<parallel>], iteration_bounds = array<i64: 1>, scalar_prefetch = 0 : i64, scratch_operands = 0 : i64, tpu.core_type = #tpu.core_type<tc>, window_params = [{transform_indices = @transform_0, window_bounds = array<i64: 8, 128>}, {pipeline_mode = #tpu.pipeline_mode<synchronous>, transform_indices = @transform_1, window_bounds = array<i64: 32, 8>}, {pipeline_mode = #tpu.pipeline_mode<synchronous>, transform_indices = @transform_2, window_bounds = array<i64: 32, 1>}, {pipeline_mode = #tpu.pipeline_mode<synchronous>, transform_indices = @transform_3, window_bounds = array<i64: 32, 32>}, {pipeline_mode = #tpu.pipeline_mode<synchronous>, transform_indices = @transform_4, window_bounds = array<i64: 32, 1>}, {pipeline_mode = #tpu.pipeline_mode<synchronous>, transform_indices = @transform_5, window_bounds = array<i64: 12, 32>}, {pipeline_mode = #tpu.pipeline_mode<synchronous>, transform_indices = @transform_6, window_bounds = array<i64: 12, 1>}, {pipeline_mode = #tpu.pipeline_mode<synchronous>, transform_indices = @transform_7, window_bounds = array<i64: 32, 8>}, {pipeline_mode = #tpu.pipeline_mode<synchronous>, transform_indices = @transform_8, window_bounds = array<i64: 32, 1>}, {pipeline_mode = #tpu.pipeline_mode<synchronous>, transform_indices = @transform_9, window_bounds = array<i64: 32, 32>}, {pipeline_mode = #tpu.pipeline_mode<synchronous>, transform_indices = @transform_10, window_bounds = array<i64: 32, 1>}, {pipeline_mode = #tpu.pipeline_mode<synchronous>, transform_indices = @transform_11, window_bounds = array<i64: 12, 32>}, {pipeline_mode = #tpu.pipeline_mode<synchronous>, transform_indices = @transform_12, window_bounds = array<i64: 12, 1>}, {pipeline_mode = #tpu.pipeline_mode<synchronous>, transform_indices = @transform_13, window_bounds = array<i64: 32, 8>}, {pipeline_mode = #tpu.pipeline_mode<synchronous>, transform_indices = @transform_14, window_bounds = array<i64: 32, 1>}, {pipeline_mode = #tpu.pipeline_mode<synchronous>, transform_indices = @transform_15, window_bounds = array<i64: 32, 32>}, {pipeline_mode = #tpu.pipeline_mode<synchronous>, transform_indices = @transform_16, window_bounds = array<i64: 32, 1>}, {pipeline_mode = #tpu.pipeline_mode<synchronous>, transform_indices = @transform_17, window_bounds = array<i64: 12, 32>}, {pipeline_mode = #tpu.pipeline_mode<synchronous>, transform_indices = @transform_18, window_bounds = array<i64: 12, 1>}, {pipeline_mode = #tpu.pipeline_mode<synchronous>, transform_indices = @transform_19, window_bounds = array<i64: 32, 8>}, {pipeline_mode = #tpu.pipeline_mode<synchronous>, transform_indices = @transform_20, window_bounds = array<i64: 32, 1>}, {pipeline_mode = #tpu.pipeline_mode<synchronous>, transform_indices = @transform_21, window_bounds = array<i64: 32, 32>}, {pipeline_mode = #tpu.pipeline_mode<synchronous>, transform_indices = @transform_22, window_bounds = array<i64: 32, 1>}, {pipeline_mode = #tpu.pipeline_mode<synchronous>, transform_indices = @transform_23, window_bounds = array<i64: 12, 32>}, {pipeline_mode = #tpu.pipeline_mode<synchronous>, transform_indices = @transform_24, window_bounds = array<i64: 12, 1>}, {transform_indices = @transform_25, window_bounds = array<i64: 3, 128>}]} {
    %c0 = arith.constant 0 : index
    %c0_0 = arith.constant 0 : index
    %0 = vector.load %arg1[%c0, %c0_0] : memref<8x128xf32, #tpu.memory_space<vmem>>, vector<8x128xf32>
    %1 = vector.extract_strided_slice %0 {offsets = [2, 0], sizes = [1, 128], strides = [1, 1]} : vector<8x128xf32> to vector<1x128xf32>
    %2 = vector.extract_strided_slice %0 {offsets = [3, 0], sizes = [1, 128], strides = [1, 1]} : vector<8x128xf32> to vector<1x128xf32>
    %cst = arith.constant 5.000000e-01 : f32
    %3 = vector.broadcast %cst : f32 to vector<1x128xf32>
    %4 = arith.cmpf ogt, %2, %3 : vector<1x128xf32>
    %5 = vector.extract_strided_slice %0 {offsets = [4, 0], sizes = [1, 128], strides = [1, 1]} : vector<8x128xf32> to vector<1x128xf32>
    %cst_1 = arith.constant 5.000000e-01 : f32
    %6 = vector.broadcast %cst_1 : f32 to vector<1x128xf32>
    %7 = arith.cmpf ogt, %5, %6 : vector<1x128xf32>
    %8 = vector.extract_strided_slice %0 {offsets = [5, 0], sizes = [1, 128], strides = [1, 1]} : vector<8x128xf32> to vector<1x128xf32>
    %cst_2 = arith.constant 5.000000e-01 : f32
    %9 = vector.broadcast %cst_2 : f32 to vector<1x128xf32>
    %10 = arith.cmpf ogt, %8, %9 : vector<1x128xf32>
    %11 = vector.extract_strided_slice %0 {offsets = [0, 0], sizes = [1, 128], strides = [1, 1]} : vector<8x128xf32> to vector<1x128xf32>
    %12 = arith.subf %11, %1 : vector<1x128xf32>
    %cst_3 = arith.constant 3.14159274 : f32
    %13 = vector.broadcast %cst_3 : f32 to vector<1x128xf32>
    %14 = arith.addf %12, %13 : vector<1x128xf32>
    %cst_4 = arith.constant 0.159154937 : f32
    %15 = vector.broadcast %cst_4 : f32 to vector<1x128xf32>
    %16 = arith.mulf %14, %15 : vector<1x128xf32>
    %17 = math.floor %16 : vector<1x128xf32>
    %cst_5 = arith.constant 6.28318548 : f32
    %18 = vector.broadcast %cst_5 : f32 to vector<1x128xf32>
    %19 = arith.mulf %18, %17 : vector<1x128xf32>
    %20 = arith.subf %14, %19 : vector<1x128xf32>
    %cst_6 = arith.constant 0.000000e+00 : f32
    %21 = vector.broadcast %cst_6 : f32 to vector<1x128xf32>
    %22 = arith.cmpf olt, %20, %21 : vector<1x128xf32>
    %cst_7 = arith.constant 6.28318548 : f32
    %23 = vector.broadcast %cst_7 : f32 to vector<1x128xf32>
    %24 = arith.addf %20, %23 : vector<1x128xf32>
    %25 = arith.select %22, %24, %20 : vector<1x128xi1>, vector<1x128xf32>
    %cst_8 = arith.constant 6.28318548 : f32
    %26 = vector.broadcast %cst_8 : f32 to vector<1x128xf32>
    %27 = arith.cmpf oge, %25, %26 : vector<1x128xf32>
    %cst_9 = arith.constant 6.28318548 : f32
    %28 = vector.broadcast %cst_9 : f32 to vector<1x128xf32>
    %29 = arith.subf %25, %28 : vector<1x128xf32>
    %30 = arith.select %27, %29, %25 : vector<1x128xi1>, vector<1x128xf32>
    %31 = vector.extract_strided_slice %0 {offsets = [1, 0], sizes = [1, 128], strides = [1, 1]} : vector<8x128xf32> to vector<1x128xf32>
    %32 = arith.subf %31, %1 : vector<1x128xf32>
    %cst_10 = arith.constant 3.14159274 : f32
    %33 = vector.broadcast %cst_10 : f32 to vector<1x128xf32>
    %34 = arith.addf %32, %33 : vector<1x128xf32>
    %cst_11 = arith.constant 0.159154937 : f32
    %35 = vector.broadcast %cst_11 : f32 to vector<1x128xf32>
    %36 = arith.mulf %34, %35 : vector<1x128xf32>
    %37 = math.floor %36 : vector<1x128xf32>
    %cst_12 = arith.constant 6.28318548 : f32
    %38 = vector.broadcast %cst_12 : f32 to vector<1x128xf32>
    %39 = arith.mulf %38, %37 : vector<1x128xf32>
    %40 = arith.subf %34, %39 : vector<1x128xf32>
    %cst_13 = arith.constant 0.000000e+00 : f32
    %41 = vector.broadcast %cst_13 : f32 to vector<1x128xf32>
    %42 = arith.cmpf olt, %40, %41 : vector<1x128xf32>
    %cst_14 = arith.constant 6.28318548 : f32
    %43 = vector.broadcast %cst_14 : f32 to vector<1x128xf32>
    %44 = arith.addf %40, %43 : vector<1x128xf32>
    %45 = arith.select %42, %44, %40 : vector<1x128xi1>, vector<1x128xf32>
    %cst_15 = arith.constant 6.28318548 : f32
    %46 = vector.broadcast %cst_15 : f32 to vector<1x128xf32>
    %47 = arith.cmpf oge, %45, %46 : vector<1x128xf32>
    %cst_16 = arith.constant 6.28318548 : f32
    %48 = vector.broadcast %cst_16 : f32 to vector<1x128xf32>
    %49 = arith.subf %45, %48 : vector<1x128xf32>
    %50 = arith.select %47, %49, %45 : vector<1x128xi1>, vector<1x128xf32>
    %cst_17 = arith.constant 0.000000e+00 : f32
    %51 = vector.broadcast %cst_17 : f32 to vector<1x128xf32>
    %c1_i32 = arith.constant 1 : i32
    %52 = tpu.dynamic_rotate %50 by %c1_i32 dim 1 : vector<1x128xf32>, i32 -> vector<1x128xf32>
    %53 = tpu.concatenate %50, %52 in 0 : vector<1x128xf32>, vector<1x128xf32> -> vector<2x128xf32>
    %54 = math.cos %53 : vector<2x128xf32>
    %55 = math.sin %53 : vector<2x128xf32>
    %56 = tpu.concatenate %54, %55 in 0 : vector<2x128xf32>, vector<2x128xf32> -> vector<4x128xf32>
    %cst_18 = arith.constant 0.000000e+00 : f32
    %57 = vector.broadcast %cst_18 : f32 to vector<4x128xf32>
    %58 = tpu.concatenate %56, %57 in 0 : vector<4x128xf32>, vector<4x128xf32> -> vector<8x128xf32>
    %59 = arith.truncf %58 : vector<8x128xf32> to vector<8x128xbf16>
    %c0_19 = arith.constant 0 : index
    %c0_20 = arith.constant 0 : index
    %60 = vector.load %arg2[%c0_19, %c0_20] : memref<32x8xbf16, #tpu.memory_space<vmem>>, vector<32x8xbf16>
    %c0_21 = arith.constant 0 : index
    %c0_22 = arith.constant 0 : index
    %61 = vector.load %arg3[%c0_21, %c0_22] : memref<32x1xf32, #tpu.memory_space<vmem>>, vector<32x1xf32>
    %cst_23 = arith.constant dense<0.000000e+00> : vector<32x128xf32>
    %62 = tpu.matmul %60, %59, %cst_23 {dimension_numbers = #tpu.dot_dimension_numbers<[1], [0], [0], [1], [0, 0, 1, 1], [], []>} : vector<32x8xbf16>, vector<8x128xbf16>, vector<32x128xf32> -> vector<32x128xf32>
    %63 = vector.broadcast %61 : vector<32x1xf32> to vector<32x128xf32>
    %64 = arith.addf %62, %63 : vector<32x128xf32>
    %65 = math.tanh %64 : vector<32x128xf32>
    %66 = arith.truncf %65 : vector<32x128xf32> to vector<32x128xbf16>
    %c0_24 = arith.constant 0 : index
    %c0_25 = arith.constant 0 : index
    %67 = vector.load %arg4[%c0_24, %c0_25] : memref<32x32xbf16, #tpu.memory_space<vmem>>, vector<32x32xbf16>
    %c0_26 = arith.constant 0 : index
    %c0_27 = arith.constant 0 : index
    %68 = vector.load %arg5[%c0_26, %c0_27] : memref<32x1xf32, #tpu.memory_space<vmem>>, vector<32x1xf32>
    %cst_28 = arith.constant dense<0.000000e+00> : vector<32x128xf32>
    %69 = tpu.matmul %67, %66, %cst_28 {dimension_numbers = #tpu.dot_dimension_numbers<[1], [0], [0], [1], [0, 0, 1, 1], [], []>} : vector<32x32xbf16>, vector<32x128xbf16>, vector<32x128xf32> -> vector<32x128xf32>
    %70 = vector.broadcast %68 : vector<32x1xf32> to vector<32x128xf32>
    %71 = arith.addf %69, %70 : vector<32x128xf32>
    %72 = math.tanh %71 : vector<32x128xf32>
    %73 = arith.truncf %72 : vector<32x128xf32> to vector<32x128xbf16>
    %c0_29 = arith.constant 0 : index
    %c0_30 = arith.constant 0 : index
    %74 = vector.load %arg6[%c0_29, %c0_30] : memref<12x32xbf16, #tpu.memory_space<vmem>>, vector<12x32xbf16>
    %c0_31 = arith.constant 0 : index
    %c0_32 = arith.constant 0 : index
    %75 = vector.load %arg7[%c0_31, %c0_32] : memref<12x1xf32, #tpu.memory_space<vmem>>, vector<12x1xf32>
    %cst_33 = arith.constant dense<0.000000e+00> : vector<12x128xf32>
    %76 = tpu.matmul %74, %73, %cst_33 {dimension_numbers = #tpu.dot_dimension_numbers<[1], [0], [0], [1], [0, 0, 1, 1], [], []>} : vector<12x32xbf16>, vector<32x128xbf16>, vector<12x128xf32> -> vector<12x128xf32>
    %77 = vector.broadcast %75 : vector<12x1xf32> to vector<12x128xf32>
    %78 = arith.addf %76, %77 : vector<12x128xf32>
    %cst_34 = arith.constant 0.159154937 : f32
    %79 = vector.broadcast %cst_34 : f32 to vector<1x128xf32>
    %80 = arith.mulf %30, %79 : vector<1x128xf32>
    %81 = vector.extract_strided_slice %78 {offsets = [0, 0], sizes = [4, 128], strides = [1, 1]} : vector<12x128xf32> to vector<4x128xf32>
    %82 = vector.extract_strided_slice %78 {offsets = [4, 0], sizes = [4, 128], strides = [1, 1]} : vector<12x128xf32> to vector<4x128xf32>
    %83 = vector.extract_strided_slice %78 {offsets = [8, 0], sizes = [4, 128], strides = [1, 1]} : vector<12x128xf32> to vector<4x128xf32>
    %cst_35 = arith.constant dense<0xFF800000> : vector<128xf32>
    %84 = vector.multi_reduction <maximumf>, %83, %cst_35 [0] : vector<4x128xf32> to vector<128xf32>
    %85 = vector.shape_cast %84 : vector<128xf32> to vector<1x128xf32>
    %86 = math.absf %81 : vector<4x128xf32>
    %cst_36 = arith.constant 0.000000e+00 : f32
    %87 = vector.broadcast %cst_36 : f32 to vector<4x128xf32>
    %88 = arith.subf %87, %86 : vector<4x128xf32>
    %cst_37 = arith.constant 0.000000e+00 : f32
    %89 = vector.broadcast %cst_37 : f32 to vector<4x128xf32>
    %90 = arith.subf %89, %82 : vector<4x128xf32>
    %91 = vector.broadcast %85 : vector<1x128xf32> to vector<4x128xf32>
    %92 = arith.subf %83, %91 : vector<4x128xf32>
    %93 = tpu.concatenate %88, %90, %92 in 0 : vector<4x128xf32>, vector<4x128xf32>, vector<4x128xf32> -> vector<12x128xf32>
    %94 = math.exp %93 : vector<12x128xf32>
    %cst_38 = arith.constant 0.000000e+00 : f32
    %95 = vector.broadcast %cst_38 : f32 to vector<4x128xf32>
    %96 = arith.maximumf %81, %95 : vector<4x128xf32>
    %97 = vector.extract_strided_slice %94 {offsets = [0, 0], sizes = [4, 128], strides = [1, 1]} : vector<12x128xf32> to vector<4x128xf32>
    %cst_39 = arith.constant 1.000000e+00 : f32
    %98 = vector.broadcast %cst_39 : f32 to vector<4x128xf32>
    %99 = arith.addf %98, %97 : vector<4x128xf32>
    %100 = math.log %99 : vector<4x128xf32>
    %101 = arith.addf %96, %100 : vector<4x128xf32>
    %cst_40 = arith.constant 0.00999999977 : f32
    %102 = vector.broadcast %cst_40 : f32 to vector<4x128xf32>
    %103 = arith.addf %101, %102 : vector<4x128xf32>
    %104 = vector.extract_strided_slice %94 {offsets = [4, 0], sizes = [4, 128], strides = [1, 1]} : vector<12x128xf32> to vector<4x128xf32>
    %cst_41 = arith.constant 1.000000e+00 : f32
    %105 = vector.broadcast %cst_41 : f32 to vector<4x128xf32>
    %106 = arith.addf %105, %104 : vector<4x128xf32>
    %cst_42 = arith.constant 1.000000e+00 : f32
    %107 = vector.broadcast %cst_42 : f32 to vector<4x128xf32>
    %108 = arith.divf %107, %106 : vector<4x128xf32>
    %109 = vector.broadcast %80 : vector<1x128xf32> to vector<4x128xf32>
    %110 = arith.subf %109, %108 : vector<4x128xf32>
    %111 = arith.mulf %103, %110 : vector<4x128xf32>
    %cst_43 = arith.constant 0.000000e+00 : f32
    %112 = vector.broadcast %cst_43 : f32 to vector<4x128xf32>
    %113 = arith.subf %112, %103 : vector<4x128xf32>
    %114 = arith.mulf %113, %108 : vector<4x128xf32>
    %cst_44 = arith.constant 1.000000e+00 : f32
    %115 = vector.broadcast %cst_44 : f32 to vector<4x128xf32>
    %116 = arith.subf %115, %108 : vector<4x128xf32>
    %117 = arith.mulf %103, %116 : vector<4x128xf32>
    %118 = tpu.concatenate %111, %114, %117 in 0 : vector<4x128xf32>, vector<4x128xf32>, vector<4x128xf32> -> vector<12x128xf32>
    %cst_45 = arith.constant 5.000000e-01 : f32
    %119 = vector.broadcast %cst_45 : f32 to vector<12x128xf32>
    %120 = arith.mulf %119, %118 : vector<12x128xf32>
    %121 = math.tanh %120 : vector<12x128xf32>
    %cst_46 = arith.constant 1.000000e+00 : f32
    %122 = vector.broadcast %cst_46 : f32 to vector<12x128xf32>
    %123 = arith.addf %121, %122 : vector<12x128xf32>
    %cst_47 = arith.constant 5.000000e-01 : f32
    %124 = vector.broadcast %cst_47 : f32 to vector<12x128xf32>
    %125 = arith.mulf %124, %123 : vector<12x128xf32>
    %126 = vector.extract_strided_slice %125 {offsets = [0, 0], sizes = [4, 128], strides = [1, 1]} : vector<12x128xf32> to vector<4x128xf32>
    %127 = vector.extract_strided_slice %125 {offsets = [4, 0], sizes = [4, 128], strides = [1, 1]} : vector<12x128xf32> to vector<4x128xf32>
    %128 = vector.extract_strided_slice %125 {offsets = [8, 0], sizes = [4, 128], strides = [1, 1]} : vector<12x128xf32> to vector<4x128xf32>
    %129 = arith.subf %128, %127 : vector<4x128xf32>
    %cst_48 = arith.constant 9.99999997E-7 : f32
    %130 = vector.broadcast %cst_48 : f32 to vector<4x128xf32>
    %131 = arith.maximumf %129, %130 : vector<4x128xf32>
    %cst_49 = arith.constant 1.000000e+00 : f32
    %132 = vector.broadcast %cst_49 : f32 to vector<4x128xf32>
    %133 = arith.divf %132, %131 : vector<4x128xf32>
    %134 = arith.subf %126, %127 : vector<4x128xf32>
    %135 = arith.mulf %134, %133 : vector<4x128xf32>
    %136 = arith.mulf %103, %133 : vector<4x128xf32>
    %cst_50 = arith.constant 1.000000e+00 : f32
    %137 = vector.broadcast %cst_50 : f32 to vector<4x128xf32>
    %138 = arith.subf %137, %126 : vector<4x128xf32>
    %139 = arith.mulf %126, %138 : vector<4x128xf32>
    %140 = arith.mulf %136, %139 : vector<4x128xf32>
    %141 = vector.extract_strided_slice %94 {offsets = [8, 0], sizes = [4, 128], strides = [1, 1]} : vector<12x128xf32> to vector<4x128xf32>
    %cst_51 = arith.constant dense<0.000000e+00> : vector<128xf32>
    %142 = vector.multi_reduction <add>, %141, %cst_51 [0] : vector<4x128xf32> to vector<128xf32>
    %143 = vector.shape_cast %142 : vector<128xf32> to vector<1x128xf32>
    %cst_52 = arith.constant 0.959999978 : f32
    %144 = vector.broadcast %cst_52 : f32 to vector<4x128xf32>
    %145 = arith.mulf %144, %141 : vector<4x128xf32>
    %146 = tpu.reciprocal %143 {approx = true} : vector<1x128xf32> -> vector<1x128xf32>
    %147 = vector.broadcast %146 : vector<1x128xf32> to vector<4x128xf32>
    %148 = arith.mulf %145, %147 : vector<4x128xf32>
    %cst_53 = arith.constant 0.00999999977 : f32
    %149 = vector.broadcast %cst_53 : f32 to vector<4x128xf32>
    %150 = arith.addf %149, %148 : vector<4x128xf32>
    %151 = arith.mulf %150, %135 : vector<4x128xf32>
    %cst_54 = arith.constant dense<0.000000e+00> : vector<128xf32>
    %152 = vector.multi_reduction <add>, %151, %cst_54 [0] : vector<4x128xf32> to vector<128xf32>
    %153 = vector.shape_cast %152 : vector<128xf32> to vector<1x128xf32>
    %154 = arith.mulf %150, %140 : vector<4x128xf32>
    %cst_55 = arith.constant dense<0.000000e+00> : vector<128xf32>
    %155 = vector.multi_reduction <add>, %154, %cst_55 [0] : vector<4x128xf32> to vector<128xf32>
    %156 = vector.shape_cast %155 : vector<128xf32> to vector<1x128xf32>
    %cst_56 = arith.constant 6.28318548 : f32
    %157 = vector.broadcast %cst_56 : f32 to vector<1x128xf32>
    %158 = arith.mulf %157, %153 : vector<1x128xf32>
    %cst_57 = arith.constant 1.000000e-30 : f32
    %159 = vector.broadcast %cst_57 : f32 to vector<1x128xf32>
    %160 = arith.maximumf %156, %159 : vector<1x128xf32>
    %161 = math.log %160 : vector<1x128xf32>
    %162 = arith.select %4, %158, %30 : vector<1x128xi1>, vector<1x128xf32>
    %cst_58 = arith.constant 0.000000e+00 : f32
    %163 = vector.broadcast %cst_58 : f32 to vector<1x128xf32>
    %164 = arith.select %4, %161, %163 : vector<1x128xi1>, vector<1x128xf32>
    %165 = arith.addf %51, %164 : vector<1x128xf32>
    %cst_59 = arith.constant 1.57079637 : f32
    %166 = vector.broadcast %cst_59 : f32 to vector<1x128xf32>
    %167 = arith.addf %162, %166 : vector<1x128xf32>
    %cst_60 = arith.constant 0.159154937 : f32
    %168 = vector.broadcast %cst_60 : f32 to vector<1x128xf32>
    %169 = arith.mulf %167, %168 : vector<1x128xf32>
    %170 = math.floor %169 : vector<1x128xf32>
    %cst_61 = arith.constant 6.28318548 : f32
    %171 = vector.broadcast %cst_61 : f32 to vector<1x128xf32>
    %172 = arith.mulf %171, %170 : vector<1x128xf32>
    %173 = arith.subf %167, %172 : vector<1x128xf32>
    %cst_62 = arith.constant 0.000000e+00 : f32
    %174 = vector.broadcast %cst_62 : f32 to vector<1x128xf32>
    %175 = arith.cmpf olt, %173, %174 : vector<1x128xf32>
    %cst_63 = arith.constant 6.28318548 : f32
    %176 = vector.broadcast %cst_63 : f32 to vector<1x128xf32>
    %177 = arith.addf %173, %176 : vector<1x128xf32>
    %178 = arith.select %175, %177, %173 : vector<1x128xi1>, vector<1x128xf32>
    %cst_64 = arith.constant 6.28318548 : f32
    %179 = vector.broadcast %cst_64 : f32 to vector<1x128xf32>
    %180 = arith.cmpf oge, %178, %179 : vector<1x128xf32>
    %cst_65 = arith.constant 6.28318548 : f32
    %181 = vector.broadcast %cst_65 : f32 to vector<1x128xf32>
    %182 = arith.subf %178, %181 : vector<1x128xf32>
    %183 = arith.select %180, %182, %178 : vector<1x128xi1>, vector<1x128xf32>
    %cst_66 = arith.constant 1.57079637 : f32
    %184 = vector.broadcast %cst_66 : f32 to vector<1x128xf32>
    %185 = arith.addf %50, %184 : vector<1x128xf32>
    %cst_67 = arith.constant 0.159154937 : f32
    %186 = vector.broadcast %cst_67 : f32 to vector<1x128xf32>
    %187 = arith.mulf %185, %186 : vector<1x128xf32>
    %188 = math.floor %187 : vector<1x128xf32>
    %cst_68 = arith.constant 6.28318548 : f32
    %189 = vector.broadcast %cst_68 : f32 to vector<1x128xf32>
    %190 = arith.mulf %189, %188 : vector<1x128xf32>
    %191 = arith.subf %185, %190 : vector<1x128xf32>
    %cst_69 = arith.constant 0.000000e+00 : f32
    %192 = vector.broadcast %cst_69 : f32 to vector<1x128xf32>
    %193 = arith.cmpf olt, %191, %192 : vector<1x128xf32>
    %cst_70 = arith.constant 6.28318548 : f32
    %194 = vector.broadcast %cst_70 : f32 to vector<1x128xf32>
    %195 = arith.addf %191, %194 : vector<1x128xf32>
    %196 = arith.select %193, %195, %191 : vector<1x128xi1>, vector<1x128xf32>
    %cst_71 = arith.constant 6.28318548 : f32
    %197 = vector.broadcast %cst_71 : f32 to vector<1x128xf32>
    %198 = arith.cmpf oge, %196, %197 : vector<1x128xf32>
    %cst_72 = arith.constant 6.28318548 : f32
    %199 = vector.broadcast %cst_72 : f32 to vector<1x128xf32>
    %200 = arith.subf %196, %199 : vector<1x128xf32>
    %201 = arith.select %198, %200, %196 : vector<1x128xi1>, vector<1x128xf32>
    %c127_i32 = arith.constant 127 : i32
    %202 = tpu.dynamic_rotate %183 by %c127_i32 dim 1 : vector<1x128xf32>, i32 -> vector<1x128xf32>
    %c7_i32 = arith.constant 7 : i32
    %203 = tpu.dynamic_rotate %183 by %c7_i32 dim 1 : vector<1x128xf32>, i32 -> vector<1x128xf32>
    %204 = arith.select %10, %203, %202 : vector<1x128xi1>, vector<1x128xf32>
    %205 = tpu.concatenate %204, %183 in 0 : vector<1x128xf32>, vector<1x128xf32> -> vector<2x128xf32>
    %206 = math.cos %205 : vector<2x128xf32>
    %207 = math.sin %205 : vector<2x128xf32>
    %208 = tpu.concatenate %206, %207 in 0 : vector<2x128xf32>, vector<2x128xf32> -> vector<4x128xf32>
    %cst_73 = arith.constant 0.000000e+00 : f32
    %209 = vector.broadcast %cst_73 : f32 to vector<4x128xf32>
    %210 = tpu.concatenate %208, %209 in 0 : vector<4x128xf32>, vector<4x128xf32> -> vector<8x128xf32>
    %211 = arith.truncf %210 : vector<8x128xf32> to vector<8x128xbf16>
    %c0_74 = arith.constant 0 : index
    %c0_75 = arith.constant 0 : index
    %212 = vector.load %arg8[%c0_74, %c0_75] : memref<32x8xbf16, #tpu.memory_space<vmem>>, vector<32x8xbf16>
    %c0_76 = arith.constant 0 : index
    %c0_77 = arith.constant 0 : index
    %213 = vector.load %arg9[%c0_76, %c0_77] : memref<32x1xf32, #tpu.memory_space<vmem>>, vector<32x1xf32>
    %cst_78 = arith.constant dense<0.000000e+00> : vector<32x128xf32>
    %214 = tpu.matmul %212, %211, %cst_78 {dimension_numbers = #tpu.dot_dimension_numbers<[1], [0], [0], [1], [0, 0, 1, 1], [], []>} : vector<32x8xbf16>, vector<8x128xbf16>, vector<32x128xf32> -> vector<32x128xf32>
    %215 = vector.broadcast %213 : vector<32x1xf32> to vector<32x128xf32>
    %216 = arith.addf %214, %215 : vector<32x128xf32>
    %217 = math.tanh %216 : vector<32x128xf32>
    %218 = arith.truncf %217 : vector<32x128xf32> to vector<32x128xbf16>
    %c0_79 = arith.constant 0 : index
    %c0_80 = arith.constant 0 : index
    %219 = vector.load %arg10[%c0_79, %c0_80] : memref<32x32xbf16, #tpu.memory_space<vmem>>, vector<32x32xbf16>
    %c0_81 = arith.constant 0 : index
    %c0_82 = arith.constant 0 : index
    %220 = vector.load %arg11[%c0_81, %c0_82] : memref<32x1xf32, #tpu.memory_space<vmem>>, vector<32x1xf32>
    %cst_83 = arith.constant dense<0.000000e+00> : vector<32x128xf32>
    %221 = tpu.matmul %219, %218, %cst_83 {dimension_numbers = #tpu.dot_dimension_numbers<[1], [0], [0], [1], [0, 0, 1, 1], [], []>} : vector<32x32xbf16>, vector<32x128xbf16>, vector<32x128xf32> -> vector<32x128xf32>
    %222 = vector.broadcast %220 : vector<32x1xf32> to vector<32x128xf32>
    %223 = arith.addf %221, %222 : vector<32x128xf32>
    %224 = math.tanh %223 : vector<32x128xf32>
    %225 = arith.truncf %224 : vector<32x128xf32> to vector<32x128xbf16>
    %c0_84 = arith.constant 0 : index
    %c0_85 = arith.constant 0 : index
    %226 = vector.load %arg12[%c0_84, %c0_85] : memref<12x32xbf16, #tpu.memory_space<vmem>>, vector<12x32xbf16>
    %c0_86 = arith.constant 0 : index
    %c0_87 = arith.constant 0 : index
    %227 = vector.load %arg13[%c0_86, %c0_87] : memref<12x1xf32, #tpu.memory_space<vmem>>, vector<12x1xf32>
    %cst_88 = arith.constant dense<0.000000e+00> : vector<12x128xf32>
    %228 = tpu.matmul %226, %225, %cst_88 {dimension_numbers = #tpu.dot_dimension_numbers<[1], [0], [0], [1], [0, 0, 1, 1], [], []>} : vector<12x32xbf16>, vector<32x128xbf16>, vector<12x128xf32> -> vector<12x128xf32>
    %229 = vector.broadcast %227 : vector<12x1xf32> to vector<12x128xf32>
    %230 = arith.addf %228, %229 : vector<12x128xf32>
    %cst_89 = arith.constant 0.159154937 : f32
    %231 = vector.broadcast %cst_89 : f32 to vector<1x128xf32>
    %232 = arith.mulf %201, %231 : vector<1x128xf32>
    %233 = vector.extract_strided_slice %230 {offsets = [0, 0], sizes = [4, 128], strides = [1, 1]} : vector<12x128xf32> to vector<4x128xf32>
    %234 = vector.extract_strided_slice %230 {offsets = [4, 0], sizes = [4, 128], strides = [1, 1]} : vector<12x128xf32> to vector<4x128xf32>
    %235 = vector.extract_strided_slice %230 {offsets = [8, 0], sizes = [4, 128], strides = [1, 1]} : vector<12x128xf32> to vector<4x128xf32>
    %cst_90 = arith.constant dense<0xFF800000> : vector<128xf32>
    %236 = vector.multi_reduction <maximumf>, %235, %cst_90 [0] : vector<4x128xf32> to vector<128xf32>
    %237 = vector.shape_cast %236 : vector<128xf32> to vector<1x128xf32>
    %238 = math.absf %233 : vector<4x128xf32>
    %cst_91 = arith.constant 0.000000e+00 : f32
    %239 = vector.broadcast %cst_91 : f32 to vector<4x128xf32>
    %240 = arith.subf %239, %238 : vector<4x128xf32>
    %cst_92 = arith.constant 0.000000e+00 : f32
    %241 = vector.broadcast %cst_92 : f32 to vector<4x128xf32>
    %242 = arith.subf %241, %234 : vector<4x128xf32>
    %243 = vector.broadcast %237 : vector<1x128xf32> to vector<4x128xf32>
    %244 = arith.subf %235, %243 : vector<4x128xf32>
    %245 = tpu.concatenate %240, %242, %244 in 0 : vector<4x128xf32>, vector<4x128xf32>, vector<4x128xf32> -> vector<12x128xf32>
    %246 = math.exp %245 : vector<12x128xf32>
    %cst_93 = arith.constant 0.000000e+00 : f32
    %247 = vector.broadcast %cst_93 : f32 to vector<4x128xf32>
    %248 = arith.maximumf %233, %247 : vector<4x128xf32>
    %249 = vector.extract_strided_slice %246 {offsets = [0, 0], sizes = [4, 128], strides = [1, 1]} : vector<12x128xf32> to vector<4x128xf32>
    %cst_94 = arith.constant 1.000000e+00 : f32
    %250 = vector.broadcast %cst_94 : f32 to vector<4x128xf32>
    %251 = arith.addf %250, %249 : vector<4x128xf32>
    %252 = math.log %251 : vector<4x128xf32>
    %253 = arith.addf %248, %252 : vector<4x128xf32>
    %cst_95 = arith.constant 0.00999999977 : f32
    %254 = vector.broadcast %cst_95 : f32 to vector<4x128xf32>
    %255 = arith.addf %253, %254 : vector<4x128xf32>
    %256 = vector.extract_strided_slice %246 {offsets = [4, 0], sizes = [4, 128], strides = [1, 1]} : vector<12x128xf32> to vector<4x128xf32>
    %cst_96 = arith.constant 1.000000e+00 : f32
    %257 = vector.broadcast %cst_96 : f32 to vector<4x128xf32>
    %258 = arith.addf %257, %256 : vector<4x128xf32>
    %cst_97 = arith.constant 1.000000e+00 : f32
    %259 = vector.broadcast %cst_97 : f32 to vector<4x128xf32>
    %260 = arith.divf %259, %258 : vector<4x128xf32>
    %261 = vector.broadcast %232 : vector<1x128xf32> to vector<4x128xf32>
    %262 = arith.subf %261, %260 : vector<4x128xf32>
    %263 = arith.mulf %255, %262 : vector<4x128xf32>
    %cst_98 = arith.constant 0.000000e+00 : f32
    %264 = vector.broadcast %cst_98 : f32 to vector<4x128xf32>
    %265 = arith.subf %264, %255 : vector<4x128xf32>
    %266 = arith.mulf %265, %260 : vector<4x128xf32>
    %cst_99 = arith.constant 1.000000e+00 : f32
    %267 = vector.broadcast %cst_99 : f32 to vector<4x128xf32>
    %268 = arith.subf %267, %260 : vector<4x128xf32>
    %269 = arith.mulf %255, %268 : vector<4x128xf32>
    %270 = tpu.concatenate %263, %266, %269 in 0 : vector<4x128xf32>, vector<4x128xf32>, vector<4x128xf32> -> vector<12x128xf32>
    %cst_100 = arith.constant 5.000000e-01 : f32
    %271 = vector.broadcast %cst_100 : f32 to vector<12x128xf32>
    %272 = arith.mulf %271, %270 : vector<12x128xf32>
    %273 = math.tanh %272 : vector<12x128xf32>
    %cst_101 = arith.constant 1.000000e+00 : f32
    %274 = vector.broadcast %cst_101 : f32 to vector<12x128xf32>
    %275 = arith.addf %273, %274 : vector<12x128xf32>
    %cst_102 = arith.constant 5.000000e-01 : f32
    %276 = vector.broadcast %cst_102 : f32 to vector<12x128xf32>
    %277 = arith.mulf %276, %275 : vector<12x128xf32>
    %278 = vector.extract_strided_slice %277 {offsets = [0, 0], sizes = [4, 128], strides = [1, 1]} : vector<12x128xf32> to vector<4x128xf32>
    %279 = vector.extract_strided_slice %277 {offsets = [4, 0], sizes = [4, 128], strides = [1, 1]} : vector<12x128xf32> to vector<4x128xf32>
    %280 = vector.extract_strided_slice %277 {offsets = [8, 0], sizes = [4, 128], strides = [1, 1]} : vector<12x128xf32> to vector<4x128xf32>
    %281 = arith.subf %280, %279 : vector<4x128xf32>
    %cst_103 = arith.constant 9.99999997E-7 : f32
    %282 = vector.broadcast %cst_103 : f32 to vector<4x128xf32>
    %283 = arith.maximumf %281, %282 : vector<4x128xf32>
    %cst_104 = arith.constant 1.000000e+00 : f32
    %284 = vector.broadcast %cst_104 : f32 to vector<4x128xf32>
    %285 = arith.divf %284, %283 : vector<4x128xf32>
    %286 = arith.subf %278, %279 : vector<4x128xf32>
    %287 = arith.mulf %286, %285 : vector<4x128xf32>
    %288 = arith.mulf %255, %285 : vector<4x128xf32>
    %cst_105 = arith.constant 1.000000e+00 : f32
    %289 = vector.broadcast %cst_105 : f32 to vector<4x128xf32>
    %290 = arith.subf %289, %278 : vector<4x128xf32>
    %291 = arith.mulf %278, %290 : vector<4x128xf32>
    %292 = arith.mulf %288, %291 : vector<4x128xf32>
    %293 = vector.extract_strided_slice %246 {offsets = [8, 0], sizes = [4, 128], strides = [1, 1]} : vector<12x128xf32> to vector<4x128xf32>
    %cst_106 = arith.constant dense<0.000000e+00> : vector<128xf32>
    %294 = vector.multi_reduction <add>, %293, %cst_106 [0] : vector<4x128xf32> to vector<128xf32>
    %295 = vector.shape_cast %294 : vector<128xf32> to vector<1x128xf32>
    %cst_107 = arith.constant 0.959999978 : f32
    %296 = vector.broadcast %cst_107 : f32 to vector<4x128xf32>
    %297 = arith.mulf %296, %293 : vector<4x128xf32>
    %298 = tpu.reciprocal %295 {approx = true} : vector<1x128xf32> -> vector<1x128xf32>
    %299 = vector.broadcast %298 : vector<1x128xf32> to vector<4x128xf32>
    %300 = arith.mulf %297, %299 : vector<4x128xf32>
    %cst_108 = arith.constant 0.00999999977 : f32
    %301 = vector.broadcast %cst_108 : f32 to vector<4x128xf32>
    %302 = arith.addf %301, %300 : vector<4x128xf32>
    %303 = arith.mulf %302, %287 : vector<4x128xf32>
    %cst_109 = arith.constant dense<0.000000e+00> : vector<128xf32>
    %304 = vector.multi_reduction <add>, %303, %cst_109 [0] : vector<4x128xf32> to vector<128xf32>
    %305 = vector.shape_cast %304 : vector<128xf32> to vector<1x128xf32>
    %306 = arith.mulf %302, %292 : vector<4x128xf32>
    %cst_110 = arith.constant dense<0.000000e+00> : vector<128xf32>
    %307 = vector.multi_reduction <add>, %306, %cst_110 [0] : vector<4x128xf32> to vector<128xf32>
    %308 = vector.shape_cast %307 : vector<128xf32> to vector<1x128xf32>
    %cst_111 = arith.constant 6.28318548 : f32
    %309 = vector.broadcast %cst_111 : f32 to vector<1x128xf32>
    %310 = arith.mulf %309, %305 : vector<1x128xf32>
    %cst_112 = arith.constant 1.000000e-30 : f32
    %311 = vector.broadcast %cst_112 : f32 to vector<1x128xf32>
    %312 = arith.maximumf %308, %311 : vector<1x128xf32>
    %313 = math.log %312 : vector<1x128xf32>
    %314 = arith.select %7, %310, %201 : vector<1x128xi1>, vector<1x128xf32>
    %cst_113 = arith.constant 0.000000e+00 : f32
    %315 = vector.broadcast %cst_113 : f32 to vector<1x128xf32>
    %316 = arith.select %7, %313, %315 : vector<1x128xi1>, vector<1x128xf32>
    %317 = arith.addf %165, %316 : vector<1x128xf32>
    %cst_114 = arith.constant 1.57079637 : f32
    %318 = vector.broadcast %cst_114 : f32 to vector<1x128xf32>
    %319 = arith.addf %183, %318 : vector<1x128xf32>
    %cst_115 = arith.constant 0.159154937 : f32
    %320 = vector.broadcast %cst_115 : f32 to vector<1x128xf32>
    %321 = arith.mulf %319, %320 : vector<1x128xf32>
    %322 = math.floor %321 : vector<1x128xf32>
    %cst_116 = arith.constant 6.28318548 : f32
    %323 = vector.broadcast %cst_116 : f32 to vector<1x128xf32>
    %324 = arith.mulf %323, %322 : vector<1x128xf32>
    %325 = arith.subf %319, %324 : vector<1x128xf32>
    %cst_117 = arith.constant 0.000000e+00 : f32
    %326 = vector.broadcast %cst_117 : f32 to vector<1x128xf32>
    %327 = arith.cmpf olt, %325, %326 : vector<1x128xf32>
    %cst_118 = arith.constant 6.28318548 : f32
    %328 = vector.broadcast %cst_118 : f32 to vector<1x128xf32>
    %329 = arith.addf %325, %328 : vector<1x128xf32>
    %330 = arith.select %327, %329, %325 : vector<1x128xi1>, vector<1x128xf32>
    %cst_119 = arith.constant 6.28318548 : f32
    %331 = vector.broadcast %cst_119 : f32 to vector<1x128xf32>
    %332 = arith.cmpf oge, %330, %331 : vector<1x128xf32>
    %cst_120 = arith.constant 6.28318548 : f32
    %333 = vector.broadcast %cst_120 : f32 to vector<1x128xf32>
    %334 = arith.subf %330, %333 : vector<1x128xf32>
    %335 = arith.select %332, %334, %330 : vector<1x128xi1>, vector<1x128xf32>
    %cst_121 = arith.constant 1.57079637 : f32
    %336 = vector.broadcast %cst_121 : f32 to vector<1x128xf32>
    %337 = arith.addf %314, %336 : vector<1x128xf32>
    %cst_122 = arith.constant 0.159154937 : f32
    %338 = vector.broadcast %cst_122 : f32 to vector<1x128xf32>
    %339 = arith.mulf %337, %338 : vector<1x128xf32>
    %340 = math.floor %339 : vector<1x128xf32>
    %cst_123 = arith.constant 6.28318548 : f32
    %341 = vector.broadcast %cst_123 : f32 to vector<1x128xf32>
    %342 = arith.mulf %341, %340 : vector<1x128xf32>
    %343 = arith.subf %337, %342 : vector<1x128xf32>
    %cst_124 = arith.constant 0.000000e+00 : f32
    %344 = vector.broadcast %cst_124 : f32 to vector<1x128xf32>
    %345 = arith.cmpf olt, %343, %344 : vector<1x128xf32>
    %cst_125 = arith.constant 6.28318548 : f32
    %346 = vector.broadcast %cst_125 : f32 to vector<1x128xf32>
    %347 = arith.addf %343, %346 : vector<1x128xf32>
    %348 = arith.select %345, %347, %343 : vector<1x128xi1>, vector<1x128xf32>
    %cst_126 = arith.constant 6.28318548 : f32
    %349 = vector.broadcast %cst_126 : f32 to vector<1x128xf32>
    %350 = arith.cmpf oge, %348, %349 : vector<1x128xf32>
    %cst_127 = arith.constant 6.28318548 : f32
    %351 = vector.broadcast %cst_127 : f32 to vector<1x128xf32>
    %352 = arith.subf %348, %351 : vector<1x128xf32>
    %353 = arith.select %350, %352, %348 : vector<1x128xi1>, vector<1x128xf32>
    %c1_i32_128 = arith.constant 1 : i32
    %354 = tpu.dynamic_rotate %353 by %c1_i32_128 dim 1 : vector<1x128xf32>, i32 -> vector<1x128xf32>
    %355 = tpu.concatenate %353, %354 in 0 : vector<1x128xf32>, vector<1x128xf32> -> vector<2x128xf32>
    %356 = math.cos %355 : vector<2x128xf32>
    %357 = math.sin %355 : vector<2x128xf32>
    %358 = tpu.concatenate %356, %357 in 0 : vector<2x128xf32>, vector<2x128xf32> -> vector<4x128xf32>
    %cst_129 = arith.constant 0.000000e+00 : f32
    %359 = vector.broadcast %cst_129 : f32 to vector<4x128xf32>
    %360 = tpu.concatenate %358, %359 in 0 : vector<4x128xf32>, vector<4x128xf32> -> vector<8x128xf32>
    %361 = arith.truncf %360 : vector<8x128xf32> to vector<8x128xbf16>
    %c0_130 = arith.constant 0 : index
    %c0_131 = arith.constant 0 : index
    %362 = vector.load %arg14[%c0_130, %c0_131] : memref<32x8xbf16, #tpu.memory_space<vmem>>, vector<32x8xbf16>
    %c0_132 = arith.constant 0 : index
    %c0_133 = arith.constant 0 : index
    %363 = vector.load %arg15[%c0_132, %c0_133] : memref<32x1xf32, #tpu.memory_space<vmem>>, vector<32x1xf32>
    %cst_134 = arith.constant dense<0.000000e+00> : vector<32x128xf32>
    %364 = tpu.matmul %362, %361, %cst_134 {dimension_numbers = #tpu.dot_dimension_numbers<[1], [0], [0], [1], [0, 0, 1, 1], [], []>} : vector<32x8xbf16>, vector<8x128xbf16>, vector<32x128xf32> -> vector<32x128xf32>
    %365 = vector.broadcast %363 : vector<32x1xf32> to vector<32x128xf32>
    %366 = arith.addf %364, %365 : vector<32x128xf32>
    %367 = math.tanh %366 : vector<32x128xf32>
    %368 = arith.truncf %367 : vector<32x128xf32> to vector<32x128xbf16>
    %c0_135 = arith.constant 0 : index
    %c0_136 = arith.constant 0 : index
    %369 = vector.load %arg16[%c0_135, %c0_136] : memref<32x32xbf16, #tpu.memory_space<vmem>>, vector<32x32xbf16>
    %c0_137 = arith.constant 0 : index
    %c0_138 = arith.constant 0 : index
    %370 = vector.load %arg17[%c0_137, %c0_138] : memref<32x1xf32, #tpu.memory_space<vmem>>, vector<32x1xf32>
    %cst_139 = arith.constant dense<0.000000e+00> : vector<32x128xf32>
    %371 = tpu.matmul %369, %368, %cst_139 {dimension_numbers = #tpu.dot_dimension_numbers<[1], [0], [0], [1], [0, 0, 1, 1], [], []>} : vector<32x32xbf16>, vector<32x128xbf16>, vector<32x128xf32> -> vector<32x128xf32>
    %372 = vector.broadcast %370 : vector<32x1xf32> to vector<32x128xf32>
    %373 = arith.addf %371, %372 : vector<32x128xf32>
    %374 = math.tanh %373 : vector<32x128xf32>
    %375 = arith.truncf %374 : vector<32x128xf32> to vector<32x128xbf16>
    %c0_140 = arith.constant 0 : index
    %c0_141 = arith.constant 0 : index
    %376 = vector.load %arg18[%c0_140, %c0_141] : memref<12x32xbf16, #tpu.memory_space<vmem>>, vector<12x32xbf16>
    %c0_142 = arith.constant 0 : index
    %c0_143 = arith.constant 0 : index
    %377 = vector.load %arg19[%c0_142, %c0_143] : memref<12x1xf32, #tpu.memory_space<vmem>>, vector<12x1xf32>
    %cst_144 = arith.constant dense<0.000000e+00> : vector<12x128xf32>
    %378 = tpu.matmul %376, %375, %cst_144 {dimension_numbers = #tpu.dot_dimension_numbers<[1], [0], [0], [1], [0, 0, 1, 1], [], []>} : vector<12x32xbf16>, vector<32x128xbf16>, vector<12x128xf32> -> vector<12x128xf32>
    %379 = vector.broadcast %377 : vector<12x1xf32> to vector<12x128xf32>
    %380 = arith.addf %378, %379 : vector<12x128xf32>
    %cst_145 = arith.constant 0.159154937 : f32
    %381 = vector.broadcast %cst_145 : f32 to vector<1x128xf32>
    %382 = arith.mulf %335, %381 : vector<1x128xf32>
    %383 = vector.extract_strided_slice %380 {offsets = [0, 0], sizes = [4, 128], strides = [1, 1]} : vector<12x128xf32> to vector<4x128xf32>
    %384 = vector.extract_strided_slice %380 {offsets = [4, 0], sizes = [4, 128], strides = [1, 1]} : vector<12x128xf32> to vector<4x128xf32>
    %385 = vector.extract_strided_slice %380 {offsets = [8, 0], sizes = [4, 128], strides = [1, 1]} : vector<12x128xf32> to vector<4x128xf32>
    %cst_146 = arith.constant dense<0xFF800000> : vector<128xf32>
    %386 = vector.multi_reduction <maximumf>, %385, %cst_146 [0] : vector<4x128xf32> to vector<128xf32>
    %387 = vector.shape_cast %386 : vector<128xf32> to vector<1x128xf32>
    %388 = math.absf %383 : vector<4x128xf32>
    %cst_147 = arith.constant 0.000000e+00 : f32
    %389 = vector.broadcast %cst_147 : f32 to vector<4x128xf32>
    %390 = arith.subf %389, %388 : vector<4x128xf32>
    %cst_148 = arith.constant 0.000000e+00 : f32
    %391 = vector.broadcast %cst_148 : f32 to vector<4x128xf32>
    %392 = arith.subf %391, %384 : vector<4x128xf32>
    %393 = vector.broadcast %387 : vector<1x128xf32> to vector<4x128xf32>
    %394 = arith.subf %385, %393 : vector<4x128xf32>
    %395 = tpu.concatenate %390, %392, %394 in 0 : vector<4x128xf32>, vector<4x128xf32>, vector<4x128xf32> -> vector<12x128xf32>
    %396 = math.exp %395 : vector<12x128xf32>
    %cst_149 = arith.constant 0.000000e+00 : f32
    %397 = vector.broadcast %cst_149 : f32 to vector<4x128xf32>
    %398 = arith.maximumf %383, %397 : vector<4x128xf32>
    %399 = vector.extract_strided_slice %396 {offsets = [0, 0], sizes = [4, 128], strides = [1, 1]} : vector<12x128xf32> to vector<4x128xf32>
    %cst_150 = arith.constant 1.000000e+00 : f32
    %400 = vector.broadcast %cst_150 : f32 to vector<4x128xf32>
    %401 = arith.addf %400, %399 : vector<4x128xf32>
    %402 = math.log %401 : vector<4x128xf32>
    %403 = arith.addf %398, %402 : vector<4x128xf32>
    %cst_151 = arith.constant 0.00999999977 : f32
    %404 = vector.broadcast %cst_151 : f32 to vector<4x128xf32>
    %405 = arith.addf %403, %404 : vector<4x128xf32>
    %406 = vector.extract_strided_slice %396 {offsets = [4, 0], sizes = [4, 128], strides = [1, 1]} : vector<12x128xf32> to vector<4x128xf32>
    %cst_152 = arith.constant 1.000000e+00 : f32
    %407 = vector.broadcast %cst_152 : f32 to vector<4x128xf32>
    %408 = arith.addf %407, %406 : vector<4x128xf32>
    %cst_153 = arith.constant 1.000000e+00 : f32
    %409 = vector.broadcast %cst_153 : f32 to vector<4x128xf32>
    %410 = arith.divf %409, %408 : vector<4x128xf32>
    %411 = vector.broadcast %382 : vector<1x128xf32> to vector<4x128xf32>
    %412 = arith.subf %411, %410 : vector<4x128xf32>
    %413 = arith.mulf %405, %412 : vector<4x128xf32>
    %cst_154 = arith.constant 0.000000e+00 : f32
    %414 = vector.broadcast %cst_154 : f32 to vector<4x128xf32>
    %415 = arith.subf %414, %405 : vector<4x128xf32>
    %416 = arith.mulf %415, %410 : vector<4x128xf32>
    %cst_155 = arith.constant 1.000000e+00 : f32
    %417 = vector.broadcast %cst_155 : f32 to vector<4x128xf32>
    %418 = arith.subf %417, %410 : vector<4x128xf32>
    %419 = arith.mulf %405, %418 : vector<4x128xf32>
    %420 = tpu.concatenate %413, %416, %419 in 0 : vector<4x128xf32>, vector<4x128xf32>, vector<4x128xf32> -> vector<12x128xf32>
    %cst_156 = arith.constant 5.000000e-01 : f32
    %421 = vector.broadcast %cst_156 : f32 to vector<12x128xf32>
    %422 = arith.mulf %421, %420 : vector<12x128xf32>
    %423 = math.tanh %422 : vector<12x128xf32>
    %cst_157 = arith.constant 1.000000e+00 : f32
    %424 = vector.broadcast %cst_157 : f32 to vector<12x128xf32>
    %425 = arith.addf %423, %424 : vector<12x128xf32>
    %cst_158 = arith.constant 5.000000e-01 : f32
    %426 = vector.broadcast %cst_158 : f32 to vector<12x128xf32>
    %427 = arith.mulf %426, %425 : vector<12x128xf32>
    %428 = vector.extract_strided_slice %427 {offsets = [0, 0], sizes = [4, 128], strides = [1, 1]} : vector<12x128xf32> to vector<4x128xf32>
    %429 = vector.extract_strided_slice %427 {offsets = [4, 0], sizes = [4, 128], strides = [1, 1]} : vector<12x128xf32> to vector<4x128xf32>
    %430 = vector.extract_strided_slice %427 {offsets = [8, 0], sizes = [4, 128], strides = [1, 1]} : vector<12x128xf32> to vector<4x128xf32>
    %431 = arith.subf %430, %429 : vector<4x128xf32>
    %cst_159 = arith.constant 9.99999997E-7 : f32
    %432 = vector.broadcast %cst_159 : f32 to vector<4x128xf32>
    %433 = arith.maximumf %431, %432 : vector<4x128xf32>
    %cst_160 = arith.constant 1.000000e+00 : f32
    %434 = vector.broadcast %cst_160 : f32 to vector<4x128xf32>
    %435 = arith.divf %434, %433 : vector<4x128xf32>
    %436 = arith.subf %428, %429 : vector<4x128xf32>
    %437 = arith.mulf %436, %435 : vector<4x128xf32>
    %438 = arith.mulf %405, %435 : vector<4x128xf32>
    %cst_161 = arith.constant 1.000000e+00 : f32
    %439 = vector.broadcast %cst_161 : f32 to vector<4x128xf32>
    %440 = arith.subf %439, %428 : vector<4x128xf32>
    %441 = arith.mulf %428, %440 : vector<4x128xf32>
    %442 = arith.mulf %438, %441 : vector<4x128xf32>
    %443 = vector.extract_strided_slice %396 {offsets = [8, 0], sizes = [4, 128], strides = [1, 1]} : vector<12x128xf32> to vector<4x128xf32>
    %cst_162 = arith.constant dense<0.000000e+00> : vector<128xf32>
    %444 = vector.multi_reduction <add>, %443, %cst_162 [0] : vector<4x128xf32> to vector<128xf32>
    %445 = vector.shape_cast %444 : vector<128xf32> to vector<1x128xf32>
    %cst_163 = arith.constant 0.959999978 : f32
    %446 = vector.broadcast %cst_163 : f32 to vector<4x128xf32>
    %447 = arith.mulf %446, %443 : vector<4x128xf32>
    %448 = tpu.reciprocal %445 {approx = true} : vector<1x128xf32> -> vector<1x128xf32>
    %449 = vector.broadcast %448 : vector<1x128xf32> to vector<4x128xf32>
    %450 = arith.mulf %447, %449 : vector<4x128xf32>
    %cst_164 = arith.constant 0.00999999977 : f32
    %451 = vector.broadcast %cst_164 : f32 to vector<4x128xf32>
    %452 = arith.addf %451, %450 : vector<4x128xf32>
    %453 = arith.mulf %452, %437 : vector<4x128xf32>
    %cst_165 = arith.constant dense<0.000000e+00> : vector<128xf32>
    %454 = vector.multi_reduction <add>, %453, %cst_165 [0] : vector<4x128xf32> to vector<128xf32>
    %455 = vector.shape_cast %454 : vector<128xf32> to vector<1x128xf32>
    %456 = arith.mulf %452, %442 : vector<4x128xf32>
    %cst_166 = arith.constant dense<0.000000e+00> : vector<128xf32>
    %457 = vector.multi_reduction <add>, %456, %cst_166 [0] : vector<4x128xf32> to vector<128xf32>
    %458 = vector.shape_cast %457 : vector<128xf32> to vector<1x128xf32>
    %cst_167 = arith.constant 6.28318548 : f32
    %459 = vector.broadcast %cst_167 : f32 to vector<1x128xf32>
    %460 = arith.mulf %459, %455 : vector<1x128xf32>
    %cst_168 = arith.constant 1.000000e-30 : f32
    %461 = vector.broadcast %cst_168 : f32 to vector<1x128xf32>
    %462 = arith.maximumf %458, %461 : vector<1x128xf32>
    %463 = math.log %462 : vector<1x128xf32>
    %464 = arith.select %4, %460, %335 : vector<1x128xi1>, vector<1x128xf32>
    %cst_169 = arith.constant 0.000000e+00 : f32
    %465 = vector.broadcast %cst_169 : f32 to vector<1x128xf32>
    %466 = arith.select %4, %463, %465 : vector<1x128xi1>, vector<1x128xf32>
    %467 = arith.addf %317, %466 : vector<1x128xf32>
    %cst_170 = arith.constant 1.57079637 : f32
    %468 = vector.broadcast %cst_170 : f32 to vector<1x128xf32>
    %469 = arith.addf %464, %468 : vector<1x128xf32>
    %cst_171 = arith.constant 0.159154937 : f32
    %470 = vector.broadcast %cst_171 : f32 to vector<1x128xf32>
    %471 = arith.mulf %469, %470 : vector<1x128xf32>
    %472 = math.floor %471 : vector<1x128xf32>
    %cst_172 = arith.constant 6.28318548 : f32
    %473 = vector.broadcast %cst_172 : f32 to vector<1x128xf32>
    %474 = arith.mulf %473, %472 : vector<1x128xf32>
    %475 = arith.subf %469, %474 : vector<1x128xf32>
    %cst_173 = arith.constant 0.000000e+00 : f32
    %476 = vector.broadcast %cst_173 : f32 to vector<1x128xf32>
    %477 = arith.cmpf olt, %475, %476 : vector<1x128xf32>
    %cst_174 = arith.constant 6.28318548 : f32
    %478 = vector.broadcast %cst_174 : f32 to vector<1x128xf32>
    %479 = arith.addf %475, %478 : vector<1x128xf32>
    %480 = arith.select %477, %479, %475 : vector<1x128xi1>, vector<1x128xf32>
    %cst_175 = arith.constant 6.28318548 : f32
    %481 = vector.broadcast %cst_175 : f32 to vector<1x128xf32>
    %482 = arith.cmpf oge, %480, %481 : vector<1x128xf32>
    %cst_176 = arith.constant 6.28318548 : f32
    %483 = vector.broadcast %cst_176 : f32 to vector<1x128xf32>
    %484 = arith.subf %480, %483 : vector<1x128xf32>
    %485 = arith.select %482, %484, %480 : vector<1x128xi1>, vector<1x128xf32>
    %cst_177 = arith.constant 1.57079637 : f32
    %486 = vector.broadcast %cst_177 : f32 to vector<1x128xf32>
    %487 = arith.addf %353, %486 : vector<1x128xf32>
    %cst_178 = arith.constant 0.159154937 : f32
    %488 = vector.broadcast %cst_178 : f32 to vector<1x128xf32>
    %489 = arith.mulf %487, %488 : vector<1x128xf32>
    %490 = math.floor %489 : vector<1x128xf32>
    %cst_179 = arith.constant 6.28318548 : f32
    %491 = vector.broadcast %cst_179 : f32 to vector<1x128xf32>
    %492 = arith.mulf %491, %490 : vector<1x128xf32>
    %493 = arith.subf %487, %492 : vector<1x128xf32>
    %cst_180 = arith.constant 0.000000e+00 : f32
    %494 = vector.broadcast %cst_180 : f32 to vector<1x128xf32>
    %495 = arith.cmpf olt, %493, %494 : vector<1x128xf32>
    %cst_181 = arith.constant 6.28318548 : f32
    %496 = vector.broadcast %cst_181 : f32 to vector<1x128xf32>
    %497 = arith.addf %493, %496 : vector<1x128xf32>
    %498 = arith.select %495, %497, %493 : vector<1x128xi1>, vector<1x128xf32>
    %cst_182 = arith.constant 6.28318548 : f32
    %499 = vector.broadcast %cst_182 : f32 to vector<1x128xf32>
    %500 = arith.cmpf oge, %498, %499 : vector<1x128xf32>
    %cst_183 = arith.constant 6.28318548 : f32
    %501 = vector.broadcast %cst_183 : f32 to vector<1x128xf32>
    %502 = arith.subf %498, %501 : vector<1x128xf32>
    %503 = arith.select %500, %502, %498 : vector<1x128xi1>, vector<1x128xf32>
    %c127_i32_184 = arith.constant 127 : i32
    %504 = tpu.dynamic_rotate %485 by %c127_i32_184 dim 1 : vector<1x128xf32>, i32 -> vector<1x128xf32>
    %c7_i32_185 = arith.constant 7 : i32
    %505 = tpu.dynamic_rotate %485 by %c7_i32_185 dim 1 : vector<1x128xf32>, i32 -> vector<1x128xf32>
    %506 = arith.select %10, %505, %504 : vector<1x128xi1>, vector<1x128xf32>
    %507 = tpu.concatenate %506, %485 in 0 : vector<1x128xf32>, vector<1x128xf32> -> vector<2x128xf32>
    %508 = math.cos %507 : vector<2x128xf32>
    %509 = math.sin %507 : vector<2x128xf32>
    %510 = tpu.concatenate %508, %509 in 0 : vector<2x128xf32>, vector<2x128xf32> -> vector<4x128xf32>
    %cst_186 = arith.constant 0.000000e+00 : f32
    %511 = vector.broadcast %cst_186 : f32 to vector<4x128xf32>
    %512 = tpu.concatenate %510, %511 in 0 : vector<4x128xf32>, vector<4x128xf32> -> vector<8x128xf32>
    %513 = arith.truncf %512 : vector<8x128xf32> to vector<8x128xbf16>
    %c0_187 = arith.constant 0 : index
    %c0_188 = arith.constant 0 : index
    %514 = vector.load %arg20[%c0_187, %c0_188] : memref<32x8xbf16, #tpu.memory_space<vmem>>, vector<32x8xbf16>
    %c0_189 = arith.constant 0 : index
    %c0_190 = arith.constant 0 : index
    %515 = vector.load %arg21[%c0_189, %c0_190] : memref<32x1xf32, #tpu.memory_space<vmem>>, vector<32x1xf32>
    %cst_191 = arith.constant dense<0.000000e+00> : vector<32x128xf32>
    %516 = tpu.matmul %514, %513, %cst_191 {dimension_numbers = #tpu.dot_dimension_numbers<[1], [0], [0], [1], [0, 0, 1, 1], [], []>} : vector<32x8xbf16>, vector<8x128xbf16>, vector<32x128xf32> -> vector<32x128xf32>
    %517 = vector.broadcast %515 : vector<32x1xf32> to vector<32x128xf32>
    %518 = arith.addf %516, %517 : vector<32x128xf32>
    %519 = math.tanh %518 : vector<32x128xf32>
    %520 = arith.truncf %519 : vector<32x128xf32> to vector<32x128xbf16>
    %c0_192 = arith.constant 0 : index
    %c0_193 = arith.constant 0 : index
    %521 = vector.load %arg22[%c0_192, %c0_193] : memref<32x32xbf16, #tpu.memory_space<vmem>>, vector<32x32xbf16>
    %c0_194 = arith.constant 0 : index
    %c0_195 = arith.constant 0 : index
    %522 = vector.load %arg23[%c0_194, %c0_195] : memref<32x1xf32, #tpu.memory_space<vmem>>, vector<32x1xf32>
    %cst_196 = arith.constant dense<0.000000e+00> : vector<32x128xf32>
    %523 = tpu.matmul %521, %520, %cst_196 {dimension_numbers = #tpu.dot_dimension_numbers<[1], [0], [0], [1], [0, 0, 1, 1], [], []>} : vector<32x32xbf16>, vector<32x128xbf16>, vector<32x128xf32> -> vector<32x128xf32>
    %524 = vector.broadcast %522 : vector<32x1xf32> to vector<32x128xf32>
    %525 = arith.addf %523, %524 : vector<32x128xf32>
    %526 = math.tanh %525 : vector<32x128xf32>
    %527 = arith.truncf %526 : vector<32x128xf32> to vector<32x128xbf16>
    %c0_197 = arith.constant 0 : index
    %c0_198 = arith.constant 0 : index
    %528 = vector.load %arg24[%c0_197, %c0_198] : memref<12x32xbf16, #tpu.memory_space<vmem>>, vector<12x32xbf16>
    %c0_199 = arith.constant 0 : index
    %c0_200 = arith.constant 0 : index
    %529 = vector.load %arg25[%c0_199, %c0_200] : memref<12x1xf32, #tpu.memory_space<vmem>>, vector<12x1xf32>
    %cst_201 = arith.constant dense<0.000000e+00> : vector<12x128xf32>
    %530 = tpu.matmul %528, %527, %cst_201 {dimension_numbers = #tpu.dot_dimension_numbers<[1], [0], [0], [1], [0, 0, 1, 1], [], []>} : vector<12x32xbf16>, vector<32x128xbf16>, vector<12x128xf32> -> vector<12x128xf32>
    %531 = vector.broadcast %529 : vector<12x1xf32> to vector<12x128xf32>
    %532 = arith.addf %530, %531 : vector<12x128xf32>
    %cst_202 = arith.constant 0.159154937 : f32
    %533 = vector.broadcast %cst_202 : f32 to vector<1x128xf32>
    %534 = arith.mulf %503, %533 : vector<1x128xf32>
    %535 = vector.extract_strided_slice %532 {offsets = [0, 0], sizes = [4, 128], strides = [1, 1]} : vector<12x128xf32> to vector<4x128xf32>
    %536 = vector.extract_strided_slice %532 {offsets = [4, 0], sizes = [4, 128], strides = [1, 1]} : vector<12x128xf32> to vector<4x128xf32>
    %537 = vector.extract_strided_slice %532 {offsets = [8, 0], sizes = [4, 128], strides = [1, 1]} : vector<12x128xf32> to vector<4x128xf32>
    %cst_203 = arith.constant dense<0xFF800000> : vector<128xf32>
    %538 = vector.multi_reduction <maximumf>, %537, %cst_203 [0] : vector<4x128xf32> to vector<128xf32>
    %539 = vector.shape_cast %538 : vector<128xf32> to vector<1x128xf32>
    %540 = math.absf %535 : vector<4x128xf32>
    %cst_204 = arith.constant 0.000000e+00 : f32
    %541 = vector.broadcast %cst_204 : f32 to vector<4x128xf32>
    %542 = arith.subf %541, %540 : vector<4x128xf32>
    %cst_205 = arith.constant 0.000000e+00 : f32
    %543 = vector.broadcast %cst_205 : f32 to vector<4x128xf32>
    %544 = arith.subf %543, %536 : vector<4x128xf32>
    %545 = vector.broadcast %539 : vector<1x128xf32> to vector<4x128xf32>
    %546 = arith.subf %537, %545 : vector<4x128xf32>
    %547 = tpu.concatenate %542, %544, %546 in 0 : vector<4x128xf32>, vector<4x128xf32>, vector<4x128xf32> -> vector<12x128xf32>
    %548 = math.exp %547 : vector<12x128xf32>
    %cst_206 = arith.constant 0.000000e+00 : f32
    %549 = vector.broadcast %cst_206 : f32 to vector<4x128xf32>
    %550 = arith.maximumf %535, %549 : vector<4x128xf32>
    %551 = vector.extract_strided_slice %548 {offsets = [0, 0], sizes = [4, 128], strides = [1, 1]} : vector<12x128xf32> to vector<4x128xf32>
    %cst_207 = arith.constant 1.000000e+00 : f32
    %552 = vector.broadcast %cst_207 : f32 to vector<4x128xf32>
    %553 = arith.addf %552, %551 : vector<4x128xf32>
    %554 = math.log %553 : vector<4x128xf32>
    %555 = arith.addf %550, %554 : vector<4x128xf32>
    %cst_208 = arith.constant 0.00999999977 : f32
    %556 = vector.broadcast %cst_208 : f32 to vector<4x128xf32>
    %557 = arith.addf %555, %556 : vector<4x128xf32>
    %558 = vector.extract_strided_slice %548 {offsets = [4, 0], sizes = [4, 128], strides = [1, 1]} : vector<12x128xf32> to vector<4x128xf32>
    %cst_209 = arith.constant 1.000000e+00 : f32
    %559 = vector.broadcast %cst_209 : f32 to vector<4x128xf32>
    %560 = arith.addf %559, %558 : vector<4x128xf32>
    %cst_210 = arith.constant 1.000000e+00 : f32
    %561 = vector.broadcast %cst_210 : f32 to vector<4x128xf32>
    %562 = arith.divf %561, %560 : vector<4x128xf32>
    %563 = vector.broadcast %534 : vector<1x128xf32> to vector<4x128xf32>
    %564 = arith.subf %563, %562 : vector<4x128xf32>
    %565 = arith.mulf %557, %564 : vector<4x128xf32>
    %cst_211 = arith.constant 0.000000e+00 : f32
    %566 = vector.broadcast %cst_211 : f32 to vector<4x128xf32>
    %567 = arith.subf %566, %557 : vector<4x128xf32>
    %568 = arith.mulf %567, %562 : vector<4x128xf32>
    %cst_212 = arith.constant 1.000000e+00 : f32
    %569 = vector.broadcast %cst_212 : f32 to vector<4x128xf32>
    %570 = arith.subf %569, %562 : vector<4x128xf32>
    %571 = arith.mulf %557, %570 : vector<4x128xf32>
    %572 = tpu.concatenate %565, %568, %571 in 0 : vector<4x128xf32>, vector<4x128xf32>, vector<4x128xf32> -> vector<12x128xf32>
    %cst_213 = arith.constant 5.000000e-01 : f32
    %573 = vector.broadcast %cst_213 : f32 to vector<12x128xf32>
    %574 = arith.mulf %573, %572 : vector<12x128xf32>
    %575 = math.tanh %574 : vector<12x128xf32>
    %cst_214 = arith.constant 1.000000e+00 : f32
    %576 = vector.broadcast %cst_214 : f32 to vector<12x128xf32>
    %577 = arith.addf %575, %576 : vector<12x128xf32>
    %cst_215 = arith.constant 5.000000e-01 : f32
    %578 = vector.broadcast %cst_215 : f32 to vector<12x128xf32>
    %579 = arith.mulf %578, %577 : vector<12x128xf32>
    %580 = vector.extract_strided_slice %579 {offsets = [0, 0], sizes = [4, 128], strides = [1, 1]} : vector<12x128xf32> to vector<4x128xf32>
    %581 = vector.extract_strided_slice %579 {offsets = [4, 0], sizes = [4, 128], strides = [1, 1]} : vector<12x128xf32> to vector<4x128xf32>
    %582 = vector.extract_strided_slice %579 {offsets = [8, 0], sizes = [4, 128], strides = [1, 1]} : vector<12x128xf32> to vector<4x128xf32>
    %583 = arith.subf %582, %581 : vector<4x128xf32>
    %cst_216 = arith.constant 9.99999997E-7 : f32
    %584 = vector.broadcast %cst_216 : f32 to vector<4x128xf32>
    %585 = arith.maximumf %583, %584 : vector<4x128xf32>
    %cst_217 = arith.constant 1.000000e+00 : f32
    %586 = vector.broadcast %cst_217 : f32 to vector<4x128xf32>
    %587 = arith.divf %586, %585 : vector<4x128xf32>
    %588 = arith.subf %580, %581 : vector<4x128xf32>
    %589 = arith.mulf %588, %587 : vector<4x128xf32>
    %590 = arith.mulf %557, %587 : vector<4x128xf32>
    %cst_218 = arith.constant 1.000000e+00 : f32
    %591 = vector.broadcast %cst_218 : f32 to vector<4x128xf32>
    %592 = arith.subf %591, %580 : vector<4x128xf32>
    %593 = arith.mulf %580, %592 : vector<4x128xf32>
    %594 = arith.mulf %590, %593 : vector<4x128xf32>
    %595 = vector.extract_strided_slice %548 {offsets = [8, 0], sizes = [4, 128], strides = [1, 1]} : vector<12x128xf32> to vector<4x128xf32>
    %cst_219 = arith.constant dense<0.000000e+00> : vector<128xf32>
    %596 = vector.multi_reduction <add>, %595, %cst_219 [0] : vector<4x128xf32> to vector<128xf32>
    %597 = vector.shape_cast %596 : vector<128xf32> to vector<1x128xf32>
    %cst_220 = arith.constant 0.959999978 : f32
    %598 = vector.broadcast %cst_220 : f32 to vector<4x128xf32>
    %599 = arith.mulf %598, %595 : vector<4x128xf32>
    %600 = tpu.reciprocal %597 {approx = true} : vector<1x128xf32> -> vector<1x128xf32>
    %601 = vector.broadcast %600 : vector<1x128xf32> to vector<4x128xf32>
    %602 = arith.mulf %599, %601 : vector<4x128xf32>
    %cst_221 = arith.constant 0.00999999977 : f32
    %603 = vector.broadcast %cst_221 : f32 to vector<4x128xf32>
    %604 = arith.addf %603, %602 : vector<4x128xf32>
    %605 = arith.mulf %604, %589 : vector<4x128xf32>
    %cst_222 = arith.constant dense<0.000000e+00> : vector<128xf32>
    %606 = vector.multi_reduction <add>, %605, %cst_222 [0] : vector<4x128xf32> to vector<128xf32>
    %607 = vector.shape_cast %606 : vector<128xf32> to vector<1x128xf32>
    %608 = arith.mulf %604, %594 : vector<4x128xf32>
    %cst_223 = arith.constant dense<0.000000e+00> : vector<128xf32>
    %609 = vector.multi_reduction <add>, %608, %cst_223 [0] : vector<4x128xf32> to vector<128xf32>
    %610 = vector.shape_cast %609 : vector<128xf32> to vector<1x128xf32>
    %cst_224 = arith.constant 6.28318548 : f32
    %611 = vector.broadcast %cst_224 : f32 to vector<1x128xf32>
    %612 = arith.mulf %611, %607 : vector<1x128xf32>
    %cst_225 = arith.constant 1.000000e-30 : f32
    %613 = vector.broadcast %cst_225 : f32 to vector<1x128xf32>
    %614 = arith.maximumf %610, %613 : vector<1x128xf32>
    %615 = math.log %614 : vector<1x128xf32>
    %616 = arith.select %7, %612, %503 : vector<1x128xi1>, vector<1x128xf32>
    %cst_226 = arith.constant 0.000000e+00 : f32
    %617 = vector.broadcast %cst_226 : f32 to vector<1x128xf32>
    %618 = arith.select %7, %615, %617 : vector<1x128xi1>, vector<1x128xf32>
    %619 = arith.addf %467, %618 : vector<1x128xf32>
    %cst_227 = arith.constant 1.57079637 : f32
    %620 = vector.broadcast %cst_227 : f32 to vector<1x128xf32>
    %621 = arith.addf %485, %620 : vector<1x128xf32>
    %cst_228 = arith.constant 0.159154937 : f32
    %622 = vector.broadcast %cst_228 : f32 to vector<1x128xf32>
    %623 = arith.mulf %621, %622 : vector<1x128xf32>
    %624 = math.floor %623 : vector<1x128xf32>
    %cst_229 = arith.constant 6.28318548 : f32
    %625 = vector.broadcast %cst_229 : f32 to vector<1x128xf32>
    %626 = arith.mulf %625, %624 : vector<1x128xf32>
    %627 = arith.subf %621, %626 : vector<1x128xf32>
    %cst_230 = arith.constant 0.000000e+00 : f32
    %628 = vector.broadcast %cst_230 : f32 to vector<1x128xf32>
    %629 = arith.cmpf olt, %627, %628 : vector<1x128xf32>
    %cst_231 = arith.constant 6.28318548 : f32
    %630 = vector.broadcast %cst_231 : f32 to vector<1x128xf32>
    %631 = arith.addf %627, %630 : vector<1x128xf32>
    %632 = arith.select %629, %631, %627 : vector<1x128xi1>, vector<1x128xf32>
    %cst_232 = arith.constant 6.28318548 : f32
    %633 = vector.broadcast %cst_232 : f32 to vector<1x128xf32>
    %634 = arith.cmpf oge, %632, %633 : vector<1x128xf32>
    %cst_233 = arith.constant 6.28318548 : f32
    %635 = vector.broadcast %cst_233 : f32 to vector<1x128xf32>
    %636 = arith.subf %632, %635 : vector<1x128xf32>
    %637 = arith.select %634, %636, %632 : vector<1x128xi1>, vector<1x128xf32>
    %cst_234 = arith.constant 1.57079637 : f32
    %638 = vector.broadcast %cst_234 : f32 to vector<1x128xf32>
    %639 = arith.addf %616, %638 : vector<1x128xf32>
    %cst_235 = arith.constant 0.159154937 : f32
    %640 = vector.broadcast %cst_235 : f32 to vector<1x128xf32>
    %641 = arith.mulf %639, %640 : vector<1x128xf32>
    %642 = math.floor %641 : vector<1x128xf32>
    %cst_236 = arith.constant 6.28318548 : f32
    %643 = vector.broadcast %cst_236 : f32 to vector<1x128xf32>
    %644 = arith.mulf %643, %642 : vector<1x128xf32>
    %645 = arith.subf %639, %644 : vector<1x128xf32>
    %cst_237 = arith.constant 0.000000e+00 : f32
    %646 = vector.broadcast %cst_237 : f32 to vector<1x128xf32>
    %647 = arith.cmpf olt, %645, %646 : vector<1x128xf32>
    %cst_238 = arith.constant 6.28318548 : f32
    %648 = vector.broadcast %cst_238 : f32 to vector<1x128xf32>
    %649 = arith.addf %645, %648 : vector<1x128xf32>
    %650 = arith.select %647, %649, %645 : vector<1x128xi1>, vector<1x128xf32>
    %cst_239 = arith.constant 6.28318548 : f32
    %651 = vector.broadcast %cst_239 : f32 to vector<1x128xf32>
    %652 = arith.cmpf oge, %650, %651 : vector<1x128xf32>
    %cst_240 = arith.constant 6.28318548 : f32
    %653 = vector.broadcast %cst_240 : f32 to vector<1x128xf32>
    %654 = arith.subf %650, %653 : vector<1x128xf32>
    %655 = arith.select %652, %654, %650 : vector<1x128xi1>, vector<1x128xf32>
    %656 = arith.addf %637, %1 : vector<1x128xf32>
    %cst_241 = arith.constant 3.14159274 : f32
    %657 = vector.broadcast %cst_241 : f32 to vector<1x128xf32>
    %658 = arith.subf %656, %657 : vector<1x128xf32>
    %cst_242 = arith.constant 0.159154937 : f32
    %659 = vector.broadcast %cst_242 : f32 to vector<1x128xf32>
    %660 = arith.mulf %658, %659 : vector<1x128xf32>
    %661 = math.floor %660 : vector<1x128xf32>
    %cst_243 = arith.constant 6.28318548 : f32
    %662 = vector.broadcast %cst_243 : f32 to vector<1x128xf32>
    %663 = arith.mulf %662, %661 : vector<1x128xf32>
    %664 = arith.subf %658, %663 : vector<1x128xf32>
    %cst_244 = arith.constant 0.000000e+00 : f32
    %665 = vector.broadcast %cst_244 : f32 to vector<1x128xf32>
    %666 = arith.cmpf olt, %664, %665 : vector<1x128xf32>
    %cst_245 = arith.constant 6.28318548 : f32
    %667 = vector.broadcast %cst_245 : f32 to vector<1x128xf32>
    %668 = arith.addf %664, %667 : vector<1x128xf32>
    %669 = arith.select %666, %668, %664 : vector<1x128xi1>, vector<1x128xf32>
    %cst_246 = arith.constant 6.28318548 : f32
    %670 = vector.broadcast %cst_246 : f32 to vector<1x128xf32>
    %671 = arith.cmpf oge, %669, %670 : vector<1x128xf32>
    %cst_247 = arith.constant 6.28318548 : f32
    %672 = vector.broadcast %cst_247 : f32 to vector<1x128xf32>
    %673 = arith.subf %669, %672 : vector<1x128xf32>
    %674 = arith.select %671, %673, %669 : vector<1x128xi1>, vector<1x128xf32>
    %675 = arith.addf %655, %1 : vector<1x128xf32>
    %cst_248 = arith.constant 3.14159274 : f32
    %676 = vector.broadcast %cst_248 : f32 to vector<1x128xf32>
    %677 = arith.subf %675, %676 : vector<1x128xf32>
    %cst_249 = arith.constant 0.159154937 : f32
    %678 = vector.broadcast %cst_249 : f32 to vector<1x128xf32>
    %679 = arith.mulf %677, %678 : vector<1x128xf32>
    %680 = math.floor %679 : vector<1x128xf32>
    %cst_250 = arith.constant 6.28318548 : f32
    %681 = vector.broadcast %cst_250 : f32 to vector<1x128xf32>
    %682 = arith.mulf %681, %680 : vector<1x128xf32>
    %683 = arith.subf %677, %682 : vector<1x128xf32>
    %cst_251 = arith.constant 0.000000e+00 : f32
    %684 = vector.broadcast %cst_251 : f32 to vector<1x128xf32>
    %685 = arith.cmpf olt, %683, %684 : vector<1x128xf32>
    %cst_252 = arith.constant 6.28318548 : f32
    %686 = vector.broadcast %cst_252 : f32 to vector<1x128xf32>
    %687 = arith.addf %683, %686 : vector<1x128xf32>
    %688 = arith.select %685, %687, %683 : vector<1x128xi1>, vector<1x128xf32>
    %cst_253 = arith.constant 6.28318548 : f32
    %689 = vector.broadcast %cst_253 : f32 to vector<1x128xf32>
    %690 = arith.cmpf oge, %688, %689 : vector<1x128xf32>
    %cst_254 = arith.constant 6.28318548 : f32
    %691 = vector.broadcast %cst_254 : f32 to vector<1x128xf32>
    %692 = arith.subf %688, %691 : vector<1x128xf32>
    %693 = arith.select %690, %692, %688 : vector<1x128xi1>, vector<1x128xf32>
    %694 = tpu.concatenate %674, %693, %619 in 0 : vector<1x128xf32>, vector<1x128xf32>, vector<1x128xf32> -> vector<3x128xf32>
    %c0_255 = arith.constant 0 : index
    %c0_256 = arith.constant 0 : index
    %695 = vector.load %arg26[%c0_255, %c0_256] : memref<3x128xf32, #tpu.memory_space<vmem>>, vector<3x128xf32>
    tpu.vector_store %arg26[%c0_255, %c0_256], %694 {strides = array<i32>} : memref<3x128xf32, #tpu.memory_space<vmem>>, vector<3x128xf32>,
    return
  }
  func.func @transform_0(%arg0: i32) -> (i32, i32) {
    %c0_i32 = arith.constant 0 : i32
    %c0_i32_0 = arith.constant 0 : i32
    return %c0_i32, %arg0 : i32, i32
  }
  func.func @transform_1(%arg0: i32) -> (i32, i32) {
    %c0_i32 = arith.constant 0 : i32
    %c0_i32_0 = arith.constant 0 : i32
    %c0_i32_1 = arith.constant 0 : i32
    return %c0_i32, %c0_i32_0 : i32, i32
  }
  func.func @transform_2(%arg0: i32) -> (i32, i32) {
    %c0_i32 = arith.constant 0 : i32
    %c0_i32_0 = arith.constant 0 : i32
    %c0_i32_1 = arith.constant 0 : i32
    return %c0_i32, %c0_i32_0 : i32, i32
  }
  func.func @transform_3(%arg0: i32) -> (i32, i32) {
    %c0_i32 = arith.constant 0 : i32
    %c0_i32_0 = arith.constant 0 : i32
    %c0_i32_1 = arith.constant 0 : i32
    return %c0_i32, %c0_i32_0 : i32, i32
  }
  func.func @transform_4(%arg0: i32) -> (i32, i32) {
    %c0_i32 = arith.constant 0 : i32
    %c0_i32_0 = arith.constant 0 : i32
    %c0_i32_1 = arith.constant 0 : i32
    return %c0_i32, %c0_i32_0 : i32, i32
  }
  func.func @transform_5(%arg0: i32) -> (i32, i32) {
    %c0_i32 = arith.constant 0 : i32
    %c0_i32_0 = arith.constant 0 : i32
    %c0_i32_1 = arith.constant 0 : i32
    return %c0_i32, %c0_i32_0 : i32, i32
  }
  func.func @transform_6(%arg0: i32) -> (i32, i32) {
    %c0_i32 = arith.constant 0 : i32
    %c0_i32_0 = arith.constant 0 : i32
    %c0_i32_1 = arith.constant 0 : i32
    return %c0_i32, %c0_i32_0 : i32, i32
  }
  func.func @transform_7(%arg0: i32) -> (i32, i32) {
    %c0_i32 = arith.constant 0 : i32
    %c0_i32_0 = arith.constant 0 : i32
    %c0_i32_1 = arith.constant 0 : i32
    return %c0_i32, %c0_i32_0 : i32, i32
  }
  func.func @transform_8(%arg0: i32) -> (i32, i32) {
    %c0_i32 = arith.constant 0 : i32
    %c0_i32_0 = arith.constant 0 : i32
    %c0_i32_1 = arith.constant 0 : i32
    return %c0_i32, %c0_i32_0 : i32, i32
  }
  func.func @transform_9(%arg0: i32) -> (i32, i32) {
    %c0_i32 = arith.constant 0 : i32
    %c0_i32_0 = arith.constant 0 : i32
    %c0_i32_1 = arith.constant 0 : i32
    return %c0_i32, %c0_i32_0 : i32, i32
  }
  func.func @transform_10(%arg0: i32) -> (i32, i32) {
    %c0_i32 = arith.constant 0 : i32
    %c0_i32_0 = arith.constant 0 : i32
    %c0_i32_1 = arith.constant 0 : i32
    return %c0_i32, %c0_i32_0 : i32, i32
  }
  func.func @transform_11(%arg0: i32) -> (i32, i32) {
    %c0_i32 = arith.constant 0 : i32
    %c0_i32_0 = arith.constant 0 : i32
    %c0_i32_1 = arith.constant 0 : i32
    return %c0_i32, %c0_i32_0 : i32, i32
  }
  func.func @transform_12(%arg0: i32) -> (i32, i32) {
    %c0_i32 = arith.constant 0 : i32
    %c0_i32_0 = arith.constant 0 : i32
    %c0_i32_1 = arith.constant 0 : i32
    return %c0_i32, %c0_i32_0 : i32, i32
  }
  func.func @transform_13(%arg0: i32) -> (i32, i32) {
    %c0_i32 = arith.constant 0 : i32
    %c0_i32_0 = arith.constant 0 : i32
    %c0_i32_1 = arith.constant 0 : i32
    return %c0_i32, %c0_i32_0 : i32, i32
  }
  func.func @transform_14(%arg0: i32) -> (i32, i32) {
    %c0_i32 = arith.constant 0 : i32
    %c0_i32_0 = arith.constant 0 : i32
    %c0_i32_1 = arith.constant 0 : i32
    return %c0_i32, %c0_i32_0 : i32, i32
  }
  func.func @transform_15(%arg0: i32) -> (i32, i32) {
    %c0_i32 = arith.constant 0 : i32
    %c0_i32_0 = arith.constant 0 : i32
    %c0_i32_1 = arith.constant 0 : i32
    return %c0_i32, %c0_i32_0 : i32, i32
  }
  func.func @transform_16(%arg0: i32) -> (i32, i32) {
    %c0_i32 = arith.constant 0 : i32
    %c0_i32_0 = arith.constant 0 : i32
    %c0_i32_1 = arith.constant 0 : i32
    return %c0_i32, %c0_i32_0 : i32, i32
  }
  func.func @transform_17(%arg0: i32) -> (i32, i32) {
    %c0_i32 = arith.constant 0 : i32
    %c0_i32_0 = arith.constant 0 : i32
    %c0_i32_1 = arith.constant 0 : i32
    return %c0_i32, %c0_i32_0 : i32, i32
  }
  func.func @transform_18(%arg0: i32) -> (i32, i32) {
    %c0_i32 = arith.constant 0 : i32
    %c0_i32_0 = arith.constant 0 : i32
    %c0_i32_1 = arith.constant 0 : i32
    return %c0_i32, %c0_i32_0 : i32, i32
  }
  func.func @transform_19(%arg0: i32) -> (i32, i32) {
    %c0_i32 = arith.constant 0 : i32
    %c0_i32_0 = arith.constant 0 : i32
    %c0_i32_1 = arith.constant 0 : i32
    return %c0_i32, %c0_i32_0 : i32, i32
  }
  func.func @transform_20(%arg0: i32) -> (i32, i32) {
    %c0_i32 = arith.constant 0 : i32
    %c0_i32_0 = arith.constant 0 : i32
    %c0_i32_1 = arith.constant 0 : i32
    return %c0_i32, %c0_i32_0 : i32, i32
  }
  func.func @transform_21(%arg0: i32) -> (i32, i32) {
    %c0_i32 = arith.constant 0 : i32
    %c0_i32_0 = arith.constant 0 : i32
    %c0_i32_1 = arith.constant 0 : i32
    return %c0_i32, %c0_i32_0 : i32, i32
  }
  func.func @transform_22(%arg0: i32) -> (i32, i32) {
    %c0_i32 = arith.constant 0 : i32
    %c0_i32_0 = arith.constant 0 : i32
    %c0_i32_1 = arith.constant 0 : i32
    return %c0_i32, %c0_i32_0 : i32, i32
  }
  func.func @transform_23(%arg0: i32) -> (i32, i32) {
    %c0_i32 = arith.constant 0 : i32
    %c0_i32_0 = arith.constant 0 : i32
    %c0_i32_1 = arith.constant 0 : i32
    return %c0_i32, %c0_i32_0 : i32, i32
  }
  func.func @transform_24(%arg0: i32) -> (i32, i32) {
    %c0_i32 = arith.constant 0 : i32
    %c0_i32_0 = arith.constant 0 : i32
    %c0_i32_1 = arith.constant 0 : i32
    return %c0_i32, %c0_i32_0 : i32, i32
  }
  func.func @transform_25(%arg0: i32) -> (i32, i32) {
    %c0_i32 = arith.constant 0 : i32
    %c0_i32_0 = arith.constant 0 : i32
    return %c0_i32, %arg0 : i32, i32
  }
}

</mosaic_0001>

<bundles_post_ra>
// kernel: squeeze.9
= control target key start
LH: loop header
LB: loop body
LE: loop exit
PB: predicated region body
PF: predicated region fallthrough
CT: control target
= control target key end

     0   :  { %vm7_vm0 = vcmask 64512   ;;  %s37_s8 = smov 8   ;;  %s38_s9 = smov 16   ;;  %vm13_vm1 = vcmask 261312   ;;  %vm19_vm2 = vcmask 195712   ;;  %vm25_vm3 = vcmask 130112   ;;  %s55_s0 = inlined_call_operand.vmem [shape: f32[4,8,1], index: 0, kind: input, shape index: {}]   ;;  %s56_s1 = inlined_call_operand.vmem [shape: f32[32], index: 1, kind: output, shape index: {}]  }
   0x1   :  { %v4_v0 = vld [vmem:[%s55_s0] sm:$0xf]  ;;  %s36_s0 = smov 24  }
   0x2   :  { %5 = vst [vmem:[#allocation1] sm:$0xf] %v4_v0 }
   0x9   :  { %v10_v1 = vld [vmem:[#allocation1 + $0x3] sm:$0x1]   ;;  %v22_v2 = vld [vmem:[#allocation1 + $0x1] sm:$0x1]   ;;  %v6_v3 = vld [vmem:[#allocation1] sm:$0x1]  }
   0xa   :  { %11 = vrot.lane.b32.xlu0 %v10_v1, %s36_s0  ;;  %23 = vrot.lane.b32.xlu1 %v22_v2, %s37_s8  ;;  %v16_v4 = vld [vmem:[#allocation1 + $0x2] sm:$0x1]   ;;  %8 = vst.msk [vmem:[#allocation0] sm:$0x1] %vm7_vm0, %v6_v3  }
   0xe   :  { %17 = vrot.lane.b32.xlu0 %v16_v4, %s38_s9 }
  0x7c   :  { %v12_v5 = vpop.permute.xlu0 %11   ;;  %v24_v6 = vpop.permute.xlu1 %23  }
  0x7d   :  { %14 = vst.msk [vmem:[#allocation0] sm:$0x1] %vm13_vm1, %v12_v5  }
  0x80   :  { %v18_v7 = vpop.permute.xlu0 %17  }
  0x81   :  { %20 = vst.msk [vmem:[#allocation0] sm:$0x1] %vm19_vm2, %v18_v7  }
  0x82   :  { %26 = vst.msk [vmem:[#allocation0] sm:$0x1] %vm25_vm3, %v24_v6  }
  0x89   :  { %v30_v8 = vld [vmem:[#allocation0] sm:$0x1] }
  0x8a   :  { %32 = vst [vmem:[%s56_s1] sm:$0x1] %v30_v8 }

// kernel: squeeze.13
= control target key start
LH: loop header
LB: loop body
LE: loop exit
PB: predicated region body
PF: predicated region fallthrough
CT: control target
= control target key end

     0   :  { %s37_s8 = smov 104   ;;  %vm7_vm0 = vcmask 64512   ;;  %s38_s9 = smov 112   ;;  %s55_s0 = inlined_call_operand.vmem [shape: f32[32], index: 0, kind: input, shape index: {}]   ;;  %s56_s1 = inlined_call_operand.vmem [shape: f32[4,8], index: 1, kind: output, shape index: {}]  }
   0x1   :  { %v4_v0 = vld [vmem:[%s55_s0] sm:$0x1]  ;;  %s36_s0 = smov 120  }
   0x2   :  { %5 = vst [vmem:[#allocation1] sm:$0x1] %v4_v0 }
   0x9   :  { %v9_v1 = vld [vmem:[#allocation1] sm:$0x1]  }
   0xa   :  { %v21_v2 = vld [vmem:[#allocation1] sm:$0x1]   ;;  %10 = vrot.lane.b32.xlu0 %v9_v1, %s36_s0 }
   0xb   :  { %22 = vrot.lane.b32.xlu1 %v21_v2, %s37_s8  ;;  %v6_v3 = vld [vmem:[#allocation1] sm:$0x1]  }
   0xc   :  { %v15_v4 = vld [vmem:[#allocation1] sm:$0x1]   ;;  %8 = vst.msk [vmem:[#allocation0] sm:$0x1] %vm7_vm0, %v6_v3  }
   0xe   :  { %16 = vrot.lane.b32.xlu0 %v15_v4, %s38_s9 }
  0x7c   :  { %v11_v5 = vpop.permute.xlu0 %10  }
  0x7d   :  { %v23_v6 = vpop.permute.xlu1 %22   ;;  %14 = vst.msk [vmem:[#allocation0 + $0x1] sm:$0x1] %vm7_vm0, %v11_v5  }
  0x7e   :  { %26 = vst.msk [vmem:[#allocation0 + $0x3] sm:$0x1] %vm7_vm0, %v23_v6  }
  0x80   :  { %v17_v7 = vpop.permute.xlu0 %16  }
  0x81   :  { %20 = vst.msk [vmem:[#allocation0 + $0x2] sm:$0x1] %vm7_vm0, %v17_v7  }
  0x88   :  { %v30_v8 = vld [vmem:[#allocation0] sm:$0xf] }
  0x89   :  { %32 = vst [vmem:[%s56_s1] sm:$0xf] %v30_v8 }

// kernel: squeeze.12
= control target key start
LH: loop header
LB: loop body
LE: loop exit
PB: predicated region body
PF: predicated region fallthrough
CT: control target
= control target key end

     0   :  { %s37_s8 = smov 104   ;;  %vm7_vm0 = vcmask 64512   ;;  %s38_s9 = smov 112   ;;  %s55_s0 = inlined_call_operand.vmem [shape: f32[32], index: 0, kind: input, shape index: {}]   ;;  %s56_s1 = inlined_call_operand.vmem [shape: f32[4,8,1], index: 1, kind: output, shape index: {}]  }
   0x1   :  { %v4_v0 = vld [vmem:[%s55_s0] sm:$0x1]  ;;  %s36_s0 = smov 120  }
   0x2   :  { %5 = vst [vmem:[#allocation1] sm:$0x1] %v4_v0 }
   0x9   :  { %v9_v1 = vld [vmem:[#allocation1] sm:$0x1]  }
   0xa   :  { %v21_v2 = vld [vmem:[#allocation1] sm:$0x1]   ;;  %10 = vrot.lane.b32.xlu0 %v9_v1, %s36_s0 }
   0xb   :  { %22 = vrot.lane.b32.xlu1 %v21_v2, %s37_s8  ;;  %v6_v3 = vld [vmem:[#allocation1] sm:$0x1]  }
   0xc   :  { %v15_v4 = vld [vmem:[#allocation1] sm:$0x1]   ;;  %8 = vst.msk [vmem:[#allocation0] sm:$0x1] %vm7_vm0, %v6_v3  }
   0xe   :  { %16 = vrot.lane.b32.xlu0 %v15_v4, %s38_s9 }
  0x7c   :  { %v11_v5 = vpop.permute.xlu0 %10  }
  0x7d   :  { %v23_v6 = vpop.permute.xlu1 %22   ;;  %14 = vst.msk [vmem:[#allocation0 + $0x1] sm:$0x1] %vm7_vm0, %v11_v5  }
  0x7e   :  { %26 = vst.msk [vmem:[#allocation0 + $0x3] sm:$0x1] %vm7_vm0, %v23_v6  }
  0x80   :  { %v17_v7 = vpop.permute.xlu0 %16  }
  0x81   :  { %20 = vst.msk [vmem:[#allocation0 + $0x2] sm:$0x1] %vm7_vm0, %v17_v7  }
  0x88   :  { %v30_v8 = vld [vmem:[#allocation0] sm:$0xf] }
  0x89   :  { %32 = vst [vmem:[%s56_s1] sm:$0xf] %v30_v8 }

// kernel: _lambda_.1
= control target key start
LH: loop header
LB: loop body
LE: loop exit
PB: predicated region body
PF: predicated region fallthrough
CT: control target
= control target key end

     0   :  { %s3718_s30 = smov 1   ;;  %vm375_vm2 = vcmask 64512   ;;  %v3061_v14 = vmov 0   ;;  %vm120_vm3 = vcmask 1040384   ;;  %v3062_v38 = vmov 683565275   ;;  %s3683_s0 = inlined_call_operand.vmem [shape: f32[8,128], index: 0, kind: input, shape index: {}]   ;;  %s3684_s1 = inlined_call_operand.vmem [shape: bf16[32,8], index: 1, kind: input, shape index: {}]   ;;  %s3685_s2 = inlined_call_operand.vmem [shape: f32[32,1], index: 2, kind: input, shape index: {}, may-alias: {2,4,8,10,14,16,20,22}]   ;;  %s3686_s4 = inlined_call_operand.vmem [shape: f32[32,1], index: 4, kind: input, shape index: {}, may-alias: {2,4,8,10,14,16,20,22}]   ;;  %s3687_s6 = inlined_call_operand.vmem [shape: f32[12,1], index: 6, kind: input, shape index: {}, may-alias: {6,12,18,24}]   ;;  %s3688_s3 = inlined_call_operand.vmem [shape: bf16[32,32], index: 3, kind: input, shape index: {}]   ;;  %s3689_s5 = inlined_call_operand.vmem [shape: bf16[12,32], index: 5, kind: input, shape index: {}]   ;;  %s3690_s8 = inlined_call_operand.vmem [shape: f32[32,1], index: 8, kind: input, shape index: {}, may-alias: {2,4,8,10,14,16,20,22}]   ;;  %s3691_s10 = inlined_call_operand.vmem [shape: f32[32,1], index: 10, kind: input, shape index: {}, may-alias: {2,4,8,10,14,16,20,22}]   ;;  %s3692_s12 = inlined_call_operand.vmem [shape: f32[12,1], index: 12, kind: input, shape index: {}, may-alias: {6,12,18,24}]   ;;  %s3693_s14 = inlined_call_operand.vmem [shape: f32[32,1], index: 14, kind: input, shape index: {}, may-alias: {2,4,8,10,14,16,20,22}]   ;;  %s3694_s16 = inlined_call_operand.vmem [shape: f32[32,1], index: 16, kind: input, shape index: {}, may-alias: {2,4,8,10,14,16,20,22}]   ;;  %s3695_s18 = inlined_call_operand.vmem [shape: f32[12,1], index: 18, kind: input, shape index: {}, may-alias: {6,12,18,24}]   ;;  %s3696_s7 = inlined_call_operand.vmem [shape: bf16[32,8], index: 7, kind: input, shape index: {}]   ;;  %s3697_s9 = inlined_call_operand.vmem [shape: bf16[32,32], index: 9, kind: input, shape index: {}]   ;;  %s3698_s11 = inlined_call_operand.vmem [shape: bf16[12,32], index: 11, kind: input, shape index: {}]   ;;  %s3699_s13 = inlined_call_operand.vmem [shape: bf16[32,8], index: 13, kind: input, shape index: {}]   ;;  %s3700_s15 = inlined_call_operand.vmem [shape: bf16[32,32], index: 15, kind: input, shape index: {}]   ;;  %s3701_s17 = inlined_call_operand.vmem [shape: bf16[12,32], index: 17, kind: input, shape index: {}]   ;;  %s3702_s20 = inlined_call_operand.vmem [shape: f32[32,1], index: 20, kind: input, shape index: {}, may-alias: {2,4,8,10,14,16,20,22}]   ;;  %s3703_s22 = inlined_call_operand.vmem [shape: f32[32,1], index: 22, kind: input, shape index: {}, may-alias: {2,4,8,10,14,16,20,22}]   ;;  %s3704_s24 = inlined_call_operand.vmem [shape: f32[12,1], index: 24, kind: input, shape index: {}, may-alias: {6,12,18,24}]   ;;  %s3705_s19 = inlined_call_operand.vmem [shape: bf16[32,8], index: 19, kind: input, shape index: {}]   ;;  %s3706_s21 = inlined_call_operand.vmem [shape: bf16[32,32], index: 21, kind: input, shape index: {}]   ;;  %s3707_s23 = inlined_call_operand.vmem [shape: bf16[12,32], index: 23, kind: input, shape index: {}]   ;;  %s3708_s25 = inlined_call_operand.vmem [shape: f32[3,128], index: 25, kind: output, shape index: {}]  }
   0x1   :  { %3719 = sst [smem:[#allocation2_spill]] %s3683_s0  ;;  %2886 = vset.pattern.permute.xlu1 %v3061_v14  ;;  %2885 = vset.pattern.permute.xlu0 %v3061_v14  ;;  %v3063_v40 = vmov 2475754826   ;;  %v3064_v43 = vmov 2131351028   ;;  %s3071_s29 = smov 127  }
   0x2   :  { %3720 = sst [smem:[#allocation3_spill]] %s3684_s1  ;;  %v3065_v46 = vmov 2102212464   ;;  %v3066_v49 = vmov 920167782  }
   0x3   :  { %3721 = sst [smem:[#allocation4_spill]] %s3685_s2  ;;  %s3730_s26 = sld [smem:[#allocation3_spill]]  ;;  %v3067_v52 = vmov 1326507024  }
   0x4   :  { %3722 = sst [smem:[#allocation5_spill]] %s3686_s4  ;;  %s3731_s27 = sld [smem:[#allocation4_spill]] }
   0x5   :  { %3723 = sst [smem:[#allocation6_spill]] %s3687_s6  ;;  %s3732_s2 = sld [smem:[#allocation5_spill]] }
   0x6   :  { %3724 = sst [smem:[#allocation7_spill]] %s3688_s3  ;;  %s3733_s0 = sld [smem:[#allocation6_spill]] }
   0x7   :  { %3725 = sst [smem:[#allocation8_spill]] %s3689_s5  ;;  %s3729_s5 = sld [smem:[#allocation2_spill]] }
   0x8   :  { %3726 = sst [smem:[#allocation9_spill]] %s3690_s8  ;;  %s3735_s3 = sld [smem:[#allocation8_spill]] }
   0x9   :  { %3727 = sst [smem:[#allocation10_spill]] %s3691_s10  ;;  %v2887_v13 = vld [vmem:[%s3730_s26] sm:$0xff]   ;;  %s3734_s10 = sld [smem:[#allocation7_spill]] }
   0xa   :  { %3728 = sst [smem:[#allocation11_spill]] %s3692_s12  ;;  %2767 = vmatprep.mubr.msk.bf16.mxu0 %vm375_vm2, %v2887_v13  ;;  %v342_v15 = vld [vmem:[%s3731_s27 + $0x8] sm:$0xff]  ;;  %v341_v16 = vld [vmem:[%s3731_s27] sm:$0xff]  ;;  %v343_v17 = vld [vmem:[%s3731_s27 + $0x10] sm:$0xff] }
   0xb   :  { %352 = vperm.xlu1 %2886, %v342_v15   ;;  %v444_v18 = vld [vmem:[%s3732_s2] sm:$0xff]  ;;  %v344_v19 = vld [vmem:[%s3731_s27 + $0x18] sm:$0xff]  ;;  %v446_v20 = vld [vmem:[%s3732_s2 + $0x10] sm:$0xff]  ;;  %s3738_s6 = sld [smem:[#allocation11_spill]] }
   0xc   :  { %v445_v21 = vld [vmem:[%s3732_s2 + $0x8] sm:$0xff]  ;;  %v542_v22 = vld [vmem:[%s3733_s0] sm:$0xff]  ;;  %v447_v23 = vld [vmem:[%s3732_s2 + $0x18] sm:$0xff] }
   0xd   :  { %v3205_v0 = vld [vmem:[%s3729_s5] sm:$0xff]  ;;  %v543_v24 = vld [vmem:[%s3733_s0 + $0x8] sm:$0xf]  ;;  %s3070_s0 = smov 7  }
   0xe   :  { %v98_v1 = vrot.slane %v3205_v0, 1 }
   0xf   :  { %357 = vperm.xlu1 %2886, %v343_v17  }
  0x10   :  { %v100_v2 = vsub.f32 %v3205_v0, %v98_v1 }
  0x12   :  { %v101_v3 = vadd.f32 3.1415927, %v100_v2 }
  0x13   :  { %362 = vperm.xlu1 %2886, %v344_v19  }
  0x14   :  { %v102_v4 = vmul.f32 0.15915494, %v101_v3 }
  0x16   :  { %v103_v5 = vfloor.f32 %v102_v4 }
  0x17   :  { %455 = vperm.xlu1 %2886, %v445_v21  }
  0x18   :  { %v104_v6 = vmul.f32 6.2831855, %v103_v5 }
  0x1a   :  { %v105_v7 = vsub.f32 %v101_v3, %v104_v6 }
  0x1b   :  { %465 = vperm.xlu1 %2886, %v447_v23  }
  0x1c   :  { %vm106_vm0 = vcmp.lt.f32.partialorder %v105_v7, 0.0  ;;  %v107_v8 = vadd.f32 6.2831855, %v105_v7 }
  0x1e   :  { %v108_v9 = vsel %vm106_vm0, %v107_v8, %v105_v7 }
  0x1f   :  { %vm109_vm1 = vcmp.ge.f32.partialorder %v108_v9, 6.2831855  ;;  %v2640_v10 = vadd.f32 -6.2831855, %v108_v9  ;;  %551 = vperm.xlu1 %2886, %v543_v24  }
  0x21   :  { %v3209_v11 = vsel %vm109_vm1, %v2640_v10, %v108_v9 }
  0x22   :  { %v113_v12 = vrot.slane %v3209_v11, 1 }
  0x24   :  { %115 = vrot.lane.b32.xlu0 %v113_v12, %s3718_s30  ;;  %s3736_s30 = sld [smem:[#allocation9_spill]] }
  0x28   :  { %347 = vperm.xlu0 %2885, %v341_v16  }
  0x2c   :  { %450 = vperm.xlu0 %2885, %v444_v18  }
  0x30   :  { %460 = vperm.xlu0 %2885, %v446_v20  }
  0x34   :  { %546 = vperm.xlu0 %2885, %v542_v22  }
  0x96   :  { %v116_v25 = vpop.permute.xlu0 %115 }
  0x97   :  { %v118_v26 = vrot.slane %v116_v25, 7 }
  0x99   :  { %v3248_v27 = vsel %vm120_vm3, %v113_v12, %v118_v26 }
  0x9a   :  { %v125_v28 = vand.u32 2139095040, %v3248_v27  ;;  %v122_v32 = vand.u32 2147483647, %v3248_v27  ;;  %vm124_vm11 = vcmp.lt.s32.totalorder %v3248_v27, 0 }
  0x9c   :  { %v126_v29 = vshrl.u32 %v125_v28, 23  ;;  %v129_v35 = vand.u32 8388607, %v122_v32  ;;  %vm123_vm12 = vcmp.le.f32.partialorder %v122_v32, 0.7853982 }
  0x9e   :  { %v2641_v30 = vadd.s32 4294967169, %v126_v29  ;;  %v130_v54 = vor.u32 8388608, %v129_v35 }
  0xa0   :  { %v132_v31 = vadd.s32 1, %v2641_v30  ;;  %v170_v5 = vshll.u32 %v130_v54, 8 }
  0xa2   :  { %vm133_vm4 = vcmp.gt.s32.totalorder %v132_v31, 0 }
  0xa3   :  { %v134_v33 = vsel %vm133_vm4, %v132_v31, 0 }
  0xa4   :  { %v136_v34 = vand.u32 31, %v134_v33  ;;  %v135_v37 = vshrl.u32 %v134_v33, 5 }
  0xa6   :  { %v137_v36 = vsub.s32 32, %v136_v34  ;;  %v139_v39 = vshll.u32 %v3062_v38, %v136_v34  ;;  %v142_v41 = vshll.u32 %v3063_v40, %v136_v34  ;;  %v145_v45 = vshll.u32 %v3064_v43, %v136_v34 }
  0xa7   :  { %v148_v48 = vshll.u32 %v3065_v46, %v136_v34  ;;  %v151_v51 = vshll.u32 %v3066_v49, %v136_v34  ;;  %vm154_vm5 = vcmp.lt.s32.totalorder %v135_v37, 1  ;;  %vm157_vm6 = vcmp.lt.s32.totalorder %v135_v37, 4 }
  0xa8   :  { %v140_v42 = vshrl.u32 %v3063_v40, %v137_v36  ;;  %v143_v44 = vshrl.u32 %v3064_v43, %v137_v36  ;;  %v146_v47 = vshrl.u32 %v3065_v46, %v137_v36  ;;  %v149_v50 = vshrl.u32 %v3066_v49, %v137_v36 }
  0xa9   :  { %v152_v53 = vshrl.u32 %v3067_v52, %v137_v36  ;;  %v138_v63 = vshrl.u32 %v3062_v38, %v137_v36  ;;  %vm156_vm7 = vcmp.lt.s32.totalorder %v135_v37, 3  ;;  %vm155_vm8 = vcmp.lt.s32.totalorder %v135_v37, 2 }
  0xaa   :  { %v141_v55 = vor.u32 %v140_v42, %v139_v39  ;;  %v144_v56 = vor.u32 %v143_v44, %v142_v41  ;;  %v147_v57 = vor.u32 %v146_v47, %v145_v45  ;;  %v150_v58 = vor.u32 %v149_v50, %v148_v48 }
  0xab   :  { %v153_v59 = vor.u32 %v152_v53, %v151_v51 }
  0xac   :  { %v159_v60 = vsel %vm157_vm6, %v147_v57, 2102212464  ;;  %v162_v61 = vsel %vm154_vm5, %v141_v55, %v144_v56  ;;  %v166_v62 = vsel %vm154_vm5, %v144_v56, %v147_v57  ;;  %v163_v1 = vsel %vm157_vm6, %v150_v58, 920167782 }
  0xad   :  { %v167_v2 = vsel %vm157_vm6, %v153_v59, 1326507024  ;;  %v164_v3 = vsel %vm156_vm7, %v147_v57, %v163_v1  ;;  %v158_v6 = vsel %vm154_vm5, %v138_v63, %v141_v55  ;;  %v160_v7 = vsel %vm156_vm7, %v144_v56, %v159_v60 }
  0xae   :  { %v168_v4 = vsel %vm156_vm7, %v150_v58, %v167_v2  ;;  %v165_v8 = vsel %vm155_vm8, %v162_v61, %v164_v3  ;;  %v161_v15 = vsel %vm155_vm8, %v158_v6, %v160_v7  ;;  %vm214_vm5 = vweird.f32 %v3248_v27 }
  0xaf   :  { %v169_v9 = vsel %vm155_vm8, %v166_v62, %v168_v4  ;;  %v3268_v13 = vmul.u32.u64.low %v170_v5, %v165_v8  ;;  %v3269_v14 = vmul.u32.u64.high %v170_v5, %v165_v8, %v3268_v13  ;;  %v177_v17 = vmul.u32 %v170_v5, %v161_v15 }
  0xb0   :  { %v3265_v10 = vmul.u32.u64.low %v170_v5, %v169_v9  ;;  %v3266_v12 = vmul.u32.u64.high %v170_v5, %v169_v9, %v3265_v10  ;;  %vm332_vm6 = vcmask 1041408   ;;  %vm334_vm7 = vcmask 1043456  }
  0xb1   :  { %v180_v16 = vadd.s32 1, %v3269_v14  ;;  %vm478_vm8 = vcmask 261120  }
  0xb2   :  { %vm179_vm9 = vc.u32 %v3266_v12, %v3268_v13  ;;  %v178_v30 = vadd.s32 %v3268_v13, %v3266_v12  ;;  %v2889_v12 = vld [vmem:[%s3734_s10] sm:$0xff]   ;;  %v353_v13 = vpop.permute.xlu1 %352 }
  0xb3   :  { %v181_v18 = vsel %vm179_vm9, %v180_v16, %v3269_v14  ;;  %2775 = vmatprep.mubr.msk.bf16.mxu1 %vm478_vm8, %v2889_v12  ;;  %v348_v16 = vpop.permute.xlu0 %347  ;;  %vm3069_vm9 = vmmov 0  }
  0xb4   :  { %v182_v19 = vadd.s32 %v181_v18, %v177_v17 }
  0xb6   :  { %v183_v20 = vadd.s32 536870912, %v182_v19  ;;  %v358_v14 = vpop.permute.xlu1 %357 }
  0xb8   :  { %v184_v21 = vshrl.u32 %v183_v20, 30 }
  0xba   :  { %v185_v22 = vshll.u32 %v184_v21, 30  ;;  %v208_v47 = vsub.s32 4, %v184_v21 }
  0xbc   :  { %v186_v23 = vsub.s32 %v182_v19, %v185_v22  ;;  %v209_v51 = vsel %vm124_vm11, %v208_v47, %v184_v21  ;;  %v363_v19 = vpop.permute.xlu1 %362 }
  0xbd   :  { %v211_v54 = vsel %vm123_vm12, 0, %v209_v51 }
  0xbe   :  { %v188_v24 = vsub.s32 0, %v186_v23  ;;  %v318_v55 = vadd.s32 3, %v211_v54  ;;  %v215_v56 = vand.u32 3, %v211_v54 }
  0xc0   :  { %v2642_v25 = vmin.u32 %v188_v24, %v186_v23  ;;  %v319_v57 = vand.u32 3, %v318_v55  ;;  %vm220_vm13 = vcmp.eq.s32.totalorder %v215_v56, 2  ;;  %vm217_vm15 = vcmp.eq.s32.totalorder %v215_v56, 0 }
  0xc1   :  { %vm216_vm1 = vcmp.lt.s32.totalorder %v215_v56, 2 }
  0xc2   :  { %v190_v26 = vclz %v2642_v25  ;;  %vm324_vm14 = vcmp.eq.s32.totalorder %v319_v57, 2  ;;  %vm321_vm0 = vcmp.eq.s32.totalorder %v319_v57, 0  ;;  %vm320_vm4 = vcmp.lt.s32.totalorder %v319_v57, 2 }
  0xc4   :  { %v2643_v28 = vadd.s32 4294967294, %v190_v26 }
  0xc6   :  { %vm2644_vm10 = vcmp.lt.s32.totalorder %v2643_v28, 0 }
  0xc7   :  { %v193_v29 = vsel %vm2644_vm10, 0, %v2643_v28 }
  0xc8   :  { %v194_v31 = vsub.s32 32, %v193_v29  ;;  %v198_v33 = vsub.s32 4294967266, %v193_v29  ;;  %v195_v34 = vshll.u32 %v186_v23, %v193_v29 }
  0xca   :  { %v196_v35 = vshrl.u32 %v178_v30, %v194_v31  ;;  %v199_v36 = vadd.s32 127, %v198_v33  ;;  %v2890_v33 = vld [vmem:[%s3734_s10 + $0x8] sm:$0xff]  }
  0xcc   :  { %v197_v37 = vor.u32 %v196_v35, %v195_v34  ;;  %v200_v39 = vshll.u32 %v199_v36, 23  ;;  %v3068_v34 = vmov 0.0   ;;  %v451_v35 = vpop.permute.xlu0 %450  ;;  %v456_v36 = vpop.permute.xlu1 %455 }
  0xce   :  { %v201_v41 = vor.u32 4788187, %v200_v39  ;;  %v204_v44 = vcvt.s32.f32 %v197_v37 }
  0xd0   :  { %v202_v42 = vand.u32 2147483647, %v201_v41  ;;  %v461_v37 = vpop.permute.xlu0 %460 }
  0xd2   :  { %v205_v45 = vmul.f32 %v204_v44, %v202_v42  ;;  %v466_v44 = vpop.permute.xlu1 %465 }
  0xd4   :  { %v206_v48 = vxor.u32 2147483648, %v205_v45 }
  0xd6   :  { %v207_v50 = vsel %vm124_vm11, %v206_v48, %v205_v45 }
  0xd7   :  { %v210_v53 = vsel %vm123_vm12, %v3248_v27, %v207_v50  ;;  %v2888_v27 = vld [vmem:[%s3730_s26 + $0x8] sm:$0xff]   ;;  %vm82_vm12 = vcmp.gt.f32.partialorder %v3205_v0, 0.5 }
  0xd8   :  { %2907 = vcosq.f32 %v210_v53 }
  0xd9   :  { %2909 = vsinq.f32 %v210_v53 }
  0xe2   :  { %v2908_v58 = vpop.eup %2907 }
  0xe3   :  { %v2910_v59 = vpop.eup %2909  ;;  %v221_v60 = vxor.u32 2147483648, %v2908_v58 }
  0xe4   :  { %v218_v61 = vxor.u32 2147483648, %v2910_v59 }
  0xe5   :  { %v222_v62 = vsel %vm220_vm13, %v221_v60, %v2910_v59  ;;  %v326_v32 = vsel %vm324_vm14, %v221_v60, %v2910_v59  ;;  %v2891_v59 = vld [vmem:[%s3735_s3] sm:$0x3f]   ;;  %v84_v60 = vrot.slane %v3205_v0, 2  ;;  %s3737_s3 = sld [smem:[#allocation10_spill]] }
  0xe6   :  { %v219_v63 = vsel %vm217_vm15, %v2908_v58, %v218_v61  ;;  %v323_v1 = vsel %vm321_vm0, %v2908_v58, %v218_v61 }
  0xe7   :  { %v223_v2 = vsel %vm216_vm1, %v219_v63, %v222_v62  ;;  %v327_v3 = vsel %vm320_vm4, %v323_v1, %v326_v32  ;;  %v86_v61 = vsub.f32 %v3205_v0, %v84_v60  ;;  %v547_v32 = vpop.permute.xlu0 %546 }
  0xe8   :  { %v328_v4 = vsel %vm214_vm5, nan, %v327_v3  ;;  %v224_v6 = vsel %vm214_vm5, nan, %v223_v2 }
  0xe9   :  { %v330_v5 = vrot.slane %v328_v4, 6  ;;  %v87_v62 = vadd.f32 3.1415927, %v86_v61  ;;  %v552_v4 = vpop.permute.xlu1 %551 }
  0xeb   :  { %v333_v7 = vsel %vm332_vm6, %v224_v6, %v330_v5  ;;  %v88_v63 = vmul.f32 0.15915494, %v87_v62 }
  0xec   :  { %v335_v8 = vsel %vm334_vm7, %v333_v7, 0.0 }
  0xed   :  { %v336_v9 = vpack.c.bf16 %v335_v8, %v335_v8 }
  0xef   :  { %2853 = vmatprep.subr.msk.bf16.mxu0 %vm334_vm7, %v336_v9  ;;  %v383_v10 = vsel %vm334_vm7, %v336_v9, 0  ;;  %v89_v9 = vfloor.f32 %v88_v63 }
  0xf0   :  { %2766 = vmatpush3.bf16.msra.mxu0 %v383_v10 }
  0xf1   :  { %2779 = vmatprep.subr.bf16.mxu0 %v3068_v34 }
  0xf3   :  { %2768 = vmatmul.mubr.msk.bf16.vlgmr.msra.gmra.mrb[0].mxu0 %vm375_vm2, %v2888_v27 }
  0xf4   :  { %2783 = vmatprep.mubr.msk.bf16.mxu0 %vm3069_vm9, %v3068_v34 }
 0x1c6   :  { %v2769_v15 = vpop.f32.mrb[0].mxu0 }
 0x1c7   :  { %v428_v17 = vadd.f32 %v2769_v15, %v358_v14  ;;  %v419_v18 = vpop.f32.mrb[1].mxu0  ;;  %v90_v15 = vmul.f32 6.2831855, %v89_v9 }
 0x1c8   :  { %v420_v20 = vadd.f32 %v419_v18, %v348_v16  ;;  %v2770_v21 = vpop.f32.mrb[2].mxu0 }
 0x1c9   :  { %2911 = vtanh.f32 %v428_v17  ;;  %v431_v22 = vadd.f32 %v2770_v21, %v363_v19  ;;  %v422_v23 = vpop.f32.mrb[3].mxu0  ;;  %v91_v19 = vsub.f32 %v87_v62, %v90_v15 }
 0x1ca   :  { %2913 = vtanh.f32 %v420_v20  ;;  %v423_v24 = vadd.f32 %v422_v23, %v353_v13 }
 0x1cb   :  { %2915 = vtanh.f32 %v431_v22  ;;  %v93_v22 = vadd.f32 6.2831855, %v91_v19  ;;  %vm92_vm10 = vcmp.lt.f32.partialorder %v91_v19, 0.0 }
 0x1cc   :  { %2917 = vtanh.f32 %v423_v24 }
 0x1d3   :  { %v2912_v25 = vpop.eup %2911 }
 0x1d4   :  { %v2914_v26 = vpop.eup %2913 }
 0x1d5   :  { %v2916_v28 = vpop.eup %2915 }
 0x1d6   :  { %v2918_v29 = vpop.eup %2917  ;;  %v439_v30 = vpack.c.bf16 %v2916_v28, %v2912_v25 }
 0x1d7   :  { %v438_v31 = vpack.c.bf16 %v2918_v29, %v2914_v26  ;;  %v94_v26 = vsel %vm92_vm10, %v93_v22, %v91_v19 }
 0x1d8   :  { %vm95_vm11 = vcmp.ge.f32.partialorder %v94_v26, 6.2831855 }
 0x1d9   :  { %2771 = vmatprep.subr.bf16.mxu1 %v438_v31 }
 0x1da   :  { %2772 = vmatpush3.bf16.msra.mxu1 %v438_v31  ;;  %v2639_v31 = vadd.f32 -6.2831855, %v94_v26 }
 0x1db   :  { %2773 = vmatprep.subr.bf16.mxu1 %v439_v30 }
 0x1de   :  { %2774 = vmatpush3.bf16.msra.mxu1 %v439_v30  ;;  %v628_v30 = vlaneseq }
 0x1e1   :  { %2776 = vmatmul.mubr.msk.bf16.vlgmr.msra.gmra.mrb[0].mxu1 %vm478_vm8, %v2890_v33  ;;  %v3308_v33 = vshrl.u32 %v628_v30, 7 }
 0x2b4   :  { %v2777_v39 = vpop.f32.mrb[0].mxu1 }
 0x2b5   :  { %v528_v41 = vadd.f32 %v2777_v39, %v461_v37  ;;  %v519_v42 = vpop.f32.mrb[1].mxu1  ;;  %v630_v37 = vsub.s32 0, %v3308_v33 }
 0x2b6   :  { %v520_v45 = vadd.f32 %v519_v42, %v451_v35  ;;  %v2778_v47 = vpop.f32.mrb[2].mxu1  ;;  %v3310_v35 = vsel %vm95_vm11, %v2639_v31, %v94_v26 }
 0x2b7   :  { %2919 = vtanh.f32 %v528_v41  ;;  %v531_v48 = vadd.f32 %v2778_v47, %v466_v44  ;;  %v522_v50 = vpop.f32.mrb[3].mxu1 }
 0x2b8   :  { %2921 = vtanh.f32 %v520_v45  ;;  %v523_v51 = vadd.f32 %v522_v50, %v456_v36  ;;  %v603_v36 = vmul.f32 0.15915494, %v3310_v35 }
 0x2b9   :  { %2923 = vtanh.f32 %v531_v48 }
 0x2ba   :  { %2925 = vtanh.f32 %v523_v51  ;;  %v631_v47 = vrot.slane %v603_v36, %v630_v37 }
 0x2c1   :  { %v2920_v53 = vpop.eup %2919 }
 0x2c2   :  { %v2922_v54 = vpop.eup %2921 }
 0x2c3   :  { %v2924_v55 = vpop.eup %2923 }
 0x2c4   :  { %v2926_v56 = vpop.eup %2925  ;;  %v539_v57 = vpack.c.bf16 %v2924_v55, %v2920_v53 }
 0x2c5   :  { %v538_v58 = vpack.c.bf16 %v2926_v56, %v2922_v54 }
 0x2c7   :  { %2780 = vmatpush3.bf16.msra.mxu0 %v538_v58 }
 0x2c8   :  { %2781 = vmatprep.subr.bf16.mxu0 %v3068_v34 }
 0x2cb   :  { %2782 = vmatpush3.bf16.msra.mxu0 %v539_v57 }
 0x2ce   :  { %2784 = vmatmul.mubr.msk.bf16.vlgmr.msra.gmra.mrb[4].mxu0 %vm478_vm8, %v2891_v59 }
 0x3a1   :  { %v596_v1 = vpop.f32.mrb[4].mxu0 }
 0x3a2   :  { %v597_v2 = vadd.f32 %v596_v1, %v547_v32  ;;  %v2785_v3 = vpop.f32.mrb[5].mxu0 }
 0x3a3   :  { %v599_v5 = vpop.f32.mrb[6].mxu0 }
 0x3a4   :  { %v611_v6 = vand.u32 2147483647, %v597_v2  ;;  %v600_v7 = vadd.f32 %v599_v5, %v552_v4  ;;  %v2786_v8 = vpop.f32.mrb[7].mxu0  ;;  %v613_v27 = vsub.f32 0.0, %v597_v2  ;;  %v620_v44 = vmax.f32 %v597_v2, 0.0 }
 0x3a6   :  { %v612_v10 = vsub.f32 0.0, %v611_v6  ;;  %v604_v12 = vsel %vm334_vm7, %v600_v7, -inf }
 0x3a7   :  { %v605_v13 = vrot.slane %v604_v12, 4 }
 0x3a8   :  { %v615_v14 = vsel %vm334_vm7, %v612_v10, %v613_v27 }
 0x3a9   :  { %v616_v16 = vmul.f32 1.442695, %v615_v14  ;;  %v606_v17 = vmax.f32 %v604_v12, %v605_v13 }
 0x3ab   :  { %2927 = vpow2.f32 %v616_v16  ;;  %v607_v18 = vrot.slane %v606_v17, 2 }
 0x3ad   :  { %v608_v20 = vmax.f32 %v606_v17, %v607_v18 }
 0x3af   :  { %v609_v21 = vrot.slane %v608_v20, 1 }
 0x3b1   :  { %v610_v23 = vmax.f32 %v608_v20, %v609_v21 }
 0x3b3   :  { %v614_v24 = vsub.f32 %v600_v7, %v610_v23 }
 0x3b5   :  { %v2928_v25 = vpop.eup %2927  ;;  %v618_v28 = vmul.f32 1.442695, %v614_v24 }
 0x3b6   :  { %v621_v29 = vadd.f32 1.0, %v2928_v25 }
 0x3b7   :  { %2929 = vpow2.f32 %v618_v28 }
 0x3b8   :  { %2931 = vlog2.f32 %v621_v29 }
 0x3b9   :  { %2933 = vrcp.f32 %v621_v29 }
 0x3c1   :  { %v2930_v39 = vpop.eup %2929 }
 0x3c2   :  { %v2932_v41 = vpop.eup %2931  ;;  %v672_v51 = vsel %vm334_vm7, %v2930_v39, 0.0  ;;  %v679_v18 = vmul.f32 0.96, %v2930_v39 }
 0x3c3   :  { %v2934_v42 = vpop.eup %2933  ;;  %v623_v45 = vmul.f32 0.6931472, %v2932_v41  ;;  %v673_v59 = vrot.slane %v672_v51, 4 }
 0x3c4   :  { %v642_v48 = vsub.f32 1.0, %v2934_v42  ;;  %v632_v54 = vsub.f32 %v631_v47, %v2934_v42  ;;  %v639_v57 = vrot.slane %v2934_v42, 4 }
 0x3c5   :  { %v624_v50 = vadd.f32 %v623_v45, %v620_v44  ;;  %v674_v1 = vadd.f32 %v673_v59, %v672_v51  ;;  %v704_v45 = vrot.slane %v3310_v35, 5 }
 0x3c6   :  { %v644_v55 = vrot.slane %v642_v48, 4  ;;  %v634_v60 = vrot.slane %v632_v54, 4 }
 0x3c7   :  { %v625_v53 = vadd.f32 0.01, %v624_v50  ;;  %v675_v4 = vrot.slane %v674_v1, 2 }
 0x3c9   :  { %v637_v56 = vsub.f32 0.0, %v625_v53  ;;  %v646_v58 = vmul.f32 %v644_v55, %v625_v53  ;;  %v636_v32 = vmul.f32 %v634_v60, %v625_v53  ;;  %v676_v5 = vadd.f32 %v675_v4, %v674_v1  ;;  %v969_v60 = vld [vmem:[%s3736_s30 + $0x8] sm:$0xff]  ;;  %v1070_v1 = vld [vmem:[%s3737_s3] sm:$0xff] }
 0x3ca   :  { %v1168_v4 = vld [vmem:[%s3738_s6 + $0x8] sm:$0xf] }
 0x3cb   :  { %v641_v61 = vmul.f32 %v639_v57, %v637_v56  ;;  %v652_v62 = vmul.f32 0.5, %v646_v58  ;;  %v677_v6 = vrot.slane %v676_v5, 1 }
 0x3cd   :  { %v648_v63 = vrot.slane %v641_v61, 4  ;;  %2935 = vtanh.f32 %v652_v62  ;;  %v678_v27 = vadd.f32 %v677_v6, %v676_v5  ;;  %v968_v61 = vld [vmem:[%s3736_s30] sm:$0xff]  ;;  %v971_v62 = vld [vmem:[%s3736_s30 + $0x18] sm:$0xff] }
 0x3ce   :  { %v1167_v5 = vld [vmem:[%s3738_s6] sm:$0xff] }
 0x3cf   :  { %v650_v2 = vsel %vm334_vm7, %v636_v32, %v648_v63  ;;  %v970_v32 = vld [vmem:[%s3736_s30 + $0x10] sm:$0xff]  ;;  %v1071_v63 = vld [vmem:[%s3737_s3 + $0x8] sm:$0xff]  ;;  %v1585_v6 = vld [vmem:[%s3693_s14] sm:$0xff] }
 0x3d0   :  { %v651_v3 = vmul.f32 0.5, %v650_v2  ;;  %v1073_v2 = vld [vmem:[%s3737_s3 + $0x18] sm:$0xff] }
 0x3d2   :  { %2937 = vtanh.f32 %v651_v3  ;;  %v1072_v3 = vld [vmem:[%s3737_s3 + $0x10] sm:$0xff] }
 0x3d3   :  { %2939 = vrcp.f32 %v678_v27  ;;  %v2892_v27 = vld [vmem:[%s3696_s7] sm:$0xff]  }
 0x3d4   :  { %2789 = vmatprep.mubr.msk.bf16.mxu1 %vm375_vm2, %v2892_v27 }
 0x3d7   :  { %v2936_v7 = vpop.eup %2935 }
 0x3d8   :  { %v656_v10 = vadd.f32 1.0, %v2936_v7  ;;  %v1587_v7 = vld [vmem:[%s3693_s14 + $0x10] sm:$0xff] }
 0x3da   :  { %v658_v13 = vmul.f32 0.5, %v656_v10  ;;  %v1784_v10 = vld [vmem:[%s3695_s18] sm:$0xff] }
 0x3dc   :  { %v2938_v8 = vpop.eup %2937 }
 0x3dd   :  { %v655_v9 = vadd.f32 1.0, %v2938_v8  ;;  %v2940_v17 = vpop.eup %2939  ;;  %v1687_v8 = vld [vmem:[%s3694_s16] sm:$0xff] }
 0x3de   :  { %v681_v20 = vmul.f32 %v2940_v17, %v679_v18 }
 0x3df   :  { %v657_v12 = vmul.f32 0.5, %v655_v9  ;;  %v1689_v9 = vld [vmem:[%s3694_s16 + $0x10] sm:$0xff] }
 0x3e0   :  { %v682_v26 = vadd.f32 0.01, %v681_v20 }
 0x3e1   :  { %v660_v14 = vrot.slane %v657_v12, 4  ;;  %v669_v19 = vsub.f32 1.0, %v657_v12 }
 0x3e3   :  { %v662_v15 = vsub.f32 %v658_v13, %v660_v14  ;;  %v666_v21 = vsub.f32 %v657_v12, %v660_v14  ;;  %v670_v24 = vmul.f32 %v669_v19, %v657_v12 }
 0x3e5   :  { %v663_v16 = vmax.f32 %v662_v15, 1e-06 }
 0x3e7   :  { %2941 = vrcp.f32 %v663_v16 }
 0x3f1   :  { %v2942_v22 = vpop.eup %2941 }
 0x3f2   :  { %v668_v23 = vmul.f32 %v2942_v22, %v625_v53  ;;  %v667_v25 = vmul.f32 %v2942_v22, %v666_v21 }
 0x3f4   :  { %v671_v28 = vmul.f32 %v670_v24, %v668_v23  ;;  %v683_v29 = vmul.f32 %v682_v26, %v667_v25 }
 0x3f6   :  { %v684_v30 = vsel %vm334_vm7, %v683_v29, 0.0  ;;  %v3317_v31 = vmul.f32 %v682_v26, %v671_v28 }
 0x3f7   :  { %v685_v36 = vrot.slane %v684_v30, 4 }
 0x3f9   :  { %v686_v37 = vadd.f32 %v685_v36, %v684_v30 }
 0x3fb   :  { %v687_v41 = vrot.slane %v686_v37, 2 }
 0x3fd   :  { %v688_v42 = vadd.f32 %v687_v41, %v686_v37 }
 0x3ff   :  { %v689_v44 = vrot.slane %v688_v42, 1 }
 0x401   :  { %v690_v39 = vadd.f32 %v689_v44, %v688_v42 }
 0x403   :  { %v699_v47 = vmul.f32 6.2831855, %v690_v39 }
 0x405   :  { %v706_v48 = vsel %vm82_vm12, %v699_v47, %v704_v45 }
 0x406   :  { %v709_v50 = vadd.f32 1.5707964, %v706_v48 }
 0x408   :  { %v710_v51 = vmul.f32 0.15915494, %v709_v50 }
 0x40a   :  { %v711_v53 = vfloor.f32 %v710_v51 }
 0x40c   :  { %v712_v54 = vmul.f32 6.2831855, %v711_v53 }
 0x40e   :  { %v713_v55 = vsub.f32 %v709_v50, %v712_v54 }
 0x410   :  { %vm714_vm13 = vcmp.lt.f32.partialorder %v713_v55, 0.0  ;;  %v715_v56 = vadd.f32 6.2831855, %v713_v55 }
 0x412   :  { %v716_v57 = vsel %vm714_vm13, %v715_v56, %v713_v55 }
 0x413   :  { %vm717_vm14 = vcmp.ge.f32.partialorder %v716_v57, 6.2831855  ;;  %v2659_v58 = vadd.f32 -6.2831855, %v716_v57 }
 0x415   :  { %v3323_v59 = vsel %vm717_vm14, %v2659_v58, %v716_v57 }
 0x416   :  { %v732_v35 = vrot.slane %v3323_v59, 3  ;;  %v748_v17 = vrot.slane %v3323_v59, 2 }
 0x418   :  { %736 = vrot.lane.b32.xlu1 %v732_v35, %s3070_s0  ;;  %734 = vrot.lane.b32.xlu0 %v732_v35, %s3071_s29 }
 0x41c   :  { %979 = vperm.xlu1 %2886, %v969_v60   ;;  %974 = vperm.xlu0 %2885, %v968_v61  }
 0x420   :  { %989 = vperm.xlu1 %2886, %v971_v62   ;;  %984 = vperm.xlu0 %2885, %v970_v32  }
 0x424   :  { %1081 = vperm.xlu1 %2886, %v1071_v63   ;;  %1076 = vperm.xlu0 %2885, %v1070_v1  }
 0x428   :  { %1091 = vperm.xlu1 %2886, %v1073_v2   ;;  %1086 = vperm.xlu0 %2885, %v1072_v3  }
 0x42c   :  { %1176 = vperm.xlu1 %2886, %v1168_v4   ;;  %1171 = vperm.xlu0 %2885, %v1167_v5  }
 0x430   :  { %1591 = vperm.xlu1 %2886, %v1585_v6  }
 0x434   :  { %1601 = vperm.xlu1 %2886, %v1587_v7  }
 0x438   :  { %1693 = vperm.xlu1 %2886, %v1687_v8  }
 0x43c   :  { %1703 = vperm.xlu1 %2886, %v1689_v9  }
 0x440   :  { %1788 = vperm.xlu1 %2886, %v1784_v10  }
 0x48a   :  { %v737_v12 = vpop.permute.xlu1 %736  ;;  %v735_v13 = vpop.permute.xlu0 %734 }
 0x48b   :  { %v739_v14 = vrot.slane %v737_v12, 3  ;;  %v742_v15 = vrot.slane %v735_v13, 3 }
 0x48d   :  { %v744_v16 = vsel %vm82_vm12, %v739_v14, %v742_v15 }
 0x48e   :  { %v746_v18 = vrot.slane %v744_v16, 5 }
 0x490   :  { %v3381_v19 = vsel %vm120_vm3, %v746_v18, %v748_v17 }
 0x491   :  { %v754_v20 = vand.u32 2139095040, %v3381_v19  ;;  %v751_v24 = vand.u32 2147483647, %v3381_v19  ;;  %vm753_vm13 = vcmp.lt.s32.totalorder %v3381_v19, 0 }
 0x493   :  { %v755_v21 = vshrl.u32 %v754_v20, 23  ;;  %v758_v28 = vand.u32 8388607, %v751_v24  ;;  %vm752_vm14 = vcmp.le.f32.partialorder %v751_v24, 0.7853982 }
 0x495   :  { %v2661_v22 = vadd.s32 4294967169, %v755_v21  ;;  %v759_v51 = vor.u32 8388608, %v758_v28 }
 0x497   :  { %v761_v23 = vadd.s32 1, %v2661_v22  ;;  %v799_v2 = vshll.u32 %v759_v51, 8 }
 0x499   :  { %vm762_vm15 = vcmp.gt.s32.totalorder %v761_v23, 0 }
 0x49a   :  { %v763_v25 = vsel %vm762_vm15, %v761_v23, 0 }
 0x49b   :  { %v765_v26 = vand.u32 31, %v763_v25  ;;  %v764_v30 = vshrl.u32 %v763_v25, 5 }
 0x49d   :  { %v766_v29 = vsub.s32 32, %v765_v26  ;;  %v768_v36 = vshll.u32 %v3062_v38, %v765_v26  ;;  %v771_v37 = vshll.u32 %v3063_v40, %v765_v26  ;;  %v774_v44 = vshll.u32 %v3064_v43, %v765_v26 }
 0x49e   :  { %v777_v45 = vshll.u32 %v3065_v46, %v765_v26  ;;  %v780_v48 = vshll.u32 %v3066_v49, %v765_v26  ;;  %vm783_vm0 = vcmp.lt.s32.totalorder %v764_v30, 1  ;;  %vm786_vm1 = vcmp.lt.s32.totalorder %v764_v30, 4 }
 0x49f   :  { %v769_v41 = vshrl.u32 %v3063_v40, %v766_v29  ;;  %v772_v42 = vshrl.u32 %v3064_v43, %v766_v29  ;;  %v775_v39 = vshrl.u32 %v3065_v46, %v766_v29  ;;  %v778_v47 = vshrl.u32 %v3066_v49, %v766_v29 }
 0x4a0   :  { %v781_v50 = vshrl.u32 %v3067_v52, %v766_v29  ;;  %v767_v61 = vshrl.u32 %v3062_v38, %v766_v29  ;;  %vm785_vm4 = vcmp.lt.s32.totalorder %v764_v30, 3  ;;  %vm784_vm5 = vcmp.lt.s32.totalorder %v764_v30, 2 }
 0x4a1   :  { %v770_v53 = vor.u32 %v769_v41, %v768_v36  ;;  %v773_v54 = vor.u32 %v772_v42, %v771_v37  ;;  %v776_v55 = vor.u32 %v775_v39, %v774_v44  ;;  %v779_v56 = vor.u32 %v778_v47, %v777_v45 }
 0x4a2   :  { %v782_v57 = vor.u32 %v781_v50, %v780_v48 }
 0x4a3   :  { %v788_v58 = vsel %vm786_vm1, %v776_v55, 2102212464  ;;  %v791_v35 = vsel %vm783_vm0, %v770_v53, %v773_v54  ;;  %v795_v60 = vsel %vm783_vm0, %v773_v54, %v776_v55  ;;  %v792_v62 = vsel %vm786_vm1, %v779_v56, 920167782 }
 0x4a4   :  { %v796_v32 = vsel %vm786_vm1, %v782_v57, 1326507024  ;;  %v793_v63 = vsel %vm785_vm4, %v776_v55, %v792_v62  ;;  %v787_v3 = vsel %vm783_vm0, %v767_v61, %v770_v53  ;;  %v789_v4 = vsel %vm785_vm4, %v773_v54, %v788_v58 }
 0x4a5   :  { %v797_v1 = vsel %vm785_vm4, %v779_v56, %v796_v32  ;;  %v794_v5 = vsel %vm784_vm5, %v791_v35, %v793_v63  ;;  %v790_v27 = vsel %vm784_vm5, %v787_v3, %v789_v4 }
 0x4a6   :  { %v798_v6 = vsel %vm784_vm5, %v795_v60, %v797_v1  ;;  %v3401_v9 = vmul.u32.u64.low %v799_v2, %v794_v5  ;;  %v3402_v10 = vmul.u32.u64.high %v799_v2, %v794_v5, %v3401_v9  ;;  %v806_v13 = vmul.u32 %v799_v2, %v790_v27 }
 0x4a7   :  { %v3398_v7 = vmul.u32.u64.low %v799_v2, %v798_v6  ;;  %v3399_v8 = vmul.u32.u64.high %v799_v2, %v798_v6, %v3398_v7 }
 0x4a8   :  { %v809_v12 = vadd.s32 1, %v3402_v10 }
 0x4a9   :  { %vm808_vm10 = vc.u32 %v3399_v8, %v3401_v9  ;;  %v807_v28 = vadd.s32 %v3401_v9, %v3399_v8 }
 0x4aa   :  { %v810_v14 = vsel %vm808_vm10, %v809_v12, %v3402_v10  ;;  %v2893_v12 = vld [vmem:[%s3696_s7 + $0x8] sm:$0xff]  }
 0x4ab   :  { %v811_v15 = vadd.s32 %v810_v14, %v806_v13  ;;  %v975_v13 = vpop.permute.xlu0 %974  ;;  %v980_v14 = vpop.permute.xlu1 %979 }
 0x4ad   :  { %v812_v16 = vadd.s32 536870912, %v811_v15 }
 0x4af   :  { %v813_v17 = vshrl.u32 %v812_v16, 30 }
 0x4b1   :  { %v814_v18 = vshll.u32 %v813_v17, 30  ;;  %v837_v50 = vsub.s32 4, %v813_v17 }
 0x4b3   :  { %v815_v20 = vsub.s32 %v811_v15, %v814_v18  ;;  %v838_v54 = vsel %vm753_vm13, %v837_v50, %v813_v17  ;;  %v985_v15 = vpop.permute.xlu0 %984 }
 0x4b4   :  { %v840_v56 = vsel %vm752_vm14, 0, %v838_v54 }
 0x4b5   :  { %v817_v21 = vsub.s32 0, %v815_v20  ;;  %v947_v57 = vadd.s32 3, %v840_v56  ;;  %v844_v35 = vand.u32 3, %v840_v56 }
 0x4b7   :  { %v2662_v22 = vmin.u32 %v817_v21, %v815_v20  ;;  %v948_v58 = vand.u32 3, %v947_v57  ;;  %vm849_vm15 = vcmp.eq.s32.totalorder %v844_v35, 2  ;;  %vm846_vm1 = vcmp.eq.s32.totalorder %v844_v35, 0 }
 0x4b8   :  { %vm845_vm5 = vcmp.lt.s32.totalorder %v844_v35, 2 }
 0x4b9   :  { %v819_v23 = vclz %v2662_v22  ;;  %vm953_vm0 = vcmp.eq.s32.totalorder %v948_v58, 2  ;;  %vm950_vm4 = vcmp.eq.s32.totalorder %v948_v58, 0  ;;  %vm949_vm10 = vcmp.lt.s32.totalorder %v948_v58, 2 }
 0x4bb   :  { %v2663_v25 = vadd.s32 4294967294, %v819_v23 }
 0x4bd   :  { %vm2664_vm11 = vcmp.lt.s32.totalorder %v2663_v25, 0 }
 0x4be   :  { %v822_v26 = vsel %vm2664_vm11, 0, %v2663_v25  ;;  %vm843_vm11 = vweird.f32 %v3381_v19 }
 0x4bf   :  { %v823_v29 = vsub.s32 32, %v822_v26  ;;  %v827_v30 = vsub.s32 4294967266, %v822_v26  ;;  %v824_v36 = vshll.u32 %v815_v20, %v822_v26  ;;  %v990_v20 = vpop.permute.xlu1 %989 }
 0x4c1   :  { %v825_v37 = vshrl.u32 %v807_v28, %v823_v29  ;;  %v828_v41 = vadd.s32 127, %v827_v30 }
 0x4c3   :  { %v826_v42 = vor.u32 %v825_v37, %v824_v36  ;;  %v829_v44 = vshll.u32 %v828_v41, 23 }
 0x4c5   :  { %v830_v39 = vor.u32 4788187, %v829_v44  ;;  %v833_v47 = vcvt.s32.f32 %v826_v42  ;;  %v2895_v42 = vld [vmem:[%s3697_s9 + $0x8] sm:$0xff]   ;;  %v1077_v44 = vpop.permute.xlu0 %1076 }
 0x4c7   :  { %v831_v45 = vand.u32 2147483647, %v830_v39  ;;  %v1082_v39 = vpop.permute.xlu1 %1081 }
 0x4c9   :  { %v834_v48 = vmul.f32 %v833_v47, %v831_v45  ;;  %v1087_v45 = vpop.permute.xlu0 %1086 }
 0x4cb   :  { %v835_v51 = vxor.u32 2147483648, %v834_v48 }
 0x4cd   :  { %v836_v53 = vsel %vm753_vm13, %v835_v51, %v834_v48  ;;  %v1092_v51 = vpop.permute.xlu1 %1091 }
 0x4ce   :  { %v839_v55 = vsel %vm752_vm14, %v3381_v19, %v836_v53  ;;  %v2894_v19 = vld [vmem:[%s3697_s9] sm:$0xff]  }
 0x4cf   :  { %2943 = vcosq.f32 %v839_v55  ;;  %2797 = vmatprep.mubr.msk.bf16.mxu0 %vm478_vm8, %v2894_v19 }
 0x4d0   :  { %2945 = vsinq.f32 %v839_v55 }
 0x4d9   :  { %v2944_v60 = vpop.eup %2943 }
 0x4da   :  { %v2946_v61 = vpop.eup %2945  ;;  %v850_v62 = vxor.u32 2147483648, %v2944_v60 }
 0x4db   :  { %v847_v32 = vxor.u32 2147483648, %v2946_v61 }
 0x4dc   :  { %v851_v63 = vsel %vm849_vm15, %v850_v62, %v2946_v61  ;;  %v955_v24 = vsel %vm953_vm0, %v850_v62, %v2946_v61 }
 0x4dd   :  { %v848_v1 = vsel %vm846_vm1, %v2944_v60, %v847_v32  ;;  %v952_v2 = vsel %vm950_vm4, %v2944_v60, %v847_v32 }
 0x4de   :  { %v852_v3 = vsel %vm845_vm5, %v848_v1, %v851_v63  ;;  %v956_v4 = vsel %vm949_vm10, %v952_v2, %v955_v24  ;;  %v2896_v63 = vld [vmem:[%s3698_s11] sm:$0x3f]   ;;  %v720_v24 = vadd.f32 1.5707964, %v3209_v11  ;;  %v1172_v2 = vpop.permute.xlu0 %1171  ;;  %s3739_s11 = smov 1  }
 0x4df   :  { %v853_v5 = vsel %vm843_vm11, nan, %v852_v3  ;;  %v957_v6 = vsel %vm843_vm11, nan, %v956_v4 }
 0x4e0   :  { %v959_v7 = vrot.slane %v957_v6, 6  ;;  %v721_v1 = vmul.f32 0.15915494, %v720_v24 }
 0x4e2   :  { %v961_v8 = vsel %vm332_vm6, %v853_v5, %v959_v7  ;;  %v722_v4 = vfloor.f32 %v721_v1  ;;  %v1177_v7 = vpop.permute.xlu1 %1176 }
 0x4e3   :  { %v962_v9 = vsel %vm334_vm7, %v961_v8, 0.0 }
 0x4e4   :  { %v963_v10 = vpack.c.bf16 %v962_v9, %v962_v9 }
 0x4e6   :  { %2854 = vmatprep.subr.msk.bf16.mxu1 %vm334_vm7, %v963_v10  ;;  %v1009_v27 = vsel %vm334_vm7, %v963_v10, 0 }
 0x4e7   :  { %2788 = vmatpush3.bf16.msra.mxu1 %v1009_v27 }
 0x4e8   :  { %2801 = vmatprep.subr.bf16.mxu1 %v3068_v34 }
 0x4ea   :  { %2790 = vmatmul.mubr.msk.bf16.vlgmr.msra.gmra.mrb[4].mxu1 %vm375_vm2, %v2893_v12  ;;  %v723_v12 = vmul.f32 6.2831855, %v722_v4 }
 0x4eb   :  { %2805 = vmatprep.mubr.msk.bf16.mxu1 %vm3069_vm9, %v3068_v34 }
 0x5bd   :  { %v2791_v16 = vpop.f32.mrb[4].mxu1 }
 0x5be   :  { %v1054_v17 = vadd.f32 %v2791_v16, %v985_v15  ;;  %v1045_v18 = vpop.f32.mrb[5].mxu1 }
 0x5bf   :  { %v1046_v21 = vadd.f32 %v1045_v18, %v975_v13  ;;  %v2792_v22 = vpop.f32.mrb[6].mxu1  ;;  %v724_v18 = vsub.f32 %v720_v24, %v723_v12 }
 0x5c0   :  { %2947 = vtanh.f32 %v1054_v17  ;;  %v1057_v23 = vadd.f32 %v2792_v22, %v990_v20  ;;  %v1048_v25 = vpop.f32.mrb[7].mxu1 }
 0x5c1   :  { %2949 = vtanh.f32 %v1046_v21  ;;  %v1049_v26 = vadd.f32 %v1048_v25, %v980_v14  ;;  %v726_v22 = vadd.f32 6.2831855, %v724_v18  ;;  %vm725_vm13 = vcmp.lt.f32.partialorder %v724_v18, 0.0 }
 0x5c2   :  { %2951 = vtanh.f32 %v1057_v23 }
 0x5c3   :  { %2953 = vtanh.f32 %v1049_v26  ;;  %v727_v26 = vsel %vm725_vm13, %v726_v22, %v724_v18 }
 0x5c4   :  { %vm728_vm14 = vcmp.ge.f32.partialorder %v727_v26, 6.2831855 }
 0x5ca   :  { %v2948_v28 = vpop.eup %2947 }
 0x5cb   :  { %v2950_v29 = vpop.eup %2949 }
 0x5cc   :  { %v2952_v30 = vpop.eup %2951 }
 0x5cd   :  { %v2954_v36 = vpop.eup %2953  ;;  %v1065_v37 = vpack.c.bf16 %v2952_v30, %v2948_v28  ;;  %v2660_v30 = vadd.f32 -6.2831855, %v727_v26 }
 0x5ce   :  { %v1064_v41 = vpack.c.bf16 %v2954_v36, %v2950_v29 }
 0x5d0   :  { %2793 = vmatprep.subr.bf16.mxu0 %v1064_v41 }
 0x5d1   :  { %2794 = vmatpush3.bf16.msra.mxu0 %v1064_v41  ;;  %v3440_v41 = vsel %vm728_vm14, %v2660_v30, %v727_v26 }
 0x5d2   :  { %2795 = vmatprep.subr.bf16.mxu0 %v1065_v37 }
 0x5d5   :  { %2796 = vmatpush3.bf16.msra.mxu0 %v1065_v37 }
 0x5d8   :  { %2798 = vmatmul.mubr.msk.bf16.vlgmr.msra.gmra.mrb[8].mxu0 %vm478_vm8, %v2895_v42  ;;  %v1228_v42 = vmul.f32 0.15915494, %v3440_v41 }
 0x6ab   :  { %v2799_v47 = vpop.f32.mrb[8].mxu0 }
 0x6ac   :  { %v1153_v48 = vadd.f32 %v2799_v47, %v1087_v45  ;;  %v1144_v50 = vpop.f32.mrb[9].mxu0 }
 0x6ad   :  { %v1145_v53 = vadd.f32 %v1144_v50, %v1077_v44  ;;  %v2800_v54 = vpop.f32.mrb[10].mxu0  ;;  %v1255_v44 = vsub.s32 1, %v3308_v33 }
 0x6ae   :  { %2955 = vtanh.f32 %v1153_v48  ;;  %v1156_v55 = vadd.f32 %v2800_v54, %v1092_v51  ;;  %v1147_v56 = vpop.f32.mrb[11].mxu0 }
 0x6af   :  { %2957 = vtanh.f32 %v1145_v53  ;;  %v1148_v57 = vadd.f32 %v1147_v56, %v1082_v39  ;;  %v1256_v39 = vrot.slane %v1228_v42, %v1255_v44 }
 0x6b0   :  { %2959 = vtanh.f32 %v1156_v55 }
 0x6b1   :  { %2961 = vtanh.f32 %v1148_v57 }
 0x6b8   :  { %v2956_v58 = vpop.eup %2955 }
 0x6b9   :  { %v2958_v35 = vpop.eup %2957 }
 0x6ba   :  { %v2960_v60 = vpop.eup %2959 }
 0x6bb   :  { %v2962_v61 = vpop.eup %2961  ;;  %v1164_v62 = vpack.c.bf16 %v2960_v60, %v2956_v58 }
 0x6bc   :  { %v1163_v32 = vpack.c.bf16 %v2962_v61, %v2958_v35 }
 0x6be   :  { %2802 = vmatpush3.bf16.msra.mxu1 %v1163_v32 }
 0x6bf   :  { %2803 = vmatprep.subr.bf16.mxu1 %v3068_v34 }
 0x6c2   :  { %2804 = vmatpush3.bf16.msra.mxu1 %v1164_v62 }
 0x6c5   :  { %2806 = vmatmul.mubr.msk.bf16.vlgmr.msra.gmra.mrb[8].mxu1 %vm478_vm8, %v2896_v63 }
 0x798   :  { %v1221_v3 = vpop.f32.mrb[8].mxu1 }
 0x799   :  { %v1222_v5 = vadd.f32 %v1221_v3, %v1172_v2  ;;  %v2807_v6 = vpop.f32.mrb[9].mxu1 }
 0x79a   :  { %v1224_v8 = vpop.f32.mrb[10].mxu1 }
 0x79b   :  { %v1236_v9 = vand.u32 2147483647, %v1222_v5  ;;  %v1225_v10 = vadd.f32 %v1224_v8, %v1177_v7  ;;  %v2808_v27 = vpop.f32.mrb[11].mxu1  ;;  %v1238_v13 = vsub.f32 0.0, %v1222_v5  ;;  %v1245_v50 = vmax.f32 %v1222_v5, 0.0 }
 0x79d   :  { %v1237_v19 = vsub.f32 0.0, %v1236_v9  ;;  %v1229_v14 = vsel %vm334_vm7, %v1225_v10, -inf }
 0x79e   :  { %v1230_v15 = vrot.slane %v1229_v14, 4 }
 0x79f   :  { %v1240_v16 = vsel %vm334_vm7, %v1237_v19, %v1238_v13 }
 0x7a0   :  { %v1241_v11 = vmul.f32 1.442695, %v1240_v16  ;;  %v1231_v17 = vmax.f32 %v1229_v14, %v1230_v15 }
 0x7a2   :  { %2963 = vpow2.f32 %v1241_v11  ;;  %v1232_v20 = vrot.slane %v1231_v17, 2 }
 0x7a4   :  { %v1233_v21 = vmax.f32 %v1231_v17, %v1232_v20  ;;  %v692_v17 = vsel %vm334_vm7, %v3317_v31, 0.0 }
 0x7a5   :  { %v693_v18 = vrot.slane %v692_v17, 4 }
 0x7a6   :  { %v1234_v23 = vrot.slane %v1233_v21, 1 }
 0x7a7   :  { %v694_v22 = vadd.f32 %v693_v18, %v692_v17 }
 0x7a8   :  { %v1235_v25 = vmax.f32 %v1233_v21, %v1234_v23 }
 0x7aa   :  { %v1239_v28 = vsub.f32 %v1225_v10, %v1235_v25 }
 0x7ac   :  { %v2964_v29 = vpop.eup %2963  ;;  %v1243_v36 = vmul.f32 1.442695, %v1239_v28 }
 0x7ad   :  { %v1246_v37 = vadd.f32 1.0, %v2964_v29  ;;  %v695_v29 = vrot.slane %v694_v22, 2 }
 0x7ae   :  { %2965 = vpow2.f32 %v1243_v36 }
 0x7af   :  { %2967 = vlog2.f32 %v1246_v37 }
 0x7b0   :  { %2969 = vrcp.f32 %v1246_v37 }
 0x7b8   :  { %v2966_v45 = vpop.eup %2965 }
 0x7b9   :  { %v2968_v47 = vpop.eup %2967  ;;  %v1297_v56 = vsel %vm334_vm7, %v2966_v45, 0.0  ;;  %v1304_v21 = vmul.f32 0.96, %v2966_v45 }
 0x7ba   :  { %v2970_v48 = vpop.eup %2969  ;;  %v1248_v51 = vmul.f32 0.6931472, %v2968_v47  ;;  %v1298_v60 = vrot.slane %v1297_v56, 4  ;;  %v696_v47 = vadd.f32 %v695_v29, %v694_v22  ;;  %v1588_v22 = vld [vmem:[%s3693_s14 + $0x18] sm:$0xff] }
 0x7bb   :  { %v1257_v53 = vsub.f32 %v1256_v39, %v2970_v48  ;;  %v1267_v54 = vsub.f32 1.0, %v2970_v48  ;;  %v1264_v32 = vrot.slane %v2970_v48, 4 }
 0x7bc   :  { %v1249_v55 = vadd.f32 %v1248_v51, %v1245_v50  ;;  %v1299_v3 = vadd.f32 %v1298_v60, %v1297_v56  ;;  %v697_v45 = vrot.slane %v696_v47, 1 }
 0x7bd   :  { %v1259_v58 = vrot.slane %v1257_v53, 4  ;;  %v1269_v35 = vrot.slane %v1267_v54, 4 }
 0x7be   :  { %v1250_v57 = vadd.f32 0.01, %v1249_v55  ;;  %v1300_v6 = vrot.slane %v1299_v3, 2 }
 0x7c0   :  { %v1261_v61 = vmul.f32 %v1259_v58, %v1250_v57  ;;  %v1262_v62 = vsub.f32 0.0, %v1250_v57  ;;  %v1271_v63 = vmul.f32 %v1269_v35, %v1250_v57  ;;  %v1301_v7 = vadd.f32 %v1300_v6, %v1299_v3 }
 0x7c1   :  { %v698_v58 = vadd.f32 %v697_v45, %v696_v47 }
 0x7c2   :  { %v1266_v24 = vmul.f32 %v1264_v32, %v1262_v62  ;;  %v1277_v1 = vmul.f32 0.5, %v1271_v63  ;;  %v1302_v8 = vrot.slane %v1301_v7, 1  ;;  %v1329_v62 = vrot.slane %v3440_v41, 5 }
 0x7c3   :  { %v700_v32 = vmax.f32 %v698_v58, 1e-30 }
 0x7c4   :  { %v1273_v2 = vrot.slane %v1266_v24, 4  ;;  %2971 = vtanh.f32 %v1277_v1  ;;  %v1303_v19 = vadd.f32 %v1302_v8, %v1301_v7 }
 0x7c6   :  { %v1275_v4 = vsel %vm334_vm7, %v1261_v61, %v1273_v2 }
 0x7c7   :  { %v1276_v5 = vmul.f32 0.5, %v1275_v4 }
 0x7c9   :  { %2973 = vtanh.f32 %v1276_v5 }
 0x7ca   :  { %2975 = vrcp.f32 %v1303_v19 }
 0x7ce   :  { %v2972_v9 = vpop.eup %2971 }
 0x7cf   :  { %v1281_v12 = vadd.f32 1.0, %v2972_v9 }
 0x7d1   :  { %v1283_v14 = vmul.f32 0.5, %v1281_v12 }
 0x7d3   :  { %v2974_v10 = vpop.eup %2973 }
 0x7d4   :  { %v1280_v27 = vadd.f32 1.0, %v2974_v10  ;;  %v2976_v20 = vpop.eup %2975 }
 0x7d5   :  { %v1306_v25 = vmul.f32 %v2976_v20, %v1304_v21  ;;  %v1586_v21 = vld [vmem:[%s3693_s14 + $0x8] sm:$0xff] }
 0x7d6   :  { %v1282_v13 = vmul.f32 0.5, %v1280_v27 }
 0x7d7   :  { %v1307_v42 = vadd.f32 0.01, %v1306_v25  ;;  %v1690_v25 = vld [vmem:[%s3694_s16 + $0x18] sm:$0xff] }
 0x7d8   :  { %v1285_v15 = vrot.slane %v1282_v13, 4  ;;  %v1294_v23 = vsub.f32 1.0, %v1282_v13 }
 0x7da   :  { %v1287_v16 = vsub.f32 %v1283_v14, %v1285_v15  ;;  %v1291_v26 = vsub.f32 %v1282_v13, %v1285_v15  ;;  %v1295_v36 = vmul.f32 %v1294_v23, %v1282_v13  ;;  %v1688_v23 = vld [vmem:[%s3694_s16 + $0x8] sm:$0xff] }
 0x7dc   :  { %v1288_v11 = vmax.f32 %v1287_v16, 1e-06 }
 0x7de   :  { %2977 = vrcp.f32 %v1288_v11 }
 0x7df   :  { %2979 = vlog2.f32 %v700_v32 }
 0x7e8   :  { %v2978_v28 = vpop.eup %2977 }
 0x7e9   :  { %v1293_v30 = vmul.f32 %v2978_v28, %v1250_v57  ;;  %v1292_v37 = vmul.f32 %v2978_v28, %v1291_v26  ;;  %v2980_v10 = vpop.eup %2979  ;;  %v1785_v26 = vld [vmem:[%s3695_s18 + $0x8] sm:$0xf]  ;;  %v2897_v28 = vld [vmem:[%s3699_s13] sm:$0xff]  }
 0x7ea   :  { %v702_v12 = vmul.f32 0.6931472, %v2980_v10  ;;  %2811 = vmatprep.mubr.msk.bf16.mxu0 %vm375_vm2, %v2897_v28 }
 0x7eb   :  { %v1296_v44 = vmul.f32 %v1295_v36, %v1293_v30  ;;  %v1308_v39 = vmul.f32 %v1307_v42, %v1292_v37 }
 0x7ec   :  { %v707_v17 = vsel %vm82_vm12, %v702_v12, 0.0 }
 0x7ed   :  { %v1309_v48 = vsel %vm334_vm7, %v1308_v39, 0.0  ;;  %v1316_v31 = vmul.f32 %v1307_v42, %v1296_v44 }
 0x7ee   :  { %v1310_v50 = vrot.slane %v1309_v48, 4 }
 0x7ef   :  { %v1317_v51 = vsel %vm334_vm7, %v1316_v31, 0.0 }
 0x7f0   :  { %v1311_v53 = vadd.f32 %v1310_v50, %v1309_v48  ;;  %v1318_v54 = vrot.slane %v1317_v51, 4 }
 0x7f2   :  { %v1319_v55 = vadd.f32 %v1318_v54, %v1317_v51  ;;  %v1312_v56 = vrot.slane %v1311_v53, 2 }
 0x7f4   :  { %v1320_v35 = vrot.slane %v1319_v55, 2  ;;  %v1313_v57 = vadd.f32 %v1312_v56, %v1311_v53 }
 0x7f6   :  { %v1321_v60 = vadd.f32 %v1320_v35, %v1319_v55  ;;  %v1314_v61 = vrot.slane %v1313_v57, 1 }
 0x7f8   :  { %v1322_v63 = vrot.slane %v1321_v60, 1  ;;  %v1315_v24 = vadd.f32 %v1314_v61, %v1313_v57 }
 0x7fa   :  { %v1323_v1 = vadd.f32 %v1322_v63, %v1321_v60  ;;  %v1324_v2 = vmul.f32 6.2831855, %v1315_v24 }
 0x7fc   :  { %v1325_v3 = vmax.f32 %v1323_v1, 1e-30  ;;  %v1331_v4 = vsel %vm82_vm12, %v1324_v2, %v1329_v62 }
 0x7fd   :  { %v1348_v5 = vadd.f32 1.5707964, %v1331_v4 }
 0x7fe   :  { %2981 = vlog2.f32 %v1325_v3 }
 0x7ff   :  { %v1349_v6 = vmul.f32 0.15915494, %v1348_v5 }
 0x801   :  { %v1350_v7 = vfloor.f32 %v1349_v6 }
 0x803   :  { %v1351_v8 = vmul.f32 6.2831855, %v1350_v7 }
 0x805   :  { %v1352_v9 = vsub.f32 %v1348_v5, %v1351_v8 }
 0x807   :  { %vm1353_vm15 = vcmp.lt.f32.partialorder %v1352_v9, 0.0  ;;  %v1354_v27 = vadd.f32 6.2831855, %v1352_v9 }
 0x808   :  { %v2982_v41 = vpop.eup %2981 }
 0x809   :  { %v1327_v19 = vmul.f32 0.6931472, %v2982_v41  ;;  %v1355_v13 = vsel %vm1353_vm15, %v1354_v27, %v1352_v9 }
 0x80a   :  { %vm1356_vm0 = vcmp.ge.f32.partialorder %v1355_v13, 6.2831855  ;;  %v2680_v14 = vadd.f32 -6.2831855, %v1355_v13 }
 0x80b   :  { %v1332_v15 = vsel %vm82_vm12, %v1327_v19, 0.0 }
 0x80c   :  { %v1334_v16 = vrot.slane %v1332_v15, 1  ;;  %v3455_v11 = vsel %vm1356_vm0, %v2680_v14, %v1355_v13 }
 0x80d   :  { %v1360_v18 = vrot.slane %v3455_v11, 4 }
 0x80e   :  { %v3460_v20 = vadd.f32 %v1334_v16, %v707_v17 }
 0x80f   :  { %1362 = vrot.lane.b32.xlu0 %v1360_v18, %s3739_s11 }
 0x813   :  { %1596 = vperm.xlu0 %2885, %v1586_v21  }
 0x817   :  { %1606 = vperm.xlu0 %2885, %v1588_v22  }
 0x81b   :  { %1698 = vperm.xlu0 %2885, %v1688_v23  }
 0x81f   :  { %1708 = vperm.xlu0 %2885, %v1690_v25  }
 0x823   :  { %1793 = vperm.xlu0 %2885, %v1785_v26  }
 0x881   :  { %v1363_v29 = vpop.permute.xlu0 %1362 }
 0x882   :  { %v1365_v30 = vrot.slane %v1363_v29, 7 }
 0x884   :  { %v3483_v36 = vsel %vm120_vm3, %v1360_v18, %v1365_v30 }
 0x885   :  { %v1371_v37 = vand.u32 2139095040, %v3483_v36  ;;  %v1368_v47 = vand.u32 2147483647, %v3483_v36  ;;  %vm1370_vm15 = vcmp.lt.s32.totalorder %v3483_v36, 0 }
 0x887   :  { %v1372_v42 = vshrl.u32 %v1371_v37, 23  ;;  %v1375_v50 = vand.u32 8388607, %v1368_v47  ;;  %vm1369_vm0 = vcmp.le.f32.partialorder %v1368_v47, 0.7853982 }
 0x889   :  { %v2681_v44 = vadd.s32 4294967169, %v1372_v42  ;;  %v1376_v32 = vor.u32 8388608, %v1375_v50 }
 0x88b   :  { %v1378_v39 = vadd.s32 1, %v2681_v44  ;;  %v1416_v41 = vshll.u32 %v1376_v32, 8 }
 0x88d   :  { %vm1379_vm1 = vcmp.gt.s32.totalorder %v1378_v39, 0 }
 0x88e   :  { %v1380_v48 = vsel %vm1379_vm1, %v1378_v39, 0 }
 0x88f   :  { %v1382_v31 = vand.u32 31, %v1380_v48  ;;  %v1381_v45 = vshrl.u32 %v1380_v48, 5 }
 0x891   :  { %v1383_v51 = vsub.s32 32, %v1382_v31  ;;  %v1385_v53 = vshll.u32 %v3062_v38, %v1382_v31  ;;  %v1388_v54 = vshll.u32 %v3063_v40, %v1382_v31  ;;  %v1391_v58 = vshll.u32 %v3064_v43, %v1382_v31 }
 0x892   :  { %v1394_v57 = vshll.u32 %v3065_v46, %v1382_v31  ;;  %v1397_v61 = vshll.u32 %v3066_v49, %v1382_v31  ;;  %vm1400_vm4 = vcmp.lt.s32.totalorder %v1381_v45, 1  ;;  %vm1403_vm5 = vcmp.lt.s32.totalorder %v1381_v45, 4 }
 0x893   :  { %v1386_v55 = vshrl.u32 %v3063_v40, %v1383_v51  ;;  %v1389_v56 = vshrl.u32 %v3064_v43, %v1383_v51  ;;  %v1392_v35 = vshrl.u32 %v3065_v46, %v1383_v51  ;;  %v1395_v60 = vshrl.u32 %v3066_v49, %v1383_v51 }
 0x894   :  { %v1398_v62 = vshrl.u32 %v3067_v52, %v1383_v51  ;;  %v1384_v7 = vshrl.u32 %v3062_v38, %v1383_v51  ;;  %vm1402_vm10 = vcmp.lt.s32.totalorder %v1381_v45, 3  ;;  %vm1401_vm11 = vcmp.lt.s32.totalorder %v1381_v45, 2 }
 0x895   :  { %v1387_v63 = vor.u32 %v1386_v55, %v1385_v53  ;;  %v1390_v24 = vor.u32 %v1389_v56, %v1388_v54  ;;  %v1393_v1 = vor.u32 %v1392_v35, %v1391_v58  ;;  %v1396_v2 = vor.u32 %v1395_v60, %v1394_v57 }
 0x896   :  { %v1399_v3 = vor.u32 %v1398_v62, %v1397_v61 }
 0x897   :  { %v1405_v4 = vsel %vm1403_vm5, %v1393_v1, 2102212464  ;;  %v1408_v5 = vsel %vm1400_vm4, %v1387_v63, %v1390_v24  ;;  %v1412_v6 = vsel %vm1400_vm4, %v1390_v24, %v1393_v1  ;;  %v1409_v8 = vsel %vm1403_vm5, %v1396_v2, 920167782 }
 0x898   :  { %v1413_v9 = vsel %vm1403_vm5, %v1399_v3, 1326507024  ;;  %v1410_v10 = vsel %vm1402_vm10, %v1393_v1, %v1409_v8  ;;  %v1404_v12 = vsel %vm1400_vm4, %v1384_v7, %v1387_v63  ;;  %v1406_v19 = vsel %vm1402_vm10, %v1390_v24, %v1405_v4 }
 0x899   :  { %v1414_v27 = vsel %vm1402_vm10, %v1396_v2, %v1413_v9  ;;  %v1411_v13 = vsel %vm1401_vm11, %v1408_v5, %v1410_v10  ;;  %v1407_v21 = vsel %vm1401_vm11, %v1404_v12, %v1406_v19 }
 0x89a   :  { %v1415_v14 = vsel %vm1401_vm11, %v1412_v6, %v1414_v27  ;;  %v3503_v17 = vmul.u32.u64.low %v1416_v41, %v1411_v13  ;;  %v3504_v18 = vmul.u32.u64.high %v1416_v41, %v1411_v13, %v3503_v17  ;;  %v1423_v23 = vmul.u32 %v1416_v41, %v1407_v21 }
 0x89b   :  { %v3500_v15 = vmul.u32.u64.low %v1416_v41, %v1415_v14  ;;  %v3501_v16 = vmul.u32.u64.high %v1416_v41, %v1415_v14, %v3500_v15 }
 0x89c   :  { %v1426_v22 = vadd.s32 1, %v3504_v18 }
 0x89d   :  { %vm1425_vm13 = vc.u32 %v3501_v16, %v3503_v17  ;;  %v1424_v50 = vadd.s32 %v3503_v17, %v3501_v16 }
 0x89e   :  { %v1427_v25 = vsel %vm1425_vm13, %v1426_v22, %v3504_v18  ;;  %v2898_v22 = vld [vmem:[%s3699_s13 + $0x8] sm:$0xff]  }
 0x89f   :  { %v1428_v26 = vadd.s32 %v1427_v25, %v1423_v23  ;;  %v1592_v23 = vpop.permute.xlu1 %1591  ;;  %v1597_v25 = vpop.permute.xlu0 %1596 }
 0x8a1   :  { %v1429_v28 = vadd.s32 536870912, %v1428_v26 }
 0x8a3   :  { %v1430_v29 = vshrl.u32 %v1429_v28, 30 }
 0x8a5   :  { %v1431_v30 = vshll.u32 %v1430_v29, 30  ;;  %v1454_v62 = vsub.s32 4, %v1430_v29 }
 0x8a7   :  { %v1432_v37 = vsub.s32 %v1428_v26, %v1431_v30  ;;  %v1455_v24 = vsel %vm1370_vm15, %v1454_v62, %v1430_v29  ;;  %v1602_v26 = vpop.permute.xlu1 %1601 }
 0x8a8   :  { %v1457_v2 = vsel %vm1369_vm0, 0, %v1455_v24 }
 0x8a9   :  { %v1434_v42 = vsub.s32 0, %v1432_v37  ;;  %v1564_v3 = vadd.s32 3, %v1457_v2  ;;  %v1461_v4 = vand.u32 3, %v1457_v2 }
 0x8ab   :  { %v2682_v44 = vmin.u32 %v1434_v42, %v1432_v37  ;;  %v1565_v5 = vand.u32 3, %v1564_v3  ;;  %vm1466_vm4 = vcmp.eq.s32.totalorder %v1461_v4, 2  ;;  %vm1463_vm10 = vcmp.eq.s32.totalorder %v1461_v4, 0 }
 0x8ac   :  { %vm1462_vm13 = vcmp.lt.s32.totalorder %v1461_v4, 2 }
 0x8ad   :  { %v1436_v39 = vclz %v2682_v44  ;;  %vm1570_vm1 = vcmp.eq.s32.totalorder %v1565_v5, 2  ;;  %vm1567_vm5 = vcmp.eq.s32.totalorder %v1565_v5, 0  ;;  %vm1566_vm11 = vcmp.lt.s32.totalorder %v1565_v5, 2 }
 0x8af   :  { %v2683_v48 = vadd.s32 4294967294, %v1436_v39 }
 0x8b1   :  { %vm2684_vm14 = vcmp.lt.s32.totalorder %v2683_v48, 0 }
 0x8b2   :  { %v1439_v31 = vsel %vm2684_vm14, 0, %v2683_v48  ;;  %vm1460_vm14 = vweird.f32 %v3483_v36 }
 0x8b3   :  { %v1440_v51 = vsub.s32 32, %v1439_v31  ;;  %v1444_v45 = vsub.s32 4294967266, %v1439_v31  ;;  %v1441_v53 = vshll.u32 %v1432_v37, %v1439_v31  ;;  %v1607_v37 = vpop.permute.xlu0 %1606 }
 0x8b5   :  { %v1442_v54 = vshrl.u32 %v1424_v50, %v1440_v51  ;;  %v1445_v55 = vadd.s32 127, %v1444_v45 }
 0x8b7   :  { %v1443_v56 = vor.u32 %v1442_v54, %v1441_v53  ;;  %v1446_v58 = vshll.u32 %v1445_v55, 23 }
 0x8b9   :  { %v1447_v35 = vor.u32 4788187, %v1446_v58  ;;  %v1450_v60 = vcvt.s32.f32 %v1443_v56  ;;  %v2900_v56 = vld [vmem:[%s3700_s15 + $0x8] sm:$0xff]   ;;  %v1694_v58 = vpop.permute.xlu1 %1693 }
 0x8bb   :  { %v1448_v57 = vand.u32 2147483647, %v1447_v35  ;;  %v1699_v35 = vpop.permute.xlu0 %1698 }
 0x8bd   :  { %v1451_v61 = vmul.f32 %v1450_v60, %v1448_v57  ;;  %v1704_v57 = vpop.permute.xlu1 %1703 }
 0x8bf   :  { %v1452_v32 = vxor.u32 2147483648, %v1451_v61 }
 0x8c1   :  { %v1453_v63 = vsel %vm1370_vm15, %v1452_v32, %v1451_v61  ;;  %v1709_v32 = vpop.permute.xlu0 %1708 }
 0x8c2   :  { %v1456_v1 = vsel %vm1369_vm0, %v3483_v36, %v1453_v63  ;;  %v2899_v36 = vld [vmem:[%s3700_s15] sm:$0xff]  }
 0x8c3   :  { %2983 = vcosq.f32 %v1456_v1  ;;  %2819 = vmatprep.mubr.msk.bf16.mxu1 %vm478_vm8, %v2899_v36 }
 0x8c4   :  { %2985 = vsinq.f32 %v1456_v1 }
 0x8cd   :  { %v2984_v6 = vpop.eup %2983 }
 0x8ce   :  { %v2986_v7 = vpop.eup %2985  ;;  %v1467_v8 = vxor.u32 2147483648, %v2984_v6 }
 0x8cf   :  { %v1464_v9 = vxor.u32 2147483648, %v2986_v7 }
 0x8d0   :  { %v1572_v10 = vsel %vm1570_vm1, %v1467_v8, %v2986_v7  ;;  %v1468_v47 = vsel %vm1466_vm4, %v1467_v8, %v2986_v7 }
 0x8d1   :  { %v1569_v27 = vsel %vm1567_vm5, %v2984_v6, %v1464_v9  ;;  %v1465_v41 = vsel %vm1463_vm10, %v2984_v6, %v1464_v9 }
 0x8d2   :  { %v1573_v12 = vsel %vm1566_vm11, %v1569_v27, %v1572_v10  ;;  %v1469_v19 = vsel %vm1462_vm13, %v1465_v41, %v1468_v47  ;;  %v2901_v10 = vld [vmem:[%s3701_s17] sm:$0x3f]   ;;  %v1337_v47 = vadd.f32 1.5707964, %v3323_v59  ;;  %v1789_v41 = vpop.permute.xlu1 %1788 }
 0x8d3   :  { %v1574_v13 = vsel %vm1460_vm14, nan, %v1573_v12  ;;  %v1470_v15 = vsel %vm1460_vm14, nan, %v1469_v19 }
 0x8d4   :  { %v1576_v14 = vrot.slane %v1574_v13, 6  ;;  %v1338_v27 = vmul.f32 0.15915494, %v1337_v47 }
 0x8d6   :  { %v1578_v16 = vsel %vm332_vm6, %v1470_v15, %v1576_v14  ;;  %v1794_v14 = vpop.permute.xlu0 %1793 }
 0x8d7   :  { %v1579_v17 = vsel %vm334_vm7, %v1578_v16, 0.0  ;;  %v1339_v16 = vfloor.f32 %v1338_v27 }
 0x8d8   :  { %v1580_v18 = vpack.c.bf16 %v1579_v17, %v1579_v17 }
 0x8da   :  { %2855 = vmatprep.subr.msk.bf16.mxu0 %vm334_vm7, %v1580_v18  ;;  %v1626_v21 = vsel %vm334_vm7, %v1580_v18, 0 }
 0x8db   :  { %2810 = vmatpush3.bf16.msra.mxu0 %v1626_v21 }
 0x8dc   :  { %2823 = vmatprep.subr.bf16.mxu0 %v3068_v34 }
 0x8de   :  { %2812 = vmatmul.mubr.msk.bf16.vlgmr.msra.gmra.mrb[12].mxu0 %vm375_vm2, %v2898_v22 }
 0x8df   :  { %2827 = vmatprep.mubr.msk.bf16.mxu0 %vm3069_vm9, %v3068_v34 }
 0x9b1   :  { %v2813_v28 = vpop.f32.mrb[12].mxu0 }
 0x9b2   :  { %v1671_v29 = vadd.f32 %v2813_v28, %v1602_v26  ;;  %v1662_v30 = vpop.f32.mrb[13].mxu0  ;;  %v1340_v26 = vmul.f32 6.2831855, %v1339_v16 }
 0x9b3   :  { %v1663_v42 = vadd.f32 %v1662_v30, %v1592_v23  ;;  %v2814_v44 = vpop.f32.mrb[14].mxu0 }
 0x9b4   :  { %2987 = vtanh.f32 %v1671_v29  ;;  %v1674_v39 = vadd.f32 %v2814_v44, %v1607_v37  ;;  %v1665_v48 = vpop.f32.mrb[15].mxu0  ;;  %v1341_v37 = vsub.f32 %v1337_v47, %v1340_v26 }
 0x9b5   :  { %2989 = vtanh.f32 %v1663_v42  ;;  %v1666_v31 = vadd.f32 %v1665_v48, %v1597_v25 }
 0x9b6   :  { %2991 = vtanh.f32 %v1674_v39  ;;  %v1343_v39 = vadd.f32 6.2831855, %v1341_v37  ;;  %vm1342_vm15 = vcmp.lt.f32.partialorder %v1341_v37, 0.0 }
 0x9b7   :  { %2993 = vtanh.f32 %v1666_v31 }
 0x9be   :  { %v2988_v50 = vpop.eup %2987 }
 0x9bf   :  { %v2990_v51 = vpop.eup %2989 }
 0x9c0   :  { %v2992_v45 = vpop.eup %2991 }
 0x9c1   :  { %v2994_v53 = vpop.eup %2993  ;;  %v1682_v54 = vpack.c.bf16 %v2992_v45, %v2988_v50  ;;  %v1344_v50 = vsel %vm1342_vm15, %v1343_v39, %v1341_v37 }
 0x9c2   :  { %v1681_v55 = vpack.c.bf16 %v2994_v53, %v2990_v51  ;;  %vm1345_vm0 = vcmp.ge.f32.partialorder %v1344_v50, 6.2831855 }
 0x9c4   :  { %2815 = vmatprep.subr.bf16.mxu1 %v1681_v55 }
 0x9c5   :  { %2816 = vmatpush3.bf16.msra.mxu1 %v1681_v55 }
 0x9c6   :  { %2817 = vmatprep.subr.bf16.mxu1 %v1682_v54 }
 0x9c9   :  { %2818 = vmatpush3.bf16.msra.mxu1 %v1682_v54  ;;  %v2679_v54 = vadd.f32 -6.2831855, %v1344_v50 }
 0x9cb   :  { %v3542_v55 = vsel %vm1345_vm0, %v2679_v54, %v1344_v50 }
 0x9cc   :  { %2820 = vmatmul.mubr.msk.bf16.vlgmr.msra.gmra.mrb[12].mxu1 %vm478_vm8, %v2900_v56  ;;  %v1845_v56 = vmul.f32 0.15915494, %v3542_v55 }
 0xa9f   :  { %v2821_v60 = vpop.f32.mrb[12].mxu1 }
 0xaa0   :  { %v1770_v61 = vadd.f32 %v2821_v60, %v1704_v57  ;;  %v1761_v62 = vpop.f32.mrb[13].mxu1 }
 0xaa1   :  { %v1762_v63 = vadd.f32 %v1761_v62, %v1694_v58  ;;  %v2822_v24 = vpop.f32.mrb[14].mxu1  ;;  %v1872_v58 = vsub.s32 3, %v3308_v33 }
 0xaa2   :  { %2995 = vtanh.f32 %v1770_v61  ;;  %v1773_v1 = vadd.f32 %v2822_v24, %v1709_v32  ;;  %v1764_v2 = vpop.f32.mrb[15].mxu1 }
 0xaa3   :  { %2997 = vtanh.f32 %v1762_v63  ;;  %v1765_v3 = vadd.f32 %v1764_v2, %v1699_v35  ;;  %v1873_v60 = vrot.slane %v1845_v56, %v1872_v58 }
 0xaa4   :  { %2999 = vtanh.f32 %v1773_v1 }
 0xaa5   :  { %3001 = vtanh.f32 %v1765_v3 }
 0xaac   :  { %v2996_v4 = vpop.eup %2995 }
 0xaad   :  { %v2998_v5 = vpop.eup %2997 }
 0xaae   :  { %v3000_v6 = vpop.eup %2999 }
 0xaaf   :  { %v3002_v7 = vpop.eup %3001  ;;  %v1781_v8 = vpack.c.bf16 %v3000_v6, %v2996_v4 }
 0xab0   :  { %v1780_v9 = vpack.c.bf16 %v3002_v7, %v2998_v5 }
 0xab2   :  { %2824 = vmatpush3.bf16.msra.mxu0 %v1780_v9 }
 0xab3   :  { %2825 = vmatprep.subr.bf16.mxu0 %v3068_v34 }
 0xab6   :  { %2826 = vmatpush3.bf16.msra.mxu0 %v1781_v8 }
 0xab9   :  { %2828 = vmatmul.mubr.msk.bf16.vlgmr.msra.gmra.mrb[16].mxu0 %vm478_vm8, %v2901_v10 }
 0xb8c   :  { %v1838_v12 = vpop.f32.mrb[16].mxu0 }
 0xb8d   :  { %v1839_v19 = vadd.f32 %v1838_v12, %v1789_v41  ;;  %v2829_v13 = vpop.f32.mrb[17].mxu0 }
 0xb8e   :  { %v1841_v15 = vpop.f32.mrb[18].mxu0 }
 0xb8f   :  { %v1853_v17 = vand.u32 2147483647, %v1839_v19  ;;  %v1842_v18 = vadd.f32 %v1841_v15, %v1794_v14  ;;  %v2830_v21 = vpop.f32.mrb[19].mxu0  ;;  %v1855_v36 = vsub.f32 0.0, %v1839_v19  ;;  %v1862_v62 = vmax.f32 %v1839_v19, 0.0 }
 0xb91   :  { %v1854_v22 = vsub.f32 0.0, %v1853_v17  ;;  %v1846_v23 = vsel %vm334_vm7, %v1842_v18, -inf }
 0xb92   :  { %v1847_v25 = vrot.slane %v1846_v23, 4 }
 0xb93   :  { %v1857_v28 = vsel %vm334_vm7, %v1854_v22, %v1855_v36 }
 0xb94   :  { %v1858_v59 = vmul.f32 1.442695, %v1857_v28  ;;  %v1848_v29 = vmax.f32 %v1846_v23, %v1847_v25 }
 0xb96   :  { %3003 = vpow2.f32 %v1858_v59  ;;  %v1849_v30 = vrot.slane %v1848_v29, 2 }
 0xb98   :  { %v1850_v42 = vmax.f32 %v1848_v29, %v1849_v30 }
 0xb9a   :  { %v1851_v44 = vrot.slane %v1850_v42, 1 }
 0xb9c   :  { %v1852_v48 = vmax.f32 %v1850_v42, %v1851_v44 }
 0xb9e   :  { %v1856_v31 = vsub.f32 %v1842_v18, %v1852_v48 }
 0xba0   :  { %v3004_v51 = vpop.eup %3003  ;;  %v1860_v45 = vmul.f32 1.442695, %v1856_v31 }
 0xba1   :  { %v1863_v53 = vadd.f32 1.0, %v3004_v51 }
 0xba2   :  { %3005 = vpow2.f32 %v1860_v45 }
 0xba3   :  { %3007 = vlog2.f32 %v1863_v53 }
 0xba4   :  { %3009 = vrcp.f32 %v1863_v53 }
 0xbac   :  { %v3006_v35 = vpop.eup %3005 }
 0xbad   :  { %v3008_v57 = vpop.eup %3007  ;;  %v1914_v2 = vsel %vm334_vm7, %v3006_v35, 0.0  ;;  %v1921_v30 = vmul.f32 0.96, %v3006_v35 }
 0xbae   :  { %v3010_v61 = vpop.eup %3009  ;;  %v1865_v32 = vmul.f32 0.6931472, %v3008_v57  ;;  %v1915_v6 = vrot.slane %v1914_v2, 4 }
 0xbaf   :  { %v1874_v63 = vsub.f32 %v1873_v60, %v3010_v61  ;;  %v1884_v24 = vsub.f32 1.0, %v3010_v61  ;;  %v1881_v9 = vrot.slane %v3010_v61, 4 }
 0xbb0   :  { %v1866_v1 = vadd.f32 %v1865_v32, %v1862_v62  ;;  %v1916_v12 = vadd.f32 %v1915_v6, %v1914_v2 }
 0xbb1   :  { %v1876_v4 = vrot.slane %v1874_v63, 4  ;;  %v1886_v5 = vrot.slane %v1884_v24, 4 }
 0xbb2   :  { %v1867_v3 = vadd.f32 0.01, %v1866_v1  ;;  %v1917_v14 = vrot.slane %v1916_v12, 2 }
 0xbb4   :  { %v1878_v7 = vmul.f32 %v1876_v4, %v1867_v3  ;;  %v1879_v8 = vsub.f32 0.0, %v1867_v3  ;;  %v1888_v10 = vmul.f32 %v1886_v5, %v1867_v3  ;;  %v1918_v15 = vadd.f32 %v1917_v14, %v1916_v12 }
 0xbb6   :  { %v1883_v47 = vmul.f32 %v1881_v9, %v1879_v8  ;;  %v1894_v27 = vmul.f32 0.5, %v1888_v10  ;;  %v1919_v16 = vrot.slane %v1918_v15, 1 }
 0xbb8   :  { %v1890_v41 = vrot.slane %v1883_v47, 4  ;;  %3011 = vtanh.f32 %v1894_v27  ;;  %v1920_v36 = vadd.f32 %v1919_v16, %v1918_v15 }
 0xbba   :  { %v1892_v19 = vsel %vm334_vm7, %v1878_v7, %v1890_v41 }
 0xbbb   :  { %v1893_v13 = vmul.f32 0.5, %v1892_v19 }
 0xbbd   :  { %3013 = vtanh.f32 %v1893_v13 }
 0xbbe   :  { %3015 = vrcp.f32 %v1920_v36  ;;  %v2310_v36 = vld [vmem:[%s3703_s22 + $0x8] sm:$0xff] }
 0xbc2   :  { %v3012_v17 = vpop.eup %3011 }
 0xbc3   :  { %v1898_v22 = vadd.f32 1.0, %v3012_v17 }
 0xbc5   :  { %v1900_v25 = vmul.f32 0.5, %v1898_v22  ;;  %v2209_v22 = vld [vmem:[%s3702_s20 + $0x10] sm:$0xff] }
 0xbc7   :  { %v3014_v18 = vpop.eup %3013 }
 0xbc8   :  { %v1897_v21 = vadd.f32 1.0, %v3014_v18  ;;  %v3016_v29 = vpop.eup %3015  ;;  %v2208_v18 = vld [vmem:[%s3702_s20 + $0x8] sm:$0xff] }
 0xbc9   :  { %v1923_v42 = vmul.f32 %v3016_v29, %v1921_v30  ;;  %v2902_v29 = vld [vmem:[%s3705_s19] sm:$0xff]  }
 0xbca   :  { %v1899_v23 = vmul.f32 0.5, %v1897_v21  ;;  %v2207_v21 = vld [vmem:[%s3702_s20] sm:$0xff]  ;;  %2833 = vmatprep.mubr.msk.bf16.mxu1 %vm375_vm2, %v2902_v29 }
 0xbcb   :  { %v1924_v51 = vadd.f32 0.01, %v1923_v42 }
 0xbcc   :  { %v1902_v26 = vrot.slane %v1899_v23, 4  ;;  %v1911_v37 = vsub.f32 1.0, %v1899_v23 }
 0xbce   :  { %v1904_v28 = vsub.f32 %v1900_v25, %v1902_v26  ;;  %v1908_v44 = vsub.f32 %v1899_v23, %v1902_v26  ;;  %v1912_v31 = vmul.f32 %v1911_v37, %v1899_v23  ;;  %v2309_v23 = vld [vmem:[%s3703_s22] sm:$0xff]  ;;  %v2312_v25 = vld [vmem:[%s3703_s22 + $0x18] sm:$0xff]  ;;  %v2311_v26 = vld [vmem:[%s3703_s22 + $0x10] sm:$0xff] }
 0xbd0   :  { %v1905_v59 = vmax.f32 %v1904_v28, 1e-06  ;;  %v2407_v28 = vld [vmem:[%s3704_s24 + $0x8] sm:$0xf] }
 0xbd2   :  { %3017 = vrcp.f32 %v1905_v59  ;;  %v2406_v59 = vld [vmem:[%s3704_s24] sm:$0xff] }
 0xbdc   :  { %v3018_v39 = vpop.eup %3017 }
 0xbdd   :  { %v1910_v48 = vmul.f32 %v3018_v39, %v1867_v3  ;;  %v1909_v50 = vmul.f32 %v3018_v39, %v1908_v44 }
 0xbdf   :  { %v1913_v45 = vmul.f32 %v1912_v31, %v1910_v48  ;;  %v1925_v53 = vmul.f32 %v1924_v51, %v1909_v50 }
 0xbe1   :  { %v1926_v54 = vsel %vm334_vm7, %v1925_v53, 0.0  ;;  %v1933_v56 = vmul.f32 %v1924_v51, %v1913_v45 }
 0xbe2   :  { %v1927_v58 = vrot.slane %v1926_v54, 4 }
 0xbe3   :  { %v1934_v57 = vsel %vm334_vm7, %v1933_v56, 0.0 }
 0xbe4   :  { %v1928_v60 = vadd.f32 %v1927_v58, %v1926_v54  ;;  %v1935_v61 = vrot.slane %v1934_v57, 4 }
 0xbe6   :  { %v1929_v62 = vrot.slane %v1928_v60, 2  ;;  %v1936_v35 = vadd.f32 %v1935_v61, %v1934_v57 }
 0xbe8   :  { %v1937_v32 = vrot.slane %v1936_v35, 2  ;;  %v1930_v63 = vadd.f32 %v1929_v62, %v1928_v60 }
 0xbea   :  { %v1938_v24 = vadd.f32 %v1937_v32, %v1936_v35  ;;  %v1931_v1 = vrot.slane %v1930_v63, 1 }
 0xbec   :  { %v1939_v2 = vrot.slane %v1938_v24, 1  ;;  %v1932_v3 = vadd.f32 %v1931_v1, %v1930_v63 }
 0xbee   :  { %v1940_v4 = vadd.f32 %v1939_v2, %v1938_v24  ;;  %v1941_v5 = vmul.f32 6.2831855, %v1932_v3 }
 0xbf0   :  { %v1942_v6 = vmax.f32 %v1940_v4, 1e-30  ;;  %v1945_v7 = vsel %vm82_vm12, %v1941_v5, %v3542_v55 }
 0xbf1   :  { %v1948_v8 = vadd.f32 1.5707964, %v1945_v7 }
 0xbf2   :  { %3019 = vlog2.f32 %v1942_v6 }
 0xbf3   :  { %v1949_v9 = vmul.f32 0.15915494, %v1948_v8 }
 0xbf5   :  { %v1950_v10 = vfloor.f32 %v1949_v9 }
 0xbf7   :  { %v1951_v47 = vmul.f32 6.2831855, %v1950_v10 }
 0xbf9   :  { %v1952_v27 = vsub.f32 %v1948_v8, %v1951_v47 }
 0xbfb   :  { %vm1953_vm1 = vcmp.lt.f32.partialorder %v1952_v27, 0.0  ;;  %v1954_v41 = vadd.f32 6.2831855, %v1952_v27 }
 0xbfc   :  { %v3020_v12 = vpop.eup %3019 }
 0xbfd   :  { %v1944_v19 = vmul.f32 0.6931472, %v3020_v12  ;;  %v1955_v13 = vsel %vm1953_vm1, %v1954_v41, %v1952_v27 }
 0xbfe   :  { %vm1956_vm4 = vcmp.ge.f32.partialorder %v1955_v13, 6.2831855  ;;  %v2699_v14 = vadd.f32 -6.2831855, %v1955_v13 }
 0xbff   :  { %v1946_v15 = vsel %vm82_vm12, %v1944_v19, 0.0 }
 0xc00   :  { %v3556_v16 = vadd.f32 %v1946_v15, %v3460_v20  ;;  %v3558_v55 = vsel %vm1956_vm4, %v2699_v14, %v1955_v13  ;;  %v2210_v20 = vld [vmem:[%s3702_s20 + $0x18] sm:$0xff] }
 0xc01   :  { %v1971_v17 = vrot.slane %v3558_v55, 3  ;;  %v1987_v48 = vrot.slane %v3558_v55, 2 }
 0xc03   :  { %1975 = vrot.lane.b32.xlu0 %v1971_v17, %s3070_s0  ;;  %1973 = vrot.lane.b32.xlu1 %v1971_v17, %s3071_s29 }
 0xc07   :  { %2218 = vperm.xlu0 %2885, %v2208_v18   ;;  %2213 = vperm.xlu1 %2886, %v2207_v21  }
 0xc0b   :  { %2228 = vperm.xlu0 %2885, %v2210_v20   ;;  %2223 = vperm.xlu1 %2886, %v2209_v22  }
 0xc0f   :  { %2320 = vperm.xlu0 %2885, %v2310_v36   ;;  %2315 = vperm.xlu1 %2886, %v2309_v23  }
 0xc13   :  { %2330 = vperm.xlu0 %2885, %v2312_v25   ;;  %2325 = vperm.xlu1 %2886, %v2311_v26  }
 0xc17   :  { %2415 = vperm.xlu0 %2885, %v2407_v28   ;;  %2410 = vperm.xlu1 %2886, %v2406_v59  }
 0xc75   :  { %v1976_v30 = vpop.permute.xlu0 %1975  ;;  %v1974_v37 = vpop.permute.xlu1 %1973 }
 0xc76   :  { %v1978_v42 = vrot.slane %v1976_v30, 3  ;;  %v1981_v44 = vrot.slane %v1974_v37, 3 }
 0xc78   :  { %v1983_v39 = vsel %vm82_vm12, %v1978_v42, %v1981_v44 }
 0xc79   :  { %v1985_v31 = vrot.slane %v1983_v39, 5 }
 0xc7b   :  { %v3601_v50 = vsel %vm120_vm3, %v1985_v31, %v1987_v48 }
 0xc7c   :  { %v1993_v51 = vand.u32 2139095040, %v3601_v50  ;;  %v1990_v56 = vand.u32 2147483647, %v3601_v50  ;;  %vm1992_vm1 = vcmp.lt.s32.totalorder %v3601_v50, 0 }
 0xc7e   :  { %v1994_v45 = vshrl.u32 %v1993_v51, 23  ;;  %v1997_v60 = vand.u32 8388607, %v1990_v56  ;;  %vm1991_vm4 = vcmp.le.f32.partialorder %v1990_v56, 0.7853982 }
 0xc80   :  { %v2701_v53 = vadd.s32 4294967169, %v1994_v45  ;;  %v1998_v7 = vor.u32 8388608, %v1997_v60 }
 0xc82   :  { %v2000_v54 = vadd.s32 1, %v2701_v53 }
 0xc84   :  { %vm2001_vm5 = vcmp.gt.s32.totalorder %v2000_v54, 0 }
 0xc85   :  { %v2002_v58 = vsel %vm2001_vm5, %v2000_v54, 0 }
 0xc86   :  { %v2004_v57 = vand.u32 31, %v2002_v58  ;;  %v2003_v62 = vshrl.u32 %v2002_v58, 5 }
 0xc88   :  { %v2005_v61 = vsub.s32 32, %v2004_v57  ;;  %v2007_v35 = vshll.u32 %v3062_v38, %v2004_v57  ;;  %v2010_v32 = vshll.u32 %v3063_v40, %v2004_v57  ;;  %v2013_v1 = vshll.u32 %v3064_v43, %v2004_v57 }
 0xc89   :  { %v2016_v3 = vshll.u32 %v3065_v46, %v2004_v57  ;;  %v2019_v5 = vshll.u32 %v3066_v49, %v2004_v57  ;;  %vm2022_vm10 = vcmp.lt.s32.totalorder %v2003_v62, 1  ;;  %vm2025_vm11 = vcmp.lt.s32.totalorder %v2003_v62, 4 }
 0xc8a   :  { %v2008_v63 = vshrl.u32 %v3063_v40, %v2005_v61  ;;  %v2011_v24 = vshrl.u32 %v3064_v43, %v2005_v61  ;;  %v2014_v2 = vshrl.u32 %v3065_v46, %v2005_v61  ;;  %v2017_v4 = vshrl.u32 %v3066_v49, %v2005_v61 }
 0xc8b   :  { %v2020_v6 = vshrl.u32 %v3067_v52, %v2005_v61  ;;  %v2006_v12 = vshrl.u32 %v3062_v38, %v2005_v61  ;;  %vm2024_vm13 = vcmp.lt.s32.totalorder %v2003_v62, 3  ;;  %vm2023_vm14 = vcmp.lt.s32.totalorder %v2003_v62, 2 }
 0xc8c   :  { %v2009_v8 = vor.u32 %v2008_v63, %v2007_v35  ;;  %v2012_v9 = vor.u32 %v2011_v24, %v2010_v32  ;;  %v2015_v10 = vor.u32 %v2014_v2, %v2013_v1  ;;  %v2018_v47 = vor.u32 %v2017_v4, %v2016_v3 }
 0xc8d   :  { %v2021_v40 = vor.u32 %v2020_v6, %v2019_v5  ;;  %v2038_v52 = vshll.u32 %v1998_v7, 8 }
 0xc8e   :  { %v2027_v27 = vsel %vm2025_vm11, %v2015_v10, 2102212464  ;;  %v2030_v43 = vsel %vm2022_vm10, %v2009_v8, %v2012_v9  ;;  %v2034_v41 = vsel %vm2022_vm10, %v2012_v9, %v2015_v10  ;;  %v2031_v46 = vsel %vm2025_vm11, %v2018_v47, 920167782 }
 0xc8f   :  { %v2035_v19 = vsel %vm2025_vm11, %v2021_v40, 1326507024  ;;  %v2032_v49 = vsel %vm2024_vm13, %v2015_v10, %v2031_v46  ;;  %v2026_v14 = vsel %vm2022_vm10, %v2006_v12, %v2009_v8  ;;  %v2028_v15 = vsel %vm2024_vm13, %v2012_v9, %v2027_v27 }
 0xc90   :  { %v2036_v13 = vsel %vm2024_vm13, %v2018_v47, %v2035_v19  ;;  %v2033_v17 = vsel %vm2023_vm14, %v2030_v43, %v2032_v49  ;;  %v2029_v23 = vsel %vm2023_vm14, %v2026_v14, %v2028_v15 }
 0xc91   :  { %v2037_v18 = vsel %vm2023_vm14, %v2034_v41, %v2036_v13  ;;  %v3621_v22 = vmul.u32.u64.low %v2038_v52, %v2033_v17  ;;  %v3622_v36 = vmul.u32.u64.high %v2038_v52, %v2033_v17, %v3621_v22  ;;  %v2045_v25 = vmul.u32 %v2038_v52, %v2029_v23 }
 0xc92   :  { %v3618_v21 = vmul.u32.u64.low %v2038_v52, %v2037_v18  ;;  %v3619_v20 = vmul.u32.u64.high %v2038_v52, %v2037_v18, %v3618_v21  ;;  %v2903_v18 = vld [vmem:[%s3705_s19 + $0x8] sm:$0xff]  }
 0xc93   :  { %v2048_v38 = vadd.s32 1, %v3622_v36  ;;  %v2214_v21 = vpop.permute.xlu1 %2213 }
 0xc94   :  { %vm2047_vm15 = vc.u32 %v3619_v20, %v3621_v22  ;;  %v2046_v51 = vadd.s32 %v3621_v22, %v3619_v20  ;;  %v2219_v20 = vpop.permute.xlu0 %2218 }
 0xc95   :  { %v2049_v26 = vsel %vm2047_vm15, %v2048_v38, %v3622_v36 }
 0xc96   :  { %v2050_v28 = vadd.s32 %v2049_v26, %v2045_v25 }
 0xc97   :  { %v2224_v22 = vpop.permute.xlu1 %2223 }
 0xc98   :  { %v2051_v59 = vadd.s32 536870912, %v2050_v28  ;;  %v2229_v25 = vpop.permute.xlu0 %2228 }
 0xc9a   :  { %v2052_v29 = vshrl.u32 %v2051_v59, 30 }
 0xc9c   :  { %v2053_v30 = vshll.u32 %v2052_v29, 30  ;;  %v2076_v24 = vsub.s32 4, %v2052_v29 }
 0xc9e   :  { %v2054_v37 = vsub.s32 %v2050_v28, %v2053_v30  ;;  %v2077_v3 = vsel %vm1992_vm1, %v2076_v24, %v2052_v29 }
 0xc9f   :  { %v2079_v5 = vsel %vm1991_vm4, 0, %v2077_v3 }
 0xca0   :  { %v2056_v42 = vsub.s32 0, %v2054_v37  ;;  %v2186_v6 = vadd.s32 3, %v2079_v5  ;;  %v2083_v8 = vand.u32 3, %v2079_v5 }
 0xca2   :  { %v2702_v44 = vmin.u32 %v2056_v42, %v2054_v37  ;;  %v2187_v7 = vand.u32 3, %v2186_v6  ;;  %vm2088_vm5 = vcmp.eq.s32.totalorder %v2083_v8, 2  ;;  %vm2085_vm11 = vcmp.eq.s32.totalorder %v2083_v8, 0 }
 0xca3   :  { %vm2084_vm14 = vcmp.lt.s32.totalorder %v2083_v8, 2  ;;  %v1959_v8 = vadd.f32 1.5707964, %v3455_v11 }
 0xca4   :  { %v2058_v39 = vclz %v2702_v44  ;;  %vm2192_vm10 = vcmp.eq.s32.totalorder %v2187_v7, 2  ;;  %vm2189_vm13 = vcmp.eq.s32.totalorder %v2187_v7, 0  ;;  %vm2188_vm15 = vcmp.lt.s32.totalorder %v2187_v7, 2  ;;  %v2906_v7 = vld [vmem:[%s3707_s23] sm:$0x3f]  }
 0xca6   :  { %v2703_v48 = vadd.s32 4294967294, %v2058_v39 }
 0xca8   :  { %vm2704_vm0 = vcmp.lt.s32.totalorder %v2703_v48, 0 }
 0xca9   :  { %v2061_v31 = vsel %vm2704_vm0, 0, %v2703_v48  ;;  %vm2082_vm0 = vweird.f32 %v3601_v50 }
 0xcaa   :  { %v2062_v45 = vsub.s32 32, %v2061_v31  ;;  %v2066_v53 = vsub.s32 4294967266, %v2061_v31  ;;  %v2063_v54 = vshll.u32 %v2054_v37, %v2061_v31 }
 0xcac   :  { %v2064_v58 = vshrl.u32 %v2046_v51, %v2062_v45  ;;  %v2067_v57 = vadd.s32 127, %v2066_v53  ;;  %v2905_v51 = vld [vmem:[%s3706_s21 + $0x8] sm:$0xff]   ;;  %v2316_v45 = vpop.permute.xlu1 %2315  ;;  %v2321_v53 = vpop.permute.xlu0 %2320 }
 0xcae   :  { %v2065_v60 = vor.u32 %v2064_v58, %v2063_v54  ;;  %v2068_v61 = vshll.u32 %v2067_v57, 23 }
 0xcb0   :  { %v2069_v62 = vor.u32 4788187, %v2068_v61  ;;  %v2072_v32 = vcvt.s32.f32 %v2065_v60  ;;  %v2326_v54 = vpop.permute.xlu1 %2325  ;;  %v2331_v61 = vpop.permute.xlu0 %2330 }
 0xcb2   :  { %v2070_v35 = vand.u32 2147483647, %v2069_v62 }
 0xcb4   :  { %v2073_v63 = vmul.f32 %v2072_v32, %v2070_v35 }
 0xcb6   :  { %v2074_v1 = vxor.u32 2147483648, %v2073_v63 }
 0xcb8   :  { %v2075_v2 = vsel %vm1992_vm1, %v2074_v1, %v2073_v63 }
 0xcb9   :  { %v2078_v4 = vsel %vm1991_vm4, %v3601_v50, %v2075_v2  ;;  %v2904_v50 = vld [vmem:[%s3706_s21] sm:$0xff]  }
 0xcba   :  { %3021 = vcosq.f32 %v2078_v4  ;;  %2841 = vmatprep.mubr.msk.bf16.mxu0 %vm478_vm8, %v2904_v50 }
 0xcbb   :  { %3023 = vsinq.f32 %v2078_v4 }
 0xcc4   :  { %v3022_v9 = vpop.eup %3021 }
 0xcc5   :  { %v3024_v10 = vpop.eup %3023  ;;  %v2089_v47 = vxor.u32 2147483648, %v3022_v9 }
 0xcc6   :  { %v2086_v40 = vxor.u32 2147483648, %v3024_v10 }
 0xcc7   :  { %v2090_v27 = vsel %vm2088_vm5, %v2089_v47, %v3024_v10  ;;  %v2194_v56 = vsel %vm2192_vm10, %v2089_v47, %v3024_v10  ;;  %v2411_v10 = vpop.permute.xlu1 %2410 }
 0xcc8   :  { %v2087_v43 = vsel %vm2085_vm11, %v3022_v9, %v2086_v40  ;;  %v2191_v41 = vsel %vm2189_vm13, %v3022_v9, %v2086_v40  ;;  %v1960_v9 = vmul.f32 0.15915494, %v1959_v8 }
 0xcc9   :  { %v2091_v12 = vsel %vm2084_vm14, %v2087_v43, %v2090_v27  ;;  %v2195_v46 = vsel %vm2188_vm15, %v2191_v41, %v2194_v56  ;;  %v2416_v56 = vpop.permute.xlu0 %2415 }
 0xcca   :  { %v2092_v19 = vsel %vm2082_vm0, nan, %v2091_v12  ;;  %v2196_v49 = vsel %vm2082_vm0, nan, %v2195_v46  ;;  %v1961_v41 = vfloor.f32 %v1960_v9 }
 0xccb   :  { %v2198_v13 = vrot.slane %v2196_v49, 6 }
 0xccd   :  { %v2200_v52 = vsel %vm332_vm6, %v2092_v19, %v2198_v13 }
 0xcce   :  { %v2201_v14 = vsel %vm334_vm7, %v2200_v52, 0.0 }
 0xccf   :  { %v2202_v15 = vpack.c.bf16 %v2201_v14, %v2201_v14  ;;  %v1962_v14 = vmul.f32 6.2831855, %v1961_v41 }
 0xcd1   :  { %2856 = vmatprep.subr.msk.bf16.mxu1 %vm334_vm7, %v2202_v15  ;;  %v2248_v17 = vsel %vm334_vm7, %v2202_v15, 0  ;;  %v1963_v50 = vsub.f32 %v1959_v8, %v1962_v14 }
 0xcd2   :  { %2832 = vmatpush3.bf16.msra.mxu1 %v2248_v17 }
 0xcd3   :  { %2845 = vmatprep.subr.bf16.mxu1 %v3068_v34 }
 0xcd5   :  { %2834 = vmatmul.mubr.msk.bf16.vlgmr.msra.gmra.mrb[16].mxu1 %vm375_vm2, %v2903_v18  ;;  %vm1964_vm2 = vcmp.lt.f32.partialorder %v1963_v50, 0.0 }
 0xcd6   :  { %2849 = vmatprep.mubr.msk.bf16.mxu1 %vm3069_vm9, %v3068_v34 }
 0xda8   :  { %v2835_v36 = vpop.f32.mrb[16].mxu1 }
 0xda9   :  { %v2293_v23 = vadd.f32 %v2835_v36, %v2224_v22  ;;  %v2284_v38 = vpop.f32.mrb[17].mxu1  ;;  %v1965_v22 = vadd.f32 6.2831855, %v1963_v50 }
 0xdaa   :  { %v2285_v26 = vadd.f32 %v2284_v38, %v2214_v21  ;;  %v2836_v28 = vpop.f32.mrb[18].mxu1 }
 0xdab   :  { %3025 = vtanh.f32 %v2293_v23  ;;  %v2296_v59 = vadd.f32 %v2836_v28, %v2229_v25  ;;  %v2287_v29 = vpop.f32.mrb[19].mxu1  ;;  %v1966_v38 = vsel %vm1964_vm2, %v1965_v22, %v1963_v50 }
 0xdac   :  { %3027 = vtanh.f32 %v2285_v26  ;;  %v2288_v30 = vadd.f32 %v2287_v29, %v2219_v20 }
 0xdad   :  { %3029 = vtanh.f32 %v2296_v59  ;;  %v2700_v59 = vadd.f32 -6.2831855, %v1966_v38 }
 0xdae   :  { %3031 = vtanh.f32 %v2288_v30 }
 0xdb5   :  { %v3026_v37 = vpop.eup %3025 }
 0xdb6   :  { %v3028_v42 = vpop.eup %3027 }
 0xdb7   :  { %v3030_v44 = vpop.eup %3029 }
 0xdb8   :  { %v3032_v39 = vpop.eup %3031  ;;  %v2304_v48 = vpack.c.bf16 %v3030_v44, %v3026_v37  ;;  %v2494_v37 = vsub.s32 4, %v3308_v33 }
 0xdb9   :  { %v2303_v31 = vpack.c.bf16 %v3032_v39, %v3028_v42 }
 0xdbb   :  { %2837 = vmatprep.subr.bf16.mxu0 %v2303_v31 }
 0xdbc   :  { %2838 = vmatpush3.bf16.msra.mxu0 %v2303_v31 }
 0xdbd   :  { %2839 = vmatprep.subr.bf16.mxu0 %v2304_v48 }
 0xdc0   :  { %2840 = vmatpush3.bf16.msra.mxu0 %v2304_v48 }
 0xdc3   :  { %2842 = vmatmul.mubr.msk.bf16.vlgmr.msra.gmra.mrb[20].mxu0 %vm478_vm8, %v2905_v51 }
 0xe96   :  { %v2843_v58 = vpop.f32.mrb[20].mxu0 }
 0xe97   :  { %v2392_v57 = vadd.f32 %v2843_v58, %v2326_v54  ;;  %v2383_v60 = vpop.f32.mrb[21].mxu0 }
 0xe98   :  { %v2384_v62 = vadd.f32 %v2383_v60, %v2316_v45  ;;  %v2844_v35 = vpop.f32.mrb[22].mxu0 }
 0xe99   :  { %3033 = vtanh.f32 %v2392_v57  ;;  %v2395_v32 = vadd.f32 %v2844_v35, %v2331_v61  ;;  %v2386_v63 = vpop.f32.mrb[23].mxu0 }
 0xe9a   :  { %3035 = vtanh.f32 %v2384_v62  ;;  %v2387_v24 = vadd.f32 %v2386_v63, %v2321_v53 }
 0xe9b   :  { %3037 = vtanh.f32 %v2395_v32 }
 0xe9c   :  { %3039 = vtanh.f32 %v2387_v24 }
 0xea3   :  { %v3034_v1 = vpop.eup %3033 }
 0xea4   :  { %v3036_v2 = vpop.eup %3035 }
 0xea5   :  { %v3038_v3 = vpop.eup %3037 }
 0xea6   :  { %v3040_v4 = vpop.eup %3039  ;;  %v2403_v5 = vpack.c.bf16 %v3038_v3, %v3034_v1 }
 0xea7   :  { %v2402_v6 = vpack.c.bf16 %v3040_v4, %v3036_v2 }
 0xea9   :  { %2846 = vmatpush3.bf16.msra.mxu1 %v2402_v6 }
 0xeaa   :  { %2847 = vmatprep.subr.bf16.mxu1 %v3068_v34 }
 0xead   :  { %2848 = vmatpush3.bf16.msra.mxu1 %v2403_v5 }
 0xeb0   :  { %2850 = vmatmul.mubr.msk.bf16.vlgmr.msra.gmra.mrb[20].mxu1 %vm478_vm8, %v2906_v7  ;;  %vm1967_vm8 = vcmp.ge.f32.partialorder %v1966_v38, 6.2831855 }
 0xeb1   :  { %v3660_v29 = vsel %vm1967_vm8, %v2700_v59, %v1966_v38 }
 0xeb2   :  { %v2467_v30 = vmul.f32 0.15915494, %v3660_v29 }
 0xeb4   :  { %v2495_v39 = vrot.slane %v2467_v30, %v2494_v37 }
 0xf83   :  { %v2460_v47 = vpop.f32.mrb[20].mxu1 }
 0xf84   :  { %v2461_v40 = vadd.f32 %v2460_v47, %v2411_v10  ;;  %v2851_v27 = vpop.f32.mrb[21].mxu1 }
 0xf85   :  { %v2463_v43 = vpop.f32.mrb[22].mxu1 }
 0xf86   :  { %v2475_v12 = vand.u32 2147483647, %v2461_v40  ;;  %v2464_v46 = vadd.f32 %v2463_v43, %v2416_v56  ;;  %v2852_v34 = vpop.f32.mrb[23].mxu1  ;;  %v2477_v49 = vsub.f32 0.0, %v2461_v40  ;;  %v2484_v31 = vmax.f32 %v2461_v40, 0.0 }
 0xf87   :  { %v2573_v43 = vadd.f32 1.5707964, %v3558_v55 }
 0xf88   :  { %v2476_v19 = vsub.f32 0.0, %v2475_v12  ;;  %v2468_v13 = vsel %vm334_vm7, %v2464_v46, -inf }
 0xf89   :  { %v2469_v52 = vrot.slane %v2468_v13, 4  ;;  %v2574_v34 = vmul.f32 0.15915494, %v2573_v43 }
 0xf8a   :  { %v2479_v15 = vsel %vm334_vm7, %v2476_v19, %v2477_v49 }
 0xf8b   :  { %v2480_v11 = vmul.f32 1.442695, %v2479_v15  ;;  %v2470_v17 = vmax.f32 %v2468_v13, %v2469_v52  ;;  %v2575_v49 = vfloor.f32 %v2574_v34 }
 0xf8d   :  { %3041 = vpow2.f32 %v2480_v11  ;;  %v2471_v18 = vrot.slane %v2470_v17, 2  ;;  %v2576_v52 = vmul.f32 6.2831855, %v2575_v49 }
 0xf8f   :  { %v2472_v21 = vmax.f32 %v2470_v17, %v2471_v18  ;;  %v2577_v17 = vsub.f32 %v2573_v43, %v2576_v52 }
 0xf91   :  { %v2473_v20 = vrot.slane %v2472_v21, 1  ;;  %vm2578_vm9 = vcmp.lt.f32.partialorder %v2577_v17, 0.0 }
 0xf93   :  { %v2474_v36 = vmax.f32 %v2472_v21, %v2473_v20 }
 0xf95   :  { %v2478_v23 = vsub.f32 %v2464_v46, %v2474_v36  ;;  %v2579_v36 = vadd.f32 6.2831855, %v2577_v17 }
 0xf97   :  { %v3042_v25 = vpop.eup %3041  ;;  %v2482_v26 = vmul.f32 1.442695, %v2478_v23  ;;  %v2580_v59 = vsel %vm2578_vm9, %v2579_v36, %v2577_v17 }
 0xf98   :  { %v2485_v28 = vadd.f32 1.0, %v3042_v25  ;;  %vm2581_vm1 = vcmp.ge.f32.partialorder %v2580_v59, 6.2831855 }
 0xf99   :  { %3043 = vpow2.f32 %v2482_v26 }
 0xf9a   :  { %3045 = vlog2.f32 %v2485_v28 }
 0xf9b   :  { %3047 = vrcp.f32 %v2485_v28 }
 0xfa3   :  { %v3044_v42 = vpop.eup %3043 }
 0xfa4   :  { %v3046_v44 = vpop.eup %3045  ;;  %v2536_v58 = vsel %vm334_vm7, %v3044_v42, 0.0  ;;  %v2543_v14 = vmul.f32 0.96, %v3044_v42 }
 0xfa5   :  { %v3048_v48 = vpop.eup %3047  ;;  %v2487_v51 = vmul.f32 0.6931472, %v3046_v44  ;;  %v2537_v62 = vrot.slane %v2536_v58, 4  ;;  %v2719_v44 = vadd.f32 -6.2831855, %v2580_v59 }
 0xfa6   :  { %v2496_v45 = vsub.f32 %v2495_v39, %v3048_v48  ;;  %v2506_v53 = vsub.f32 1.0, %v3048_v48  ;;  %v2503_v63 = vrot.slane %v3048_v48, 4 }
 0xfa7   :  { %v2488_v54 = vadd.f32 %v2487_v51, %v2484_v31  ;;  %v2538_v3 = vadd.f32 %v2537_v62, %v2536_v58 }
 0xfa8   :  { %v2498_v60 = vrot.slane %v2496_v45, 4  ;;  %v2508_v61 = vrot.slane %v2506_v53, 4  ;;  %v3059_v45 = vld [vmem:[%s3729_s5] sm:$0xff] }
 0xfa9   :  { %v2489_v57 = vadd.f32 0.01, %v2488_v54  ;;  %v2539_v6 = vrot.slane %v2538_v3, 2  ;;  %v2595_v53 = vrot.slane %v3059_v45, 7  ;;  %v2583_v54 = vsel %vm2581_vm1, %v2719_v44, %v2580_v59 }
 0xfab   :  { %v2500_v35 = vmul.f32 %v2498_v60, %v2489_v57  ;;  %v2501_v32 = vsub.f32 0.0, %v2489_v57  ;;  %v2510_v24 = vmul.f32 %v2508_v61, %v2489_v57  ;;  %v2540_v7 = vadd.f32 %v2539_v6, %v2538_v3 }
 0xfac   :  { %v2597_v62 = vadd.f32 %v2595_v53, %v2583_v54 }
 0xfad   :  { %v2505_v33 = vmul.f32 %v2503_v63, %v2501_v32  ;;  %v2516_v1 = vmul.f32 0.5, %v2510_v24  ;;  %v2541_v8 = vrot.slane %v2540_v7, 1 }
 0xfaf   :  { %v2512_v2 = vrot.slane %v2505_v33, 4  ;;  %3049 = vtanh.f32 %v2516_v1  ;;  %v2542_v27 = vadd.f32 %v2541_v8, %v2540_v7  ;;  %v2721_v33 = vadd.f32 -3.1415927, %v2597_v62 }
 0xfb1   :  { %v2514_v4 = vsel %vm334_vm7, %v2500_v35, %v2512_v2  ;;  %v2599_v3 = vmul.f32 0.15915494, %v2721_v33 }
 0xfb2   :  { %v2515_v5 = vmul.f32 0.5, %v2514_v4 }
 0xfb3   :  { %v2600_v6 = vfloor.f32 %v2599_v3 }
 0xfb4   :  { %3051 = vtanh.f32 %v2515_v5 }
 0xfb5   :  { %3053 = vrcp.f32 %v2542_v27 }
 0xfb9   :  { %v3050_v9 = vpop.eup %3049 }
 0xfba   :  { %v2520_v40 = vadd.f32 1.0, %v3050_v9 }
 0xfbc   :  { %v2522_v41 = vmul.f32 0.5, %v2520_v40 }
 0xfbe   :  { %v3052_v10 = vpop.eup %3051 }
 0xfbf   :  { %v2519_v47 = vadd.f32 1.0, %v3052_v10  ;;  %v3054_v13 = vpop.eup %3053  ;;  %v2609_v10 = vrot.slane %v3059_v45, 6 }
 0xfc0   :  { %v2545_v11 = vmul.f32 %v3054_v13, %v2543_v14 }
 0xfc1   :  { %v2521_v56 = vmul.f32 0.5, %v2519_v47  ;;  %v2601_v47 = vmul.f32 6.2831855, %v2600_v6 }
 0xfc2   :  { %v2546_v55 = vadd.f32 0.01, %v2545_v11 }
 0xfc3   :  { %v2524_v12 = vrot.slane %v2521_v56, 4  ;;  %v2533_v15 = vsub.f32 1.0, %v2521_v56 }
 0xfc5   :  { %v2526_v46 = vsub.f32 %v2522_v41, %v2524_v12  ;;  %v2530_v18 = vsub.f32 %v2521_v56, %v2524_v12  ;;  %v2534_v20 = vmul.f32 %v2533_v15, %v2521_v56  ;;  %v2602_v12 = vsub.f32 %v2721_v33, %v2601_v47 }
 0xfc7   :  { %v2527_v19 = vmax.f32 %v2526_v46, 1e-06  ;;  %v2604_v49 = vadd.f32 6.2831855, %v2602_v12  ;;  %vm2603_vm5 = vcmp.lt.f32.partialorder %v2602_v12, 0.0 }
 0xfc9   :  { %3055 = vrcp.f32 %v2527_v19  ;;  %v2605_v14 = vsel %vm2603_vm5, %v2604_v49, %v2602_v12 }
 0xfca   :  { %v2722_v17 = vadd.f32 -6.2831855, %v2605_v14  ;;  %vm2606_vm10 = vcmp.ge.f32.partialorder %v2605_v14, 6.2831855 }
 0xfd3   :  { %v3056_v50 = vpop.eup %3055 }
 0xfd4   :  { %v2532_v21 = vmul.f32 %v3056_v50, %v2489_v57  ;;  %v2531_v22 = vmul.f32 %v3056_v50, %v2530_v18  ;;  %v2608_v50 = vsel %vm2606_vm10, %v2722_v17, %v2605_v14 }
 0xfd6   :  { %v2535_v23 = vmul.f32 %v2534_v20, %v2532_v21  ;;  %v2547_v38 = vmul.f32 %v2546_v55, %v2531_v22  ;;  %v2624_v22 = vrot.slane %v2608_v50, 3 }
 0xfd8   :  { %v2548_v25 = vsel %vm334_vm7, %v2547_v38, 0.0  ;;  %v2555_v26 = vmul.f32 %v2546_v55, %v2535_v23 }
 0xfd9   :  { %v2549_v28 = vrot.slane %v2548_v25, 4 }
 0xfda   :  { %v2556_v30 = vsel %vm334_vm7, %v2555_v26, 0.0 }
 0xfdb   :  { %v2550_v37 = vadd.f32 %v2549_v28, %v2548_v25  ;;  %v2557_v42 = vrot.slane %v2556_v30, 4 }
 0xfdd   :  { %v2551_v39 = vrot.slane %v2550_v37, 2  ;;  %v2558_v48 = vadd.f32 %v2557_v42, %v2556_v30 }
 0xfdf   :  { %v2552_v31 = vadd.f32 %v2551_v39, %v2550_v37  ;;  %v2559_v51 = vrot.slane %v2558_v48, 2 }
 0xfe1   :  { %v2553_v58 = vrot.slane %v2552_v31, 1  ;;  %v2560_v57 = vadd.f32 %v2559_v51, %v2558_v48 }
 0xfe3   :  { %v2554_v60 = vadd.f32 %v2553_v58, %v2552_v31  ;;  %v2561_v61 = vrot.slane %v2560_v57, 1 }
 0xfe5   :  { %v2562_v35 = vadd.f32 %v2561_v61, %v2560_v57  ;;  %v2563_v32 = vmul.f32 6.2831855, %v2554_v60 }
 0xfe7   :  { %v2564_v63 = vmax.f32 %v2562_v35, 1e-30  ;;  %v2567_v24 = vsel %vm82_vm12, %v2563_v32, %v3660_v29 }
 0xfe8   :  { %v2584_v1 = vadd.f32 1.5707964, %v2567_v24 }
 0xfe9   :  { %3057 = vlog2.f32 %v2564_v63 }
 0xfea   :  { %v2585_v2 = vmul.f32 0.15915494, %v2584_v1 }
 0xfec   :  { %v2586_v4 = vfloor.f32 %v2585_v2 }
 0xfee   :  { %v2587_v5 = vmul.f32 6.2831855, %v2586_v4 }
 0xff0   :  { %v2588_v7 = vsub.f32 %v2584_v1, %v2587_v5 }
 0xff2   :  { %vm2589_vm7 = vcmp.lt.f32.partialorder %v2588_v7, 0.0  ;;  %v2590_v8 = vadd.f32 6.2831855, %v2588_v7 }
 0xff3   :  { %v3058_v9 = vpop.eup %3057 }
 0xff4   :  { %v2566_v40 = vmul.f32 0.6931472, %v3058_v9  ;;  %v2591_v27 = vsel %vm2589_vm7, %v2590_v8, %v2588_v7 }
 0xff5   :  { %vm2592_vm4 = vcmp.ge.f32.partialorder %v2591_v27, 6.2831855  ;;  %v2720_v56 = vadd.f32 -6.2831855, %v2591_v27 }
 0xff6   :  { %v2568_v29 = vsel %vm82_vm12, %v2566_v40, 0.0 }
 0xff7   :  { %v2570_v43 = vrot.slane %v2568_v29, 1  ;;  %v2594_v41 = vsel %vm2592_vm4, %v2720_v56, %v2591_v27 }
 0xff8   :  { %v2611_v46 = vadd.f32 %v2609_v10, %v2594_v41 }
 0xff9   :  { %v2572_v34 = vadd.f32 %v2570_v43, %v3556_v16 }
 0xffa   :  { %v2723_v19 = vadd.f32 -3.1415927, %v2611_v46 }
 0xffb   :  { %v2630_v16 = vrot.slane %v2572_v34, 1 }
 0xffc   :  { %v2613_v13 = vmul.f32 0.15915494, %v2723_v19 }
 0xffe   :  { %v2614_v52 = vfloor.f32 %v2613_v13 }
0x1000   :  { %v2615_v15 = vmul.f32 6.2831855, %v2614_v52 }
0x1002   :  { %v2616_v11 = vsub.f32 %v2723_v19, %v2615_v15 }
0x1004   :  { %vm2617_vm11 = vcmp.lt.f32.partialorder %v2616_v11, 0.0  ;;  %v2618_v18 = vadd.f32 6.2831855, %v2616_v11 }
0x1006   :  { %v2619_v0 = vsel %vm2617_vm11, %v2618_v18, %v2616_v11 }
0x1007   :  { %vm2620_vm12 = vcmp.ge.f32.partialorder %v2619_v0, 6.2831855  ;;  %v2724_v21 = vadd.f32 -6.2831855, %v2619_v0 }
0x1009   :  { %v2622_v20 = vsel %vm2620_vm12, %v2724_v21, %v2619_v0 }
0x100a   :  { %v2627_v55 = vrot.slane %v2622_v20, 3 }
0x100c   :  { %v2632_v36 = vsel %vm120_vm3, %v2624_v22, %v2627_v55 }
0x100d   :  { %v2633_v23 = vsel %vm332_vm6, %v2632_v36, %v2630_v16 }
0x100e   :  { %2634 = vst [vmem:[%s3708_s25] sm:$0x7] %v2633_v23 }

</bundles_post_ra>
